<compile_context>
chip_gen: v5e
topology: v5e:2x2
jax: 0.10.0
libtpu: 0.0.40
codegen_flags: <defaults>
</compile_context>

<pallas_src>
import math

import jax
import jax.numpy as jnp
from jax.experimental import pallas as pl
from jax.experimental.pallas import tpu as pltpu


def _round_up(x, m):
    return ((x + m - 1) // m) * m


# --------------------------------------------------------------------------
# Fused decoder kernel (GRU layers + eval-mode dropout + linear)
# --------------------------------------------------------------------------
def _make_decoder_kernel(num_layers, B, T):
    n_in = 4 + 4 * num_layers  # x, h0, 4 params per layer, lin_w, lin_b

    def kernel(*refs):
        x_ref, h0_ref = refs[0], refs[1]
        layer_refs = refs[2:2 + 4 * num_layers]
        lw_ref, lb_ref = refs[2 + 4 * num_layers], refs[3 + 4 * num_layers]
        out_ref, hout_ref, y_scr = refs[n_in], refs[n_in + 1], refs[n_in + 2]

        Hp = y_scr.shape[-1]            # padded hidden width (multiple of 128)
        G = 3 * Hp                      # fused r|z|n gate width
        BT = B * T

        # Layer-0 input: (B*T, Din), rows ordered b*T + t (batch_first, no transpose).
        x_cur = x_ref[...]

        for layer in range(num_layers):
            wih_ref, whh_ref, bih_ref, bhh_ref = layer_refs[4 * layer:4 * layer + 4]

            # Hoisted input projection: all timesteps x all 3 gates in ONE matmul,
            # with b_ih folded in.  Only h @ W_hh is left inside the recurrence.
            gx = jnp.dot(x_cur, wih_ref[...],
                         preferred_element_type=jnp.float32) + bih_ref[...]
            gx3 = gx.reshape(B, T, G)                       # (B, T, 3*Hp)

            # Loop-invariant loads / broadcasts hoisted out of the serial chain.
            whh = whh_ref[...]                              # (Hp, 3*Hp)
            bhh = jnp.broadcast_to(bhh_ref[...], (B, G))    # (B, 3*Hp)

            h = h0_ref[layer]                               # (B, Hp)
            for t in range(T):                              # small static T: fully unrolled
                g_t = gx3[:, t, :]                          # (B, 3*Hp), precomputed x-gates
                gh = jnp.dot(h, whh,
                             preferred_element_type=jnp.float32) + bhh
                r = jax.nn.sigmoid(g_t[:, :Hp] + gh[:, :Hp])
                z = jax.nn.sigmoid(g_t[:, Hp:2 * Hp] + gh[:, Hp:2 * Hp])
                n = jnp.tanh(g_t[:, 2 * Hp:] + r * gh[:, 2 * Hp:])
                h = (1.0 - z) * n + z * h
                y_scr[:, t, :] = h                          # lane-dense (Hp=128) store
            hout_ref[layer] = h
            x_cur = y_scr[...].reshape(BT, Hp)              # input to next layer / linear

        # nn.Dropout(p=0.5) is identity in eval mode.
        # TODO(synk): training-mode stochastic dropout (torch RNG) not reproduced.
        out_ref[...] = (jnp.dot(x_cur, lw_ref[...],
                                preferred_element_type=jnp.float32)
                        + lb_ref[...]).astype(out_ref.dtype)

    return kernel


# --------------------------------------------------------------------------
# Parameter init: PyTorch-style GRU/Linear ranges, stored fused (r|z|n) and
# zero-padded to lane-dense widths (H -> Hp, output_size -> Op).
# Zero padding keeps the padded lanes exactly zero through the recurrence, so
# the real lanes match the unpadded math bit-for-bit (up to MXU rounding).
# --------------------------------------------------------------------------
def init_decoder_params(key, hidden_size, output_size, num_layers):
    H = output_size * 30
    Hp = _round_up(H, 128)
    Op = _round_up(max(output_size, 1), 128)
    k = 1.0 / math.sqrt(H)

    layers = []
    for layer in range(num_layers):
        din = hidden_size if layer == 0 else H
        din_p = hidden_size if layer == 0 else Hp
        key, k1, k2, k3, k4 = jax.random.split(key, 5)
        wih = jax.random.uniform(k1, (3, din, H), jnp.float32, -k, k)
        whh = jax.random.uniform(k2, (3, H, H), jnp.float32, -k, k)
        bih = jax.random.uniform(k3, (3, H), jnp.float32, -k, k)
        bhh = jax.random.uniform(k4, (3, H), jnp.float32, -k, k)

        wih_f = jnp.zeros((din_p, 3 * Hp), jnp.float32)
        whh_f = jnp.zeros((Hp, 3 * Hp), jnp.float32)
        bih_f = jnp.zeros((1, 3 * Hp), jnp.float32)
        bhh_f = jnp.zeros((1, 3 * Hp), jnp.float32)
        for g in range(3):           # gate g occupies lanes [g*Hp, g*Hp + H)
            wih_f = wih_f.at[:din, g * Hp:g * Hp + H].set(wih[g])
            whh_f = whh_f.at[:H, g * Hp:g * Hp + H].set(whh[g])
            bih_f = bih_f.at[0, g * Hp:g * Hp + H].set(bih[g])
            bhh_f = bhh_f.at[0, g * Hp:g * Hp + H].set(bhh[g])
        layers.append({"wih": wih_f, "whh": whh_f, "bih": bih_f, "bhh": bhh_f})

    key, k1, k2 = jax.random.split(key, 3)
    lw = jax.random.uniform(k1, (H, output_size), jnp.float32, -k, k)
    lb = jax.random.uniform(k2, (output_size,), jnp.float32, -k, k)
    lin_w = jnp.zeros((Hp, Op), jnp.float32).at[:H, :output_size].set(lw)
    lin_b = jnp.zeros((1, Op), jnp.float32).at[0, :output_size].set(lb)

    return {"layers": layers, "lin_w": lin_w, "lin_b": lin_b,
            "H": H, "Hp": Hp, "output_size": output_size, "Op": Op,
            "hidden_size": hidden_size}


# --------------------------------------------------------------------------
# Forward wrapper: single pallas_call for the whole decoder.
#   encoded_input: (B, T, hidden_size)   hidden: (num_layers, B, H)
#   returns decoded (B, T, output_size), hidden_out (num_layers, B, H)
# --------------------------------------------------------------------------
def decoder_rnn_forward(params, encoded_input, hidden):
    B, T, Din = encoded_input.shape
    L = len(params["layers"])
    H, Hp = params["H"], params["Hp"]
    O, Op = params["output_size"], params["Op"]

    x2d = encoded_input.reshape(B * T, Din).astype(jnp.float32)   # metadata reshape only
    h0 = jnp.pad(hidden.astype(jnp.float32),
                 ((0, 0), (0, 0), (0, Hp - hidden.shape[-1])))

    flat = [x2d, h0]
    for lp in params["layers"]:
        flat += [lp["wih"], lp["whh"], lp["bih"], lp["bhh"]]
    flat += [params["lin_w"], params["lin_b"]]

    vmem = pl.BlockSpec(memory_space=pltpu.MemorySpace.VMEM)
    out2d, hout = pl.pallas_call(
        _make_decoder_kernel(L, B, T),
        out_shape=(jax.ShapeDtypeStruct((B * T, Op), jnp.float32),
                   jax.ShapeDtypeStruct((L, B, Hp), jnp.float32)),
        in_specs=[vmem] * len(flat),
        out_specs=(vmem, vmem),
        scratch_shapes=[pltpu.VMEM((B, T, Hp), jnp.float32)],
    )(*flat)

    decoded = out2d.reshape(B, T, Op)[:, :, :O]    # drop lane padding 128 -> output_size
    hidden_out = hout[:, :, :H]                    # drop lane padding 128 -> H
    return decoded, hidden_out


if __name__ == "__main__":
    hidden_size, output_size, num_layers = 32, 4, 2
    B, T = 2, 8
    H = output_size * 30  # 120

    key = jax.random.PRNGKey(0)
    kp, kx, kh = jax.random.split(key, 3)
    params = init_decoder_params(kp, hidden_size, output_size, num_layers)
    encoded_input = jax.random.normal(kx, (B, T, hidden_size), jnp.float32)
    hidden0 = jax.random.normal(kh, (num_layers, B, H), jnp.float32)

    decoded, hidden_out = decoder_rnn_forward(params, encoded_input, hidden0)
    jax.block_until_ready((decoded, hidden_out))

    assert decoded.shape == (B, T, output_size)
    assert hidden_out.shape == (num_layers, B, H)
    assert bool(jnp.all(jnp.isfinite(decoded)))
    assert bool(jnp.all(jnp.isfinite(hidden_out)))
    print("KERNEL_OK")
</pallas_src>

<mosaic_0001>
module attributes {stable_mosaic.version = 11 : i64} {
  func.func @kernel(%arg0: memref<16x32xf32, #tpu.memory_space<vmem>>, %arg1: memref<2x2x128xf32, #tpu.memory_space<vmem>>, %arg2: memref<32x384xf32, #tpu.memory_space<vmem>>, %arg3: memref<128x384xf32, #tpu.memory_space<vmem>>, %arg4: memref<1x384xf32, #tpu.memory_space<vmem>>, %arg5: memref<1x384xf32, #tpu.memory_space<vmem>>, %arg6: memref<128x384xf32, #tpu.memory_space<vmem>>, %arg7: memref<128x384xf32, #tpu.memory_space<vmem>>, %arg8: memref<1x384xf32, #tpu.memory_space<vmem>>, %arg9: memref<1x384xf32, #tpu.memory_space<vmem>>, %arg10: memref<128x128xf32, #tpu.memory_space<vmem>>, %arg11: memref<1x128xf32, #tpu.memory_space<vmem>>, %arg12: memref<16x128xf32, #tpu.memory_space<vmem>>, %arg13: memref<2x2x128xf32, #tpu.memory_space<vmem>>, %arg14: memref<2x8x128xf32, #tpu.memory_space<vmem>>) attributes {dimension_semantics = [], scalar_prefetch = 0 : i64, scratch_operands = 1 : i64, tpu.core_type = #tpu.core_type<tc>} {
    %c0 = arith.constant 0 : index
    %c0_0 = arith.constant 0 : index
    %0 = vector.load %arg0[%c0, %c0_0] : memref<16x32xf32, #tpu.memory_space<vmem>>, vector<16x32xf32>
    %c0_1 = arith.constant 0 : index
    %c0_2 = arith.constant 0 : index
    %1 = vector.load %arg2[%c0_1, %c0_2] : memref<32x384xf32, #tpu.memory_space<vmem>>, vector<32x384xf32>
    %cst = arith.constant dense<0.000000e+00> : vector<16x384xf32>
    %2 = tpu.matmul %0, %1, %cst {dimension_numbers = #tpu.dot_dimension_numbers<[1], [0], [0], [1], [0, 0, 1, 1], [], []>} : vector<16x32xf32>, vector<32x384xf32>, vector<16x384xf32> -> vector<16x384xf32>
    %c0_3 = arith.constant 0 : index
    %c0_4 = arith.constant 0 : index
    %3 = vector.load %arg4[%c0_3, %c0_4] : memref<1x384xf32, #tpu.memory_space<vmem>>, vector<1x384xf32>
    %4 = vector.broadcast %3 : vector<1x384xf32> to vector<16x384xf32>
    %5 = arith.addf %2, %4 : vector<16x384xf32>
    %6 = vector.shape_cast %5 : vector<16x384xf32> to vector<2x8x384xf32>
    %c0_5 = arith.constant 0 : index
    %c0_6 = arith.constant 0 : index
    %7 = vector.load %arg3[%c0_5, %c0_6] : memref<128x384xf32, #tpu.memory_space<vmem>>, vector<128x384xf32>
    %c0_7 = arith.constant 0 : index
    %c0_8 = arith.constant 0 : index
    %8 = vector.load %arg5[%c0_7, %c0_8] : memref<1x384xf32, #tpu.memory_space<vmem>>, vector<1x384xf32>
    %9 = vector.shape_cast %8 : vector<1x384xf32> to vector<1x384xf32>
    %10 = vector.broadcast %9 : vector<1x384xf32> to vector<2x384xf32>
    %c0_9 = arith.constant 0 : index
    %c0_10 = arith.constant 0 : index
    %c0_11 = arith.constant 0 : index
    %11 = vector.load %arg1[%c0_9, %c0_10, %c0_11] : memref<2x2x128xf32, #tpu.memory_space<vmem>>, vector<1x2x128xf32>
    %12 = vector.shape_cast %11 : vector<1x2x128xf32> to vector<2x128xf32>
    %13 = vector.extract_strided_slice %6 {offsets = [0, 0, 0], sizes = [2, 1, 384], strides = [1, 1, 1]} : vector<2x8x384xf32> to vector<2x1x384xf32>
    %14 = vector.shape_cast %13 : vector<2x1x384xf32> to vector<2x384xf32>
    %cst_12 = arith.constant dense<0.000000e+00> : vector<2x384xf32>
    %15 = tpu.matmul %12, %7, %cst_12 {dimension_numbers = #tpu.dot_dimension_numbers<[1], [0], [0], [1], [0, 0, 1, 1], [], []>} : vector<2x128xf32>, vector<128x384xf32>, vector<2x384xf32> -> vector<2x384xf32>
    %16 = arith.addf %15, %10 : vector<2x384xf32>
    %17 = vector.extract_strided_slice %14 {offsets = [0, 0], sizes = [2, 128], strides = [1, 1]} : vector<2x384xf32> to vector<2x128xf32>
    %18 = vector.extract_strided_slice %16 {offsets = [0, 0], sizes = [2, 128], strides = [1, 1]} : vector<2x384xf32> to vector<2x128xf32>
    %19 = arith.addf %17, %18 : vector<2x128xf32>
    %20 = arith.negf %19 : vector<2x128xf32>
    %21 = math.exp %20 : vector<2x128xf32>
    %cst_13 = arith.constant 1.000000e+00 : f32
    %22 = vector.broadcast %cst_13 : f32 to vector<2x128xf32>
    %23 = arith.addf %22, %21 : vector<2x128xf32>
    %24 = arith.divf %22, %23 : vector<2x128xf32>
    %25 = vector.extract_strided_slice %14 {offsets = [0, 128], sizes = [2, 128], strides = [1, 1]} : vector<2x384xf32> to vector<2x128xf32>
    %26 = vector.extract_strided_slice %16 {offsets = [0, 128], sizes = [2, 128], strides = [1, 1]} : vector<2x384xf32> to vector<2x128xf32>
    %27 = arith.addf %25, %26 : vector<2x128xf32>
    %28 = arith.negf %27 : vector<2x128xf32>
    %29 = math.exp %28 : vector<2x128xf32>
    %cst_14 = arith.constant 1.000000e+00 : f32
    %30 = vector.broadcast %cst_14 : f32 to vector<2x128xf32>
    %31 = arith.addf %30, %29 : vector<2x128xf32>
    %32 = arith.divf %30, %31 : vector<2x128xf32>
    %33 = vector.extract_strided_slice %14 {offsets = [0, 256], sizes = [2, 128], strides = [1, 1]} : vector<2x384xf32> to vector<2x128xf32>
    %34 = vector.extract_strided_slice %16 {offsets = [0, 256], sizes = [2, 128], strides = [1, 1]} : vector<2x384xf32> to vector<2x128xf32>
    %35 = arith.mulf %24, %34 : vector<2x128xf32>
    %36 = arith.addf %33, %35 : vector<2x128xf32>
    %37 = math.tanh %36 : vector<2x128xf32>
    %cst_15 = arith.constant 1.000000e+00 : f32
    %38 = vector.broadcast %cst_15 : f32 to vector<2x128xf32>
    %39 = arith.subf %38, %32 : vector<2x128xf32>
    %40 = arith.mulf %39, %37 : vector<2x128xf32>
    %41 = arith.mulf %32, %12 : vector<2x128xf32>
    %42 = arith.addf %40, %41 : vector<2x128xf32>
    %c0_16 = arith.constant 0 : index
    %c0_17 = arith.constant 0 : index
    %c0_18 = arith.constant 0 : index
    %43 = vector.load %arg14[%c0_16, %c0_17, %c0_18] : memref<2x8x128xf32, #tpu.memory_space<vmem>>, vector<2x1x128xf32>
    %44 = vector.shape_cast %43 : vector<2x1x128xf32> to vector<2x128xf32>
    %45 = vector.shape_cast %42 : vector<2x128xf32> to vector<2x1x128xf32>
    tpu.vector_store %arg14[%c0_16, %c0_17, %c0_18], %45 {strides = array<i32>} : memref<2x8x128xf32, #tpu.memory_space<vmem>>, vector<2x1x128xf32>,
    %46 = vector.extract_strided_slice %6 {offsets = [0, 1, 0], sizes = [2, 1, 384], strides = [1, 1, 1]} : vector<2x8x384xf32> to vector<2x1x384xf32>
    %47 = vector.shape_cast %46 : vector<2x1x384xf32> to vector<2x384xf32>
    %cst_19 = arith.constant dense<0.000000e+00> : vector<2x384xf32>
    %48 = tpu.matmul %42, %7, %cst_19 {dimension_numbers = #tpu.dot_dimension_numbers<[1], [0], [0], [1], [0, 0, 1, 1], [], []>} : vector<2x128xf32>, vector<128x384xf32>, vector<2x384xf32> -> vector<2x384xf32>
    %49 = arith.addf %48, %10 : vector<2x384xf32>
    %50 = vector.extract_strided_slice %47 {offsets = [0, 0], sizes = [2, 128], strides = [1, 1]} : vector<2x384xf32> to vector<2x128xf32>
    %51 = vector.extract_strided_slice %49 {offsets = [0, 0], sizes = [2, 128], strides = [1, 1]} : vector<2x384xf32> to vector<2x128xf32>
    %52 = arith.addf %50, %51 : vector<2x128xf32>
    %53 = arith.negf %52 : vector<2x128xf32>
    %54 = math.exp %53 : vector<2x128xf32>
    %cst_20 = arith.constant 1.000000e+00 : f32
    %55 = vector.broadcast %cst_20 : f32 to vector<2x128xf32>
    %56 = arith.addf %55, %54 : vector<2x128xf32>
    %57 = arith.divf %55, %56 : vector<2x128xf32>
    %58 = vector.extract_strided_slice %47 {offsets = [0, 128], sizes = [2, 128], strides = [1, 1]} : vector<2x384xf32> to vector<2x128xf32>
    %59 = vector.extract_strided_slice %49 {offsets = [0, 128], sizes = [2, 128], strides = [1, 1]} : vector<2x384xf32> to vector<2x128xf32>
    %60 = arith.addf %58, %59 : vector<2x128xf32>
    %61 = arith.negf %60 : vector<2x128xf32>
    %62 = math.exp %61 : vector<2x128xf32>
    %cst_21 = arith.constant 1.000000e+00 : f32
    %63 = vector.broadcast %cst_21 : f32 to vector<2x128xf32>
    %64 = arith.addf %63, %62 : vector<2x128xf32>
    %65 = arith.divf %63, %64 : vector<2x128xf32>
    %66 = vector.extract_strided_slice %47 {offsets = [0, 256], sizes = [2, 128], strides = [1, 1]} : vector<2x384xf32> to vector<2x128xf32>
    %67 = vector.extract_strided_slice %49 {offsets = [0, 256], sizes = [2, 128], strides = [1, 1]} : vector<2x384xf32> to vector<2x128xf32>
    %68 = arith.mulf %57, %67 : vector<2x128xf32>
    %69 = arith.addf %66, %68 : vector<2x128xf32>
    %70 = math.tanh %69 : vector<2x128xf32>
    %cst_22 = arith.constant 1.000000e+00 : f32
    %71 = vector.broadcast %cst_22 : f32 to vector<2x128xf32>
    %72 = arith.subf %71, %65 : vector<2x128xf32>
    %73 = arith.mulf %72, %70 : vector<2x128xf32>
    %74 = arith.mulf %65, %42 : vector<2x128xf32>
    %75 = arith.addf %73, %74 : vector<2x128xf32>
    %c0_23 = arith.constant 0 : index
    %c1 = arith.constant 1 : index
    %c0_24 = arith.constant 0 : index
    %76 = vector.load %arg14[%c0_23, %c1, %c0_24] : memref<2x8x128xf32, #tpu.memory_space<vmem>>, vector<2x1x128xf32>
    %77 = vector.shape_cast %76 : vector<2x1x128xf32> to vector<2x128xf32>
    %78 = vector.shape_cast %75 : vector<2x128xf32> to vector<2x1x128xf32>
    tpu.vector_store %arg14[%c0_23, %c1, %c0_24], %78 {strides = array<i32>} : memref<2x8x128xf32, #tpu.memory_space<vmem>>, vector<2x1x128xf32>,
    %79 = vector.extract_strided_slice %6 {offsets = [0, 2, 0], sizes = [2, 1, 384], strides = [1, 1, 1]} : vector<2x8x384xf32> to vector<2x1x384xf32>
    %80 = vector.shape_cast %79 : vector<2x1x384xf32> to vector<2x384xf32>
    %cst_25 = arith.constant dense<0.000000e+00> : vector<2x384xf32>
    %81 = tpu.matmul %75, %7, %cst_25 {dimension_numbers = #tpu.dot_dimension_numbers<[1], [0], [0], [1], [0, 0, 1, 1], [], []>} : vector<2x128xf32>, vector<128x384xf32>, vector<2x384xf32> -> vector<2x384xf32>
    %82 = arith.addf %81, %10 : vector<2x384xf32>
    %83 = vector.extract_strided_slice %80 {offsets = [0, 0], sizes = [2, 128], strides = [1, 1]} : vector<2x384xf32> to vector<2x128xf32>
    %84 = vector.extract_strided_slice %82 {offsets = [0, 0], sizes = [2, 128], strides = [1, 1]} : vector<2x384xf32> to vector<2x128xf32>
    %85 = arith.addf %83, %84 : vector<2x128xf32>
    %86 = arith.negf %85 : vector<2x128xf32>
    %87 = math.exp %86 : vector<2x128xf32>
    %cst_26 = arith.constant 1.000000e+00 : f32
    %88 = vector.broadcast %cst_26 : f32 to vector<2x128xf32>
    %89 = arith.addf %88, %87 : vector<2x128xf32>
    %90 = arith.divf %88, %89 : vector<2x128xf32>
    %91 = vector.extract_strided_slice %80 {offsets = [0, 128], sizes = [2, 128], strides = [1, 1]} : vector<2x384xf32> to vector<2x128xf32>
    %92 = vector.extract_strided_slice %82 {offsets = [0, 128], sizes = [2, 128], strides = [1, 1]} : vector<2x384xf32> to vector<2x128xf32>
    %93 = arith.addf %91, %92 : vector<2x128xf32>
    %94 = arith.negf %93 : vector<2x128xf32>
    %95 = math.exp %94 : vector<2x128xf32>
    %cst_27 = arith.constant 1.000000e+00 : f32
    %96 = vector.broadcast %cst_27 : f32 to vector<2x128xf32>
    %97 = arith.addf %96, %95 : vector<2x128xf32>
    %98 = arith.divf %96, %97 : vector<2x128xf32>
    %99 = vector.extract_strided_slice %80 {offsets = [0, 256], sizes = [2, 128], strides = [1, 1]} : vector<2x384xf32> to vector<2x128xf32>
    %100 = vector.extract_strided_slice %82 {offsets = [0, 256], sizes = [2, 128], strides = [1, 1]} : vector<2x384xf32> to vector<2x128xf32>
    %101 = arith.mulf %90, %100 : vector<2x128xf32>
    %102 = arith.addf %99, %101 : vector<2x128xf32>
    %103 = math.tanh %102 : vector<2x128xf32>
    %cst_28 = arith.constant 1.000000e+00 : f32
    %104 = vector.broadcast %cst_28 : f32 to vector<2x128xf32>
    %105 = arith.subf %104, %98 : vector<2x128xf32>
    %106 = arith.mulf %105, %103 : vector<2x128xf32>
    %107 = arith.mulf %98, %75 : vector<2x128xf32>
    %108 = arith.addf %106, %107 : vector<2x128xf32>
    %c0_29 = arith.constant 0 : index
    %c2 = arith.constant 2 : index
    %c0_30 = arith.constant 0 : index
    %109 = vector.load %arg14[%c0_29, %c2, %c0_30] : memref<2x8x128xf32, #tpu.memory_space<vmem>>, vector<2x1x128xf32>
    %110 = vector.shape_cast %109 : vector<2x1x128xf32> to vector<2x128xf32>
    %111 = vector.shape_cast %108 : vector<2x128xf32> to vector<2x1x128xf32>
    tpu.vector_store %arg14[%c0_29, %c2, %c0_30], %111 {strides = array<i32>} : memref<2x8x128xf32, #tpu.memory_space<vmem>>, vector<2x1x128xf32>,
    %112 = vector.extract_strided_slice %6 {offsets = [0, 3, 0], sizes = [2, 1, 384], strides = [1, 1, 1]} : vector<2x8x384xf32> to vector<2x1x384xf32>
    %113 = vector.shape_cast %112 : vector<2x1x384xf32> to vector<2x384xf32>
    %cst_31 = arith.constant dense<0.000000e+00> : vector<2x384xf32>
    %114 = tpu.matmul %108, %7, %cst_31 {dimension_numbers = #tpu.dot_dimension_numbers<[1], [0], [0], [1], [0, 0, 1, 1], [], []>} : vector<2x128xf32>, vector<128x384xf32>, vector<2x384xf32> -> vector<2x384xf32>
    %115 = arith.addf %114, %10 : vector<2x384xf32>
    %116 = vector.extract_strided_slice %113 {offsets = [0, 0], sizes = [2, 128], strides = [1, 1]} : vector<2x384xf32> to vector<2x128xf32>
    %117 = vector.extract_strided_slice %115 {offsets = [0, 0], sizes = [2, 128], strides = [1, 1]} : vector<2x384xf32> to vector<2x128xf32>
    %118 = arith.addf %116, %117 : vector<2x128xf32>
    %119 = arith.negf %118 : vector<2x128xf32>
    %120 = math.exp %119 : vector<2x128xf32>
    %cst_32 = arith.constant 1.000000e+00 : f32
    %121 = vector.broadcast %cst_32 : f32 to vector<2x128xf32>
    %122 = arith.addf %121, %120 : vector<2x128xf32>
    %123 = arith.divf %121, %122 : vector<2x128xf32>
    %124 = vector.extract_strided_slice %113 {offsets = [0, 128], sizes = [2, 128], strides = [1, 1]} : vector<2x384xf32> to vector<2x128xf32>
    %125 = vector.extract_strided_slice %115 {offsets = [0, 128], sizes = [2, 128], strides = [1, 1]} : vector<2x384xf32> to vector<2x128xf32>
    %126 = arith.addf %124, %125 : vector<2x128xf32>
    %127 = arith.negf %126 : vector<2x128xf32>
    %128 = math.exp %127 : vector<2x128xf32>
    %cst_33 = arith.constant 1.000000e+00 : f32
    %129 = vector.broadcast %cst_33 : f32 to vector<2x128xf32>
    %130 = arith.addf %129, %128 : vector<2x128xf32>
    %131 = arith.divf %129, %130 : vector<2x128xf32>
    %132 = vector.extract_strided_slice %113 {offsets = [0, 256], sizes = [2, 128], strides = [1, 1]} : vector<2x384xf32> to vector<2x128xf32>
    %133 = vector.extract_strided_slice %115 {offsets = [0, 256], sizes = [2, 128], strides = [1, 1]} : vector<2x384xf32> to vector<2x128xf32>
    %134 = arith.mulf %123, %133 : vector<2x128xf32>
    %135 = arith.addf %132, %134 : vector<2x128xf32>
    %136 = math.tanh %135 : vector<2x128xf32>
    %cst_34 = arith.constant 1.000000e+00 : f32
    %137 = vector.broadcast %cst_34 : f32 to vector<2x128xf32>
    %138 = arith.subf %137, %131 : vector<2x128xf32>
    %139 = arith.mulf %138, %136 : vector<2x128xf32>
    %140 = arith.mulf %131, %108 : vector<2x128xf32>
    %141 = arith.addf %139, %140 : vector<2x128xf32>
    %c0_35 = arith.constant 0 : index
    %c3 = arith.constant 3 : index
    %c0_36 = arith.constant 0 : index
    %142 = vector.load %arg14[%c0_35, %c3, %c0_36] : memref<2x8x128xf32, #tpu.memory_space<vmem>>, vector<2x1x128xf32>
    %143 = vector.shape_cast %142 : vector<2x1x128xf32> to vector<2x128xf32>
    %144 = vector.shape_cast %141 : vector<2x128xf32> to vector<2x1x128xf32>
    tpu.vector_store %arg14[%c0_35, %c3, %c0_36], %144 {strides = array<i32>} : memref<2x8x128xf32, #tpu.memory_space<vmem>>, vector<2x1x128xf32>,
    %145 = vector.extract_strided_slice %6 {offsets = [0, 4, 0], sizes = [2, 1, 384], strides = [1, 1, 1]} : vector<2x8x384xf32> to vector<2x1x384xf32>
    %146 = vector.shape_cast %145 : vector<2x1x384xf32> to vector<2x384xf32>
    %cst_37 = arith.constant dense<0.000000e+00> : vector<2x384xf32>
    %147 = tpu.matmul %141, %7, %cst_37 {dimension_numbers = #tpu.dot_dimension_numbers<[1], [0], [0], [1], [0, 0, 1, 1], [], []>} : vector<2x128xf32>, vector<128x384xf32>, vector<2x384xf32> -> vector<2x384xf32>
    %148 = arith.addf %147, %10 : vector<2x384xf32>
    %149 = vector.extract_strided_slice %146 {offsets = [0, 0], sizes = [2, 128], strides = [1, 1]} : vector<2x384xf32> to vector<2x128xf32>
    %150 = vector.extract_strided_slice %148 {offsets = [0, 0], sizes = [2, 128], strides = [1, 1]} : vector<2x384xf32> to vector<2x128xf32>
    %151 = arith.addf %149, %150 : vector<2x128xf32>
    %152 = arith.negf %151 : vector<2x128xf32>
    %153 = math.exp %152 : vector<2x128xf32>
    %cst_38 = arith.constant 1.000000e+00 : f32
    %154 = vector.broadcast %cst_38 : f32 to vector<2x128xf32>
    %155 = arith.addf %154, %153 : vector<2x128xf32>
    %156 = arith.divf %154, %155 : vector<2x128xf32>
    %157 = vector.extract_strided_slice %146 {offsets = [0, 128], sizes = [2, 128], strides = [1, 1]} : vector<2x384xf32> to vector<2x128xf32>
    %158 = vector.extract_strided_slice %148 {offsets = [0, 128], sizes = [2, 128], strides = [1, 1]} : vector<2x384xf32> to vector<2x128xf32>
    %159 = arith.addf %157, %158 : vector<2x128xf32>
    %160 = arith.negf %159 : vector<2x128xf32>
    %161 = math.exp %160 : vector<2x128xf32>
    %cst_39 = arith.constant 1.000000e+00 : f32
    %162 = vector.broadcast %cst_39 : f32 to vector<2x128xf32>
    %163 = arith.addf %162, %161 : vector<2x128xf32>
    %164 = arith.divf %162, %163 : vector<2x128xf32>
    %165 = vector.extract_strided_slice %146 {offsets = [0, 256], sizes = [2, 128], strides = [1, 1]} : vector<2x384xf32> to vector<2x128xf32>
    %166 = vector.extract_strided_slice %148 {offsets = [0, 256], sizes = [2, 128], strides = [1, 1]} : vector<2x384xf32> to vector<2x128xf32>
    %167 = arith.mulf %156, %166 : vector<2x128xf32>
    %168 = arith.addf %165, %167 : vector<2x128xf32>
    %169 = math.tanh %168 : vector<2x128xf32>
    %cst_40 = arith.constant 1.000000e+00 : f32
    %170 = vector.broadcast %cst_40 : f32 to vector<2x128xf32>
    %171 = arith.subf %170, %164 : vector<2x128xf32>
    %172 = arith.mulf %171, %169 : vector<2x128xf32>
    %173 = arith.mulf %164, %141 : vector<2x128xf32>
    %174 = arith.addf %172, %173 : vector<2x128xf32>
    %c0_41 = arith.constant 0 : index
    %c4 = arith.constant 4 : index
    %c0_42 = arith.constant 0 : index
    %175 = vector.load %arg14[%c0_41, %c4, %c0_42] : memref<2x8x128xf32, #tpu.memory_space<vmem>>, vector<2x1x128xf32>
    %176 = vector.shape_cast %175 : vector<2x1x128xf32> to vector<2x128xf32>
    %177 = vector.shape_cast %174 : vector<2x128xf32> to vector<2x1x128xf32>
    tpu.vector_store %arg14[%c0_41, %c4, %c0_42], %177 {strides = array<i32>} : memref<2x8x128xf32, #tpu.memory_space<vmem>>, vector<2x1x128xf32>,
    %178 = vector.extract_strided_slice %6 {offsets = [0, 5, 0], sizes = [2, 1, 384], strides = [1, 1, 1]} : vector<2x8x384xf32> to vector<2x1x384xf32>
    %179 = vector.shape_cast %178 : vector<2x1x384xf32> to vector<2x384xf32>
    %cst_43 = arith.constant dense<0.000000e+00> : vector<2x384xf32>
    %180 = tpu.matmul %174, %7, %cst_43 {dimension_numbers = #tpu.dot_dimension_numbers<[1], [0], [0], [1], [0, 0, 1, 1], [], []>} : vector<2x128xf32>, vector<128x384xf32>, vector<2x384xf32> -> vector<2x384xf32>
    %181 = arith.addf %180, %10 : vector<2x384xf32>
    %182 = vector.extract_strided_slice %179 {offsets = [0, 0], sizes = [2, 128], strides = [1, 1]} : vector<2x384xf32> to vector<2x128xf32>
    %183 = vector.extract_strided_slice %181 {offsets = [0, 0], sizes = [2, 128], strides = [1, 1]} : vector<2x384xf32> to vector<2x128xf32>
    %184 = arith.addf %182, %183 : vector<2x128xf32>
    %185 = arith.negf %184 : vector<2x128xf32>
    %186 = math.exp %185 : vector<2x128xf32>
    %cst_44 = arith.constant 1.000000e+00 : f32
    %187 = vector.broadcast %cst_44 : f32 to vector<2x128xf32>
    %188 = arith.addf %187, %186 : vector<2x128xf32>
    %189 = arith.divf %187, %188 : vector<2x128xf32>
    %190 = vector.extract_strided_slice %179 {offsets = [0, 128], sizes = [2, 128], strides = [1, 1]} : vector<2x384xf32> to vector<2x128xf32>
    %191 = vector.extract_strided_slice %181 {offsets = [0, 128], sizes = [2, 128], strides = [1, 1]} : vector<2x384xf32> to vector<2x128xf32>
    %192 = arith.addf %190, %191 : vector<2x128xf32>
    %193 = arith.negf %192 : vector<2x128xf32>
    %194 = math.exp %193 : vector<2x128xf32>
    %cst_45 = arith.constant 1.000000e+00 : f32
    %195 = vector.broadcast %cst_45 : f32 to vector<2x128xf32>
    %196 = arith.addf %195, %194 : vector<2x128xf32>
    %197 = arith.divf %195, %196 : vector<2x128xf32>
    %198 = vector.extract_strided_slice %179 {offsets = [0, 256], sizes = [2, 128], strides = [1, 1]} : vector<2x384xf32> to vector<2x128xf32>
    %199 = vector.extract_strided_slice %181 {offsets = [0, 256], sizes = [2, 128], strides = [1, 1]} : vector<2x384xf32> to vector<2x128xf32>
    %200 = arith.mulf %189, %199 : vector<2x128xf32>
    %201 = arith.addf %198, %200 : vector<2x128xf32>
    %202 = math.tanh %201 : vector<2x128xf32>
    %cst_46 = arith.constant 1.000000e+00 : f32
    %203 = vector.broadcast %cst_46 : f32 to vector<2x128xf32>
    %204 = arith.subf %203, %197 : vector<2x128xf32>
    %205 = arith.mulf %204, %202 : vector<2x128xf32>
    %206 = arith.mulf %197, %174 : vector<2x128xf32>
    %207 = arith.addf %205, %206 : vector<2x128xf32>
    %c0_47 = arith.constant 0 : index
    %c5 = arith.constant 5 : index
    %c0_48 = arith.constant 0 : index
    %208 = vector.load %arg14[%c0_47, %c5, %c0_48] : memref<2x8x128xf32, #tpu.memory_space<vmem>>, vector<2x1x128xf32>
    %209 = vector.shape_cast %208 : vector<2x1x128xf32> to vector<2x128xf32>
    %210 = vector.shape_cast %207 : vector<2x128xf32> to vector<2x1x128xf32>
    tpu.vector_store %arg14[%c0_47, %c5, %c0_48], %210 {strides = array<i32>} : memref<2x8x128xf32, #tpu.memory_space<vmem>>, vector<2x1x128xf32>,
    %211 = vector.extract_strided_slice %6 {offsets = [0, 6, 0], sizes = [2, 1, 384], strides = [1, 1, 1]} : vector<2x8x384xf32> to vector<2x1x384xf32>
    %212 = vector.shape_cast %211 : vector<2x1x384xf32> to vector<2x384xf32>
    %cst_49 = arith.constant dense<0.000000e+00> : vector<2x384xf32>
    %213 = tpu.matmul %207, %7, %cst_49 {dimension_numbers = #tpu.dot_dimension_numbers<[1], [0], [0], [1], [0, 0, 1, 1], [], []>} : vector<2x128xf32>, vector<128x384xf32>, vector<2x384xf32> -> vector<2x384xf32>
    %214 = arith.addf %213, %10 : vector<2x384xf32>
    %215 = vector.extract_strided_slice %212 {offsets = [0, 0], sizes = [2, 128], strides = [1, 1]} : vector<2x384xf32> to vector<2x128xf32>
    %216 = vector.extract_strided_slice %214 {offsets = [0, 0], sizes = [2, 128], strides = [1, 1]} : vector<2x384xf32> to vector<2x128xf32>
    %217 = arith.addf %215, %216 : vector<2x128xf32>
    %218 = arith.negf %217 : vector<2x128xf32>
    %219 = math.exp %218 : vector<2x128xf32>
    %cst_50 = arith.constant 1.000000e+00 : f32
    %220 = vector.broadcast %cst_50 : f32 to vector<2x128xf32>
    %221 = arith.addf %220, %219 : vector<2x128xf32>
    %222 = arith.divf %220, %221 : vector<2x128xf32>
    %223 = vector.extract_strided_slice %212 {offsets = [0, 128], sizes = [2, 128], strides = [1, 1]} : vector<2x384xf32> to vector<2x128xf32>
    %224 = vector.extract_strided_slice %214 {offsets = [0, 128], sizes = [2, 128], strides = [1, 1]} : vector<2x384xf32> to vector<2x128xf32>
    %225 = arith.addf %223, %224 : vector<2x128xf32>
    %226 = arith.negf %225 : vector<2x128xf32>
    %227 = math.exp %226 : vector<2x128xf32>
    %cst_51 = arith.constant 1.000000e+00 : f32
    %228 = vector.broadcast %cst_51 : f32 to vector<2x128xf32>
    %229 = arith.addf %228, %227 : vector<2x128xf32>
    %230 = arith.divf %228, %229 : vector<2x128xf32>
    %231 = vector.extract_strided_slice %212 {offsets = [0, 256], sizes = [2, 128], strides = [1, 1]} : vector<2x384xf32> to vector<2x128xf32>
    %232 = vector.extract_strided_slice %214 {offsets = [0, 256], sizes = [2, 128], strides = [1, 1]} : vector<2x384xf32> to vector<2x128xf32>
    %233 = arith.mulf %222, %232 : vector<2x128xf32>
    %234 = arith.addf %231, %233 : vector<2x128xf32>
    %235 = math.tanh %234 : vector<2x128xf32>
    %cst_52 = arith.constant 1.000000e+00 : f32
    %236 = vector.broadcast %cst_52 : f32 to vector<2x128xf32>
    %237 = arith.subf %236, %230 : vector<2x128xf32>
    %238 = arith.mulf %237, %235 : vector<2x128xf32>
    %239 = arith.mulf %230, %207 : vector<2x128xf32>
    %240 = arith.addf %238, %239 : vector<2x128xf32>
    %c0_53 = arith.constant 0 : index
    %c6 = arith.constant 6 : index
    %c0_54 = arith.constant 0 : index
    %241 = vector.load %arg14[%c0_53, %c6, %c0_54] : memref<2x8x128xf32, #tpu.memory_space<vmem>>, vector<2x1x128xf32>
    %242 = vector.shape_cast %241 : vector<2x1x128xf32> to vector<2x128xf32>
    %243 = vector.shape_cast %240 : vector<2x128xf32> to vector<2x1x128xf32>
    tpu.vector_store %arg14[%c0_53, %c6, %c0_54], %243 {strides = array<i32>} : memref<2x8x128xf32, #tpu.memory_space<vmem>>, vector<2x1x128xf32>,
    %244 = vector.extract_strided_slice %6 {offsets = [0, 7, 0], sizes = [2, 1, 384], strides = [1, 1, 1]} : vector<2x8x384xf32> to vector<2x1x384xf32>
    %245 = vector.shape_cast %244 : vector<2x1x384xf32> to vector<2x384xf32>
    %cst_55 = arith.constant dense<0.000000e+00> : vector<2x384xf32>
    %246 = tpu.matmul %240, %7, %cst_55 {dimension_numbers = #tpu.dot_dimension_numbers<[1], [0], [0], [1], [0, 0, 1, 1], [], []>} : vector<2x128xf32>, vector<128x384xf32>, vector<2x384xf32> -> vector<2x384xf32>
    %247 = arith.addf %246, %10 : vector<2x384xf32>
    %248 = vector.extract_strided_slice %245 {offsets = [0, 0], sizes = [2, 128], strides = [1, 1]} : vector<2x384xf32> to vector<2x128xf32>
    %249 = vector.extract_strided_slice %247 {offsets = [0, 0], sizes = [2, 128], strides = [1, 1]} : vector<2x384xf32> to vector<2x128xf32>
    %250 = arith.addf %248, %249 : vector<2x128xf32>
    %251 = arith.negf %250 : vector<2x128xf32>
    %252 = math.exp %251 : vector<2x128xf32>
    %cst_56 = arith.constant 1.000000e+00 : f32
    %253 = vector.broadcast %cst_56 : f32 to vector<2x128xf32>
    %254 = arith.addf %253, %252 : vector<2x128xf32>
    %255 = arith.divf %253, %254 : vector<2x128xf32>
    %256 = vector.extract_strided_slice %245 {offsets = [0, 128], sizes = [2, 128], strides = [1, 1]} : vector<2x384xf32> to vector<2x128xf32>
    %257 = vector.extract_strided_slice %247 {offsets = [0, 128], sizes = [2, 128], strides = [1, 1]} : vector<2x384xf32> to vector<2x128xf32>
    %258 = arith.addf %256, %257 : vector<2x128xf32>
    %259 = arith.negf %258 : vector<2x128xf32>
    %260 = math.exp %259 : vector<2x128xf32>
    %cst_57 = arith.constant 1.000000e+00 : f32
    %261 = vector.broadcast %cst_57 : f32 to vector<2x128xf32>
    %262 = arith.addf %261, %260 : vector<2x128xf32>
    %263 = arith.divf %261, %262 : vector<2x128xf32>
    %264 = vector.extract_strided_slice %245 {offsets = [0, 256], sizes = [2, 128], strides = [1, 1]} : vector<2x384xf32> to vector<2x128xf32>
    %265 = vector.extract_strided_slice %247 {offsets = [0, 256], sizes = [2, 128], strides = [1, 1]} : vector<2x384xf32> to vector<2x128xf32>
    %266 = arith.mulf %255, %265 : vector<2x128xf32>
    %267 = arith.addf %264, %266 : vector<2x128xf32>
    %268 = math.tanh %267 : vector<2x128xf32>
    %cst_58 = arith.constant 1.000000e+00 : f32
    %269 = vector.broadcast %cst_58 : f32 to vector<2x128xf32>
    %270 = arith.subf %269, %263 : vector<2x128xf32>
    %271 = arith.mulf %270, %268 : vector<2x128xf32>
    %272 = arith.mulf %263, %240 : vector<2x128xf32>
    %273 = arith.addf %271, %272 : vector<2x128xf32>
    %c0_59 = arith.constant 0 : index
    %c7 = arith.constant 7 : index
    %c0_60 = arith.constant 0 : index
    %274 = vector.load %arg14[%c0_59, %c7, %c0_60] : memref<2x8x128xf32, #tpu.memory_space<vmem>>, vector<2x1x128xf32>
    %275 = vector.shape_cast %274 : vector<2x1x128xf32> to vector<2x128xf32>
    %276 = vector.shape_cast %273 : vector<2x128xf32> to vector<2x1x128xf32>
    tpu.vector_store %arg14[%c0_59, %c7, %c0_60], %276 {strides = array<i32>} : memref<2x8x128xf32, #tpu.memory_space<vmem>>, vector<2x1x128xf32>,
    %c0_61 = arith.constant 0 : index
    %c0_62 = arith.constant 0 : index
    %c0_63 = arith.constant 0 : index
    %277 = vector.load %arg13[%c0_61, %c0_62, %c0_63] : memref<2x2x128xf32, #tpu.memory_space<vmem>>, vector<1x2x128xf32>
    %278 = vector.shape_cast %277 : vector<1x2x128xf32> to vector<2x128xf32>
    %279 = vector.shape_cast %273 : vector<2x128xf32> to vector<1x2x128xf32>
    tpu.vector_store %arg13[%c0_61, %c0_62, %c0_63], %279 {strides = array<i32>} : memref<2x2x128xf32, #tpu.memory_space<vmem>>, vector<1x2x128xf32>,
    %c0_64 = arith.constant 0 : index
    %c0_65 = arith.constant 0 : index
    %c0_66 = arith.constant 0 : index
    %280 = vector.load %arg14[%c0_64, %c0_65, %c0_66] : memref<2x8x128xf32, #tpu.memory_space<vmem>>, vector<2x8x128xf32>
    %281 = vector.shape_cast %280 : vector<2x8x128xf32> to vector<16x128xf32>
    %c0_67 = arith.constant 0 : index
    %c0_68 = arith.constant 0 : index
    %282 = vector.load %arg6[%c0_67, %c0_68] : memref<128x384xf32, #tpu.memory_space<vmem>>, vector<128x384xf32>
    %cst_69 = arith.constant dense<0.000000e+00> : vector<16x384xf32>
    %283 = tpu.matmul %281, %282, %cst_69 {dimension_numbers = #tpu.dot_dimension_numbers<[1], [0], [0], [1], [0, 0, 1, 1], [], []>} : vector<16x128xf32>, vector<128x384xf32>, vector<16x384xf32> -> vector<16x384xf32>
    %c0_70 = arith.constant 0 : index
    %c0_71 = arith.constant 0 : index
    %284 = vector.load %arg8[%c0_70, %c0_71] : memref<1x384xf32, #tpu.memory_space<vmem>>, vector<1x384xf32>
    %285 = vector.broadcast %284 : vector<1x384xf32> to vector<16x384xf32>
    %286 = arith.addf %283, %285 : vector<16x384xf32>
    %287 = vector.shape_cast %286 : vector<16x384xf32> to vector<2x8x384xf32>
    %c0_72 = arith.constant 0 : index
    %c0_73 = arith.constant 0 : index
    %288 = vector.load %arg7[%c0_72, %c0_73] : memref<128x384xf32, #tpu.memory_space<vmem>>, vector<128x384xf32>
    %c0_74 = arith.constant 0 : index
    %c0_75 = arith.constant 0 : index
    %289 = vector.load %arg9[%c0_74, %c0_75] : memref<1x384xf32, #tpu.memory_space<vmem>>, vector<1x384xf32>
    %290 = vector.shape_cast %289 : vector<1x384xf32> to vector<1x384xf32>
    %291 = vector.broadcast %290 : vector<1x384xf32> to vector<2x384xf32>
    %c1_76 = arith.constant 1 : index
    %c0_77 = arith.constant 0 : index
    %c0_78 = arith.constant 0 : index
    %292 = vector.load %arg1[%c1_76, %c0_77, %c0_78] : memref<2x2x128xf32, #tpu.memory_space<vmem>>, vector<1x2x128xf32>
    %293 = vector.shape_cast %292 : vector<1x2x128xf32> to vector<2x128xf32>
    %294 = vector.extract_strided_slice %287 {offsets = [0, 0, 0], sizes = [2, 1, 384], strides = [1, 1, 1]} : vector<2x8x384xf32> to vector<2x1x384xf32>
    %295 = vector.shape_cast %294 : vector<2x1x384xf32> to vector<2x384xf32>
    %cst_79 = arith.constant dense<0.000000e+00> : vector<2x384xf32>
    %296 = tpu.matmul %293, %288, %cst_79 {dimension_numbers = #tpu.dot_dimension_numbers<[1], [0], [0], [1], [0, 0, 1, 1], [], []>} : vector<2x128xf32>, vector<128x384xf32>, vector<2x384xf32> -> vector<2x384xf32>
    %297 = arith.addf %296, %291 : vector<2x384xf32>
    %298 = vector.extract_strided_slice %295 {offsets = [0, 0], sizes = [2, 128], strides = [1, 1]} : vector<2x384xf32> to vector<2x128xf32>
    %299 = vector.extract_strided_slice %297 {offsets = [0, 0], sizes = [2, 128], strides = [1, 1]} : vector<2x384xf32> to vector<2x128xf32>
    %300 = arith.addf %298, %299 : vector<2x128xf32>
    %301 = arith.negf %300 : vector<2x128xf32>
    %302 = math.exp %301 : vector<2x128xf32>
    %cst_80 = arith.constant 1.000000e+00 : f32
    %303 = vector.broadcast %cst_80 : f32 to vector<2x128xf32>
    %304 = arith.addf %303, %302 : vector<2x128xf32>
    %305 = arith.divf %303, %304 : vector<2x128xf32>
    %306 = vector.extract_strided_slice %295 {offsets = [0, 128], sizes = [2, 128], strides = [1, 1]} : vector<2x384xf32> to vector<2x128xf32>
    %307 = vector.extract_strided_slice %297 {offsets = [0, 128], sizes = [2, 128], strides = [1, 1]} : vector<2x384xf32> to vector<2x128xf32>
    %308 = arith.addf %306, %307 : vector<2x128xf32>
    %309 = arith.negf %308 : vector<2x128xf32>
    %310 = math.exp %309 : vector<2x128xf32>
    %cst_81 = arith.constant 1.000000e+00 : f32
    %311 = vector.broadcast %cst_81 : f32 to vector<2x128xf32>
    %312 = arith.addf %311, %310 : vector<2x128xf32>
    %313 = arith.divf %311, %312 : vector<2x128xf32>
    %314 = vector.extract_strided_slice %295 {offsets = [0, 256], sizes = [2, 128], strides = [1, 1]} : vector<2x384xf32> to vector<2x128xf32>
    %315 = vector.extract_strided_slice %297 {offsets = [0, 256], sizes = [2, 128], strides = [1, 1]} : vector<2x384xf32> to vector<2x128xf32>
    %316 = arith.mulf %305, %315 : vector<2x128xf32>
    %317 = arith.addf %314, %316 : vector<2x128xf32>
    %318 = math.tanh %317 : vector<2x128xf32>
    %cst_82 = arith.constant 1.000000e+00 : f32
    %319 = vector.broadcast %cst_82 : f32 to vector<2x128xf32>
    %320 = arith.subf %319, %313 : vector<2x128xf32>
    %321 = arith.mulf %320, %318 : vector<2x128xf32>
    %322 = arith.mulf %313, %293 : vector<2x128xf32>
    %323 = arith.addf %321, %322 : vector<2x128xf32>
    %c0_83 = arith.constant 0 : index
    %c0_84 = arith.constant 0 : index
    %c0_85 = arith.constant 0 : index
    %324 = vector.load %arg14[%c0_83, %c0_84, %c0_85] : memref<2x8x128xf32, #tpu.memory_space<vmem>>, vector<2x1x128xf32>
    %325 = vector.shape_cast %324 : vector<2x1x128xf32> to vector<2x128xf32>
    %326 = vector.shape_cast %323 : vector<2x128xf32> to vector<2x1x128xf32>
    tpu.vector_store %arg14[%c0_83, %c0_84, %c0_85], %326 {strides = array<i32>} : memref<2x8x128xf32, #tpu.memory_space<vmem>>, vector<2x1x128xf32>,
    %327 = vector.extract_strided_slice %287 {offsets = [0, 1, 0], sizes = [2, 1, 384], strides = [1, 1, 1]} : vector<2x8x384xf32> to vector<2x1x384xf32>
    %328 = vector.shape_cast %327 : vector<2x1x384xf32> to vector<2x384xf32>
    %cst_86 = arith.constant dense<0.000000e+00> : vector<2x384xf32>
    %329 = tpu.matmul %323, %288, %cst_86 {dimension_numbers = #tpu.dot_dimension_numbers<[1], [0], [0], [1], [0, 0, 1, 1], [], []>} : vector<2x128xf32>, vector<128x384xf32>, vector<2x384xf32> -> vector<2x384xf32>
    %330 = arith.addf %329, %291 : vector<2x384xf32>
    %331 = vector.extract_strided_slice %328 {offsets = [0, 0], sizes = [2, 128], strides = [1, 1]} : vector<2x384xf32> to vector<2x128xf32>
    %332 = vector.extract_strided_slice %330 {offsets = [0, 0], sizes = [2, 128], strides = [1, 1]} : vector<2x384xf32> to vector<2x128xf32>
    %333 = arith.addf %331, %332 : vector<2x128xf32>
    %334 = arith.negf %333 : vector<2x128xf32>
    %335 = math.exp %334 : vector<2x128xf32>
    %cst_87 = arith.constant 1.000000e+00 : f32
    %336 = vector.broadcast %cst_87 : f32 to vector<2x128xf32>
    %337 = arith.addf %336, %335 : vector<2x128xf32>
    %338 = arith.divf %336, %337 : vector<2x128xf32>
    %339 = vector.extract_strided_slice %328 {offsets = [0, 128], sizes = [2, 128], strides = [1, 1]} : vector<2x384xf32> to vector<2x128xf32>
    %340 = vector.extract_strided_slice %330 {offsets = [0, 128], sizes = [2, 128], strides = [1, 1]} : vector<2x384xf32> to vector<2x128xf32>
    %341 = arith.addf %339, %340 : vector<2x128xf32>
    %342 = arith.negf %341 : vector<2x128xf32>
    %343 = math.exp %342 : vector<2x128xf32>
    %cst_88 = arith.constant 1.000000e+00 : f32
    %344 = vector.broadcast %cst_88 : f32 to vector<2x128xf32>
    %345 = arith.addf %344, %343 : vector<2x128xf32>
    %346 = arith.divf %344, %345 : vector<2x128xf32>
    %347 = vector.extract_strided_slice %328 {offsets = [0, 256], sizes = [2, 128], strides = [1, 1]} : vector<2x384xf32> to vector<2x128xf32>
    %348 = vector.extract_strided_slice %330 {offsets = [0, 256], sizes = [2, 128], strides = [1, 1]} : vector<2x384xf32> to vector<2x128xf32>
    %349 = arith.mulf %338, %348 : vector<2x128xf32>
    %350 = arith.addf %347, %349 : vector<2x128xf32>
    %351 = math.tanh %350 : vector<2x128xf32>
    %cst_89 = arith.constant 1.000000e+00 : f32
    %352 = vector.broadcast %cst_89 : f32 to vector<2x128xf32>
    %353 = arith.subf %352, %346 : vector<2x128xf32>
    %354 = arith.mulf %353, %351 : vector<2x128xf32>
    %355 = arith.mulf %346, %323 : vector<2x128xf32>
    %356 = arith.addf %354, %355 : vector<2x128xf32>
    %c0_90 = arith.constant 0 : index
    %c1_91 = arith.constant 1 : index
    %c0_92 = arith.constant 0 : index
    %357 = vector.load %arg14[%c0_90, %c1_91, %c0_92] : memref<2x8x128xf32, #tpu.memory_space<vmem>>, vector<2x1x128xf32>
    %358 = vector.shape_cast %357 : vector<2x1x128xf32> to vector<2x128xf32>
    %359 = vector.shape_cast %356 : vector<2x128xf32> to vector<2x1x128xf32>
    tpu.vector_store %arg14[%c0_90, %c1_91, %c0_92], %359 {strides = array<i32>} : memref<2x8x128xf32, #tpu.memory_space<vmem>>, vector<2x1x128xf32>,
    %360 = vector.extract_strided_slice %287 {offsets = [0, 2, 0], sizes = [2, 1, 384], strides = [1, 1, 1]} : vector<2x8x384xf32> to vector<2x1x384xf32>
    %361 = vector.shape_cast %360 : vector<2x1x384xf32> to vector<2x384xf32>
    %cst_93 = arith.constant dense<0.000000e+00> : vector<2x384xf32>
    %362 = tpu.matmul %356, %288, %cst_93 {dimension_numbers = #tpu.dot_dimension_numbers<[1], [0], [0], [1], [0, 0, 1, 1], [], []>} : vector<2x128xf32>, vector<128x384xf32>, vector<2x384xf32> -> vector<2x384xf32>
    %363 = arith.addf %362, %291 : vector<2x384xf32>
    %364 = vector.extract_strided_slice %361 {offsets = [0, 0], sizes = [2, 128], strides = [1, 1]} : vector<2x384xf32> to vector<2x128xf32>
    %365 = vector.extract_strided_slice %363 {offsets = [0, 0], sizes = [2, 128], strides = [1, 1]} : vector<2x384xf32> to vector<2x128xf32>
    %366 = arith.addf %364, %365 : vector<2x128xf32>
    %367 = arith.negf %366 : vector<2x128xf32>
    %368 = math.exp %367 : vector<2x128xf32>
    %cst_94 = arith.constant 1.000000e+00 : f32
    %369 = vector.broadcast %cst_94 : f32 to vector<2x128xf32>
    %370 = arith.addf %369, %368 : vector<2x128xf32>
    %371 = arith.divf %369, %370 : vector<2x128xf32>
    %372 = vector.extract_strided_slice %361 {offsets = [0, 128], sizes = [2, 128], strides = [1, 1]} : vector<2x384xf32> to vector<2x128xf32>
    %373 = vector.extract_strided_slice %363 {offsets = [0, 128], sizes = [2, 128], strides = [1, 1]} : vector<2x384xf32> to vector<2x128xf32>
    %374 = arith.addf %372, %373 : vector<2x128xf32>
    %375 = arith.negf %374 : vector<2x128xf32>
    %376 = math.exp %375 : vector<2x128xf32>
    %cst_95 = arith.constant 1.000000e+00 : f32
    %377 = vector.broadcast %cst_95 : f32 to vector<2x128xf32>
    %378 = arith.addf %377, %376 : vector<2x128xf32>
    %379 = arith.divf %377, %378 : vector<2x128xf32>
    %380 = vector.extract_strided_slice %361 {offsets = [0, 256], sizes = [2, 128], strides = [1, 1]} : vector<2x384xf32> to vector<2x128xf32>
    %381 = vector.extract_strided_slice %363 {offsets = [0, 256], sizes = [2, 128], strides = [1, 1]} : vector<2x384xf32> to vector<2x128xf32>
    %382 = arith.mulf %371, %381 : vector<2x128xf32>
    %383 = arith.addf %380, %382 : vector<2x128xf32>
    %384 = math.tanh %383 : vector<2x128xf32>
    %cst_96 = arith.constant 1.000000e+00 : f32
    %385 = vector.broadcast %cst_96 : f32 to vector<2x128xf32>
    %386 = arith.subf %385, %379 : vector<2x128xf32>
    %387 = arith.mulf %386, %384 : vector<2x128xf32>
    %388 = arith.mulf %379, %356 : vector<2x128xf32>
    %389 = arith.addf %387, %388 : vector<2x128xf32>
    %c0_97 = arith.constant 0 : index
    %c2_98 = arith.constant 2 : index
    %c0_99 = arith.constant 0 : index
    %390 = vector.load %arg14[%c0_97, %c2_98, %c0_99] : memref<2x8x128xf32, #tpu.memory_space<vmem>>, vector<2x1x128xf32>
    %391 = vector.shape_cast %390 : vector<2x1x128xf32> to vector<2x128xf32>
    %392 = vector.shape_cast %389 : vector<2x128xf32> to vector<2x1x128xf32>
    tpu.vector_store %arg14[%c0_97, %c2_98, %c0_99], %392 {strides = array<i32>} : memref<2x8x128xf32, #tpu.memory_space<vmem>>, vector<2x1x128xf32>,
    %393 = vector.extract_strided_slice %287 {offsets = [0, 3, 0], sizes = [2, 1, 384], strides = [1, 1, 1]} : vector<2x8x384xf32> to vector<2x1x384xf32>
    %394 = vector.shape_cast %393 : vector<2x1x384xf32> to vector<2x384xf32>
    %cst_100 = arith.constant dense<0.000000e+00> : vector<2x384xf32>
    %395 = tpu.matmul %389, %288, %cst_100 {dimension_numbers = #tpu.dot_dimension_numbers<[1], [0], [0], [1], [0, 0, 1, 1], [], []>} : vector<2x128xf32>, vector<128x384xf32>, vector<2x384xf32> -> vector<2x384xf32>
    %396 = arith.addf %395, %291 : vector<2x384xf32>
    %397 = vector.extract_strided_slice %394 {offsets = [0, 0], sizes = [2, 128], strides = [1, 1]} : vector<2x384xf32> to vector<2x128xf32>
    %398 = vector.extract_strided_slice %396 {offsets = [0, 0], sizes = [2, 128], strides = [1, 1]} : vector<2x384xf32> to vector<2x128xf32>
    %399 = arith.addf %397, %398 : vector<2x128xf32>
    %400 = arith.negf %399 : vector<2x128xf32>
    %401 = math.exp %400 : vector<2x128xf32>
    %cst_101 = arith.constant 1.000000e+00 : f32
    %402 = vector.broadcast %cst_101 : f32 to vector<2x128xf32>
    %403 = arith.addf %402, %401 : vector<2x128xf32>
    %404 = arith.divf %402, %403 : vector<2x128xf32>
    %405 = vector.extract_strided_slice %394 {offsets = [0, 128], sizes = [2, 128], strides = [1, 1]} : vector<2x384xf32> to vector<2x128xf32>
    %406 = vector.extract_strided_slice %396 {offsets = [0, 128], sizes = [2, 128], strides = [1, 1]} : vector<2x384xf32> to vector<2x128xf32>
    %407 = arith.addf %405, %406 : vector<2x128xf32>
    %408 = arith.negf %407 : vector<2x128xf32>
    %409 = math.exp %408 : vector<2x128xf32>
    %cst_102 = arith.constant 1.000000e+00 : f32
    %410 = vector.broadcast %cst_102 : f32 to vector<2x128xf32>
    %411 = arith.addf %410, %409 : vector<2x128xf32>
    %412 = arith.divf %410, %411 : vector<2x128xf32>
    %413 = vector.extract_strided_slice %394 {offsets = [0, 256], sizes = [2, 128], strides = [1, 1]} : vector<2x384xf32> to vector<2x128xf32>
    %414 = vector.extract_strided_slice %396 {offsets = [0, 256], sizes = [2, 128], strides = [1, 1]} : vector<2x384xf32> to vector<2x128xf32>
    %415 = arith.mulf %404, %414 : vector<2x128xf32>
    %416 = arith.addf %413, %415 : vector<2x128xf32>
    %417 = math.tanh %416 : vector<2x128xf32>
    %cst_103 = arith.constant 1.000000e+00 : f32
    %418 = vector.broadcast %cst_103 : f32 to vector<2x128xf32>
    %419 = arith.subf %418, %412 : vector<2x128xf32>
    %420 = arith.mulf %419, %417 : vector<2x128xf32>
    %421 = arith.mulf %412, %389 : vector<2x128xf32>
    %422 = arith.addf %420, %421 : vector<2x128xf32>
    %c0_104 = arith.constant 0 : index
    %c3_105 = arith.constant 3 : index
    %c0_106 = arith.constant 0 : index
    %423 = vector.load %arg14[%c0_104, %c3_105, %c0_106] : memref<2x8x128xf32, #tpu.memory_space<vmem>>, vector<2x1x128xf32>
    %424 = vector.shape_cast %423 : vector<2x1x128xf32> to vector<2x128xf32>
    %425 = vector.shape_cast %422 : vector<2x128xf32> to vector<2x1x128xf32>
    tpu.vector_store %arg14[%c0_104, %c3_105, %c0_106], %425 {strides = array<i32>} : memref<2x8x128xf32, #tpu.memory_space<vmem>>, vector<2x1x128xf32>,
    %426 = vector.extract_strided_slice %287 {offsets = [0, 4, 0], sizes = [2, 1, 384], strides = [1, 1, 1]} : vector<2x8x384xf32> to vector<2x1x384xf32>
    %427 = vector.shape_cast %426 : vector<2x1x384xf32> to vector<2x384xf32>
    %cst_107 = arith.constant dense<0.000000e+00> : vector<2x384xf32>
    %428 = tpu.matmul %422, %288, %cst_107 {dimension_numbers = #tpu.dot_dimension_numbers<[1], [0], [0], [1], [0, 0, 1, 1], [], []>} : vector<2x128xf32>, vector<128x384xf32>, vector<2x384xf32> -> vector<2x384xf32>
    %429 = arith.addf %428, %291 : vector<2x384xf32>
    %430 = vector.extract_strided_slice %427 {offsets = [0, 0], sizes = [2, 128], strides = [1, 1]} : vector<2x384xf32> to vector<2x128xf32>
    %431 = vector.extract_strided_slice %429 {offsets = [0, 0], sizes = [2, 128], strides = [1, 1]} : vector<2x384xf32> to vector<2x128xf32>
    %432 = arith.addf %430, %431 : vector<2x128xf32>
    %433 = arith.negf %432 : vector<2x128xf32>
    %434 = math.exp %433 : vector<2x128xf32>
    %cst_108 = arith.constant 1.000000e+00 : f32
    %435 = vector.broadcast %cst_108 : f32 to vector<2x128xf32>
    %436 = arith.addf %435, %434 : vector<2x128xf32>
    %437 = arith.divf %435, %436 : vector<2x128xf32>
    %438 = vector.extract_strided_slice %427 {offsets = [0, 128], sizes = [2, 128], strides = [1, 1]} : vector<2x384xf32> to vector<2x128xf32>
    %439 = vector.extract_strided_slice %429 {offsets = [0, 128], sizes = [2, 128], strides = [1, 1]} : vector<2x384xf32> to vector<2x128xf32>
    %440 = arith.addf %438, %439 : vector<2x128xf32>
    %441 = arith.negf %440 : vector<2x128xf32>
    %442 = math.exp %441 : vector<2x128xf32>
    %cst_109 = arith.constant 1.000000e+00 : f32
    %443 = vector.broadcast %cst_109 : f32 to vector<2x128xf32>
    %444 = arith.addf %443, %442 : vector<2x128xf32>
    %445 = arith.divf %443, %444 : vector<2x128xf32>
    %446 = vector.extract_strided_slice %427 {offsets = [0, 256], sizes = [2, 128], strides = [1, 1]} : vector<2x384xf32> to vector<2x128xf32>
    %447 = vector.extract_strided_slice %429 {offsets = [0, 256], sizes = [2, 128], strides = [1, 1]} : vector<2x384xf32> to vector<2x128xf32>
    %448 = arith.mulf %437, %447 : vector<2x128xf32>
    %449 = arith.addf %446, %448 : vector<2x128xf32>
    %450 = math.tanh %449 : vector<2x128xf32>
    %cst_110 = arith.constant 1.000000e+00 : f32
    %451 = vector.broadcast %cst_110 : f32 to vector<2x128xf32>
    %452 = arith.subf %451, %445 : vector<2x128xf32>
    %453 = arith.mulf %452, %450 : vector<2x128xf32>
    %454 = arith.mulf %445, %422 : vector<2x128xf32>
    %455 = arith.addf %453, %454 : vector<2x128xf32>
    %c0_111 = arith.constant 0 : index
    %c4_112 = arith.constant 4 : index
    %c0_113 = arith.constant 0 : index
    %456 = vector.load %arg14[%c0_111, %c4_112, %c0_113] : memref<2x8x128xf32, #tpu.memory_space<vmem>>, vector<2x1x128xf32>
    %457 = vector.shape_cast %456 : vector<2x1x128xf32> to vector<2x128xf32>
    %458 = vector.shape_cast %455 : vector<2x128xf32> to vector<2x1x128xf32>
    tpu.vector_store %arg14[%c0_111, %c4_112, %c0_113], %458 {strides = array<i32>} : memref<2x8x128xf32, #tpu.memory_space<vmem>>, vector<2x1x128xf32>,
    %459 = vector.extract_strided_slice %287 {offsets = [0, 5, 0], sizes = [2, 1, 384], strides = [1, 1, 1]} : vector<2x8x384xf32> to vector<2x1x384xf32>
    %460 = vector.shape_cast %459 : vector<2x1x384xf32> to vector<2x384xf32>
    %cst_114 = arith.constant dense<0.000000e+00> : vector<2x384xf32>
    %461 = tpu.matmul %455, %288, %cst_114 {dimension_numbers = #tpu.dot_dimension_numbers<[1], [0], [0], [1], [0, 0, 1, 1], [], []>} : vector<2x128xf32>, vector<128x384xf32>, vector<2x384xf32> -> vector<2x384xf32>
    %462 = arith.addf %461, %291 : vector<2x384xf32>
    %463 = vector.extract_strided_slice %460 {offsets = [0, 0], sizes = [2, 128], strides = [1, 1]} : vector<2x384xf32> to vector<2x128xf32>
    %464 = vector.extract_strided_slice %462 {offsets = [0, 0], sizes = [2, 128], strides = [1, 1]} : vector<2x384xf32> to vector<2x128xf32>
    %465 = arith.addf %463, %464 : vector<2x128xf32>
    %466 = arith.negf %465 : vector<2x128xf32>
    %467 = math.exp %466 : vector<2x128xf32>
    %cst_115 = arith.constant 1.000000e+00 : f32
    %468 = vector.broadcast %cst_115 : f32 to vector<2x128xf32>
    %469 = arith.addf %468, %467 : vector<2x128xf32>
    %470 = arith.divf %468, %469 : vector<2x128xf32>
    %471 = vector.extract_strided_slice %460 {offsets = [0, 128], sizes = [2, 128], strides = [1, 1]} : vector<2x384xf32> to vector<2x128xf32>
    %472 = vector.extract_strided_slice %462 {offsets = [0, 128], sizes = [2, 128], strides = [1, 1]} : vector<2x384xf32> to vector<2x128xf32>
    %473 = arith.addf %471, %472 : vector<2x128xf32>
    %474 = arith.negf %473 : vector<2x128xf32>
    %475 = math.exp %474 : vector<2x128xf32>
    %cst_116 = arith.constant 1.000000e+00 : f32
    %476 = vector.broadcast %cst_116 : f32 to vector<2x128xf32>
    %477 = arith.addf %476, %475 : vector<2x128xf32>
    %478 = arith.divf %476, %477 : vector<2x128xf32>
    %479 = vector.extract_strided_slice %460 {offsets = [0, 256], sizes = [2, 128], strides = [1, 1]} : vector<2x384xf32> to vector<2x128xf32>
    %480 = vector.extract_strided_slice %462 {offsets = [0, 256], sizes = [2, 128], strides = [1, 1]} : vector<2x384xf32> to vector<2x128xf32>
    %481 = arith.mulf %470, %480 : vector<2x128xf32>
    %482 = arith.addf %479, %481 : vector<2x128xf32>
    %483 = math.tanh %482 : vector<2x128xf32>
    %cst_117 = arith.constant 1.000000e+00 : f32
    %484 = vector.broadcast %cst_117 : f32 to vector<2x128xf32>
    %485 = arith.subf %484, %478 : vector<2x128xf32>
    %486 = arith.mulf %485, %483 : vector<2x128xf32>
    %487 = arith.mulf %478, %455 : vector<2x128xf32>
    %488 = arith.addf %486, %487 : vector<2x128xf32>
    %c0_118 = arith.constant 0 : index
    %c5_119 = arith.constant 5 : index
    %c0_120 = arith.constant 0 : index
    %489 = vector.load %arg14[%c0_118, %c5_119, %c0_120] : memref<2x8x128xf32, #tpu.memory_space<vmem>>, vector<2x1x128xf32>
    %490 = vector.shape_cast %489 : vector<2x1x128xf32> to vector<2x128xf32>
    %491 = vector.shape_cast %488 : vector<2x128xf32> to vector<2x1x128xf32>
    tpu.vector_store %arg14[%c0_118, %c5_119, %c0_120], %491 {strides = array<i32>} : memref<2x8x128xf32, #tpu.memory_space<vmem>>, vector<2x1x128xf32>,
    %492 = vector.extract_strided_slice %287 {offsets = [0, 6, 0], sizes = [2, 1, 384], strides = [1, 1, 1]} : vector<2x8x384xf32> to vector<2x1x384xf32>
    %493 = vector.shape_cast %492 : vector<2x1x384xf32> to vector<2x384xf32>
    %cst_121 = arith.constant dense<0.000000e+00> : vector<2x384xf32>
    %494 = tpu.matmul %488, %288, %cst_121 {dimension_numbers = #tpu.dot_dimension_numbers<[1], [0], [0], [1], [0, 0, 1, 1], [], []>} : vector<2x128xf32>, vector<128x384xf32>, vector<2x384xf32> -> vector<2x384xf32>
    %495 = arith.addf %494, %291 : vector<2x384xf32>
    %496 = vector.extract_strided_slice %493 {offsets = [0, 0], sizes = [2, 128], strides = [1, 1]} : vector<2x384xf32> to vector<2x128xf32>
    %497 = vector.extract_strided_slice %495 {offsets = [0, 0], sizes = [2, 128], strides = [1, 1]} : vector<2x384xf32> to vector<2x128xf32>
    %498 = arith.addf %496, %497 : vector<2x128xf32>
    %499 = arith.negf %498 : vector<2x128xf32>
    %500 = math.exp %499 : vector<2x128xf32>
    %cst_122 = arith.constant 1.000000e+00 : f32
    %501 = vector.broadcast %cst_122 : f32 to vector<2x128xf32>
    %502 = arith.addf %501, %500 : vector<2x128xf32>
    %503 = arith.divf %501, %502 : vector<2x128xf32>
    %504 = vector.extract_strided_slice %493 {offsets = [0, 128], sizes = [2, 128], strides = [1, 1]} : vector<2x384xf32> to vector<2x128xf32>
    %505 = vector.extract_strided_slice %495 {offsets = [0, 128], sizes = [2, 128], strides = [1, 1]} : vector<2x384xf32> to vector<2x128xf32>
    %506 = arith.addf %504, %505 : vector<2x128xf32>
    %507 = arith.negf %506 : vector<2x128xf32>
    %508 = math.exp %507 : vector<2x128xf32>
    %cst_123 = arith.constant 1.000000e+00 : f32
    %509 = vector.broadcast %cst_123 : f32 to vector<2x128xf32>
    %510 = arith.addf %509, %508 : vector<2x128xf32>
    %511 = arith.divf %509, %510 : vector<2x128xf32>
    %512 = vector.extract_strided_slice %493 {offsets = [0, 256], sizes = [2, 128], strides = [1, 1]} : vector<2x384xf32> to vector<2x128xf32>
    %513 = vector.extract_strided_slice %495 {offsets = [0, 256], sizes = [2, 128], strides = [1, 1]} : vector<2x384xf32> to vector<2x128xf32>
    %514 = arith.mulf %503, %513 : vector<2x128xf32>
    %515 = arith.addf %512, %514 : vector<2x128xf32>
    %516 = math.tanh %515 : vector<2x128xf32>
    %cst_124 = arith.constant 1.000000e+00 : f32
    %517 = vector.broadcast %cst_124 : f32 to vector<2x128xf32>
    %518 = arith.subf %517, %511 : vector<2x128xf32>
    %519 = arith.mulf %518, %516 : vector<2x128xf32>
    %520 = arith.mulf %511, %488 : vector<2x128xf32>
    %521 = arith.addf %519, %520 : vector<2x128xf32>
    %c0_125 = arith.constant 0 : index
    %c6_126 = arith.constant 6 : index
    %c0_127 = arith.constant 0 : index
    %522 = vector.load %arg14[%c0_125, %c6_126, %c0_127] : memref<2x8x128xf32, #tpu.memory_space<vmem>>, vector<2x1x128xf32>
    %523 = vector.shape_cast %522 : vector<2x1x128xf32> to vector<2x128xf32>
    %524 = vector.shape_cast %521 : vector<2x128xf32> to vector<2x1x128xf32>
    tpu.vector_store %arg14[%c0_125, %c6_126, %c0_127], %524 {strides = array<i32>} : memref<2x8x128xf32, #tpu.memory_space<vmem>>, vector<2x1x128xf32>,
    %525 = vector.extract_strided_slice %287 {offsets = [0, 7, 0], sizes = [2, 1, 384], strides = [1, 1, 1]} : vector<2x8x384xf32> to vector<2x1x384xf32>
    %526 = vector.shape_cast %525 : vector<2x1x384xf32> to vector<2x384xf32>
    %cst_128 = arith.constant dense<0.000000e+00> : vector<2x384xf32>
    %527 = tpu.matmul %521, %288, %cst_128 {dimension_numbers = #tpu.dot_dimension_numbers<[1], [0], [0], [1], [0, 0, 1, 1], [], []>} : vector<2x128xf32>, vector<128x384xf32>, vector<2x384xf32> -> vector<2x384xf32>
    %528 = arith.addf %527, %291 : vector<2x384xf32>
    %529 = vector.extract_strided_slice %526 {offsets = [0, 0], sizes = [2, 128], strides = [1, 1]} : vector<2x384xf32> to vector<2x128xf32>
    %530 = vector.extract_strided_slice %528 {offsets = [0, 0], sizes = [2, 128], strides = [1, 1]} : vector<2x384xf32> to vector<2x128xf32>
    %531 = arith.addf %529, %530 : vector<2x128xf32>
    %532 = arith.negf %531 : vector<2x128xf32>
    %533 = math.exp %532 : vector<2x128xf32>
    %cst_129 = arith.constant 1.000000e+00 : f32
    %534 = vector.broadcast %cst_129 : f32 to vector<2x128xf32>
    %535 = arith.addf %534, %533 : vector<2x128xf32>
    %536 = arith.divf %534, %535 : vector<2x128xf32>
    %537 = vector.extract_strided_slice %526 {offsets = [0, 128], sizes = [2, 128], strides = [1, 1]} : vector<2x384xf32> to vector<2x128xf32>
    %538 = vector.extract_strided_slice %528 {offsets = [0, 128], sizes = [2, 128], strides = [1, 1]} : vector<2x384xf32> to vector<2x128xf32>
    %539 = arith.addf %537, %538 : vector<2x128xf32>
    %540 = arith.negf %539 : vector<2x128xf32>
    %541 = math.exp %540 : vector<2x128xf32>
    %cst_130 = arith.constant 1.000000e+00 : f32
    %542 = vector.broadcast %cst_130 : f32 to vector<2x128xf32>
    %543 = arith.addf %542, %541 : vector<2x128xf32>
    %544 = arith.divf %542, %543 : vector<2x128xf32>
    %545 = vector.extract_strided_slice %526 {offsets = [0, 256], sizes = [2, 128], strides = [1, 1]} : vector<2x384xf32> to vector<2x128xf32>
    %546 = vector.extract_strided_slice %528 {offsets = [0, 256], sizes = [2, 128], strides = [1, 1]} : vector<2x384xf32> to vector<2x128xf32>
    %547 = arith.mulf %536, %546 : vector<2x128xf32>
    %548 = arith.addf %545, %547 : vector<2x128xf32>
    %549 = math.tanh %548 : vector<2x128xf32>
    %cst_131 = arith.constant 1.000000e+00 : f32
    %550 = vector.broadcast %cst_131 : f32 to vector<2x128xf32>
    %551 = arith.subf %550, %544 : vector<2x128xf32>
    %552 = arith.mulf %551, %549 : vector<2x128xf32>
    %553 = arith.mulf %544, %521 : vector<2x128xf32>
    %554 = arith.addf %552, %553 : vector<2x128xf32>
    %c0_132 = arith.constant 0 : index
    %c7_133 = arith.constant 7 : index
    %c0_134 = arith.constant 0 : index
    %555 = vector.load %arg14[%c0_132, %c7_133, %c0_134] : memref<2x8x128xf32, #tpu.memory_space<vmem>>, vector<2x1x128xf32>
    %556 = vector.shape_cast %555 : vector<2x1x128xf32> to vector<2x128xf32>
    %557 = vector.shape_cast %554 : vector<2x128xf32> to vector<2x1x128xf32>
    tpu.vector_store %arg14[%c0_132, %c7_133, %c0_134], %557 {strides = array<i32>} : memref<2x8x128xf32, #tpu.memory_space<vmem>>, vector<2x1x128xf32>,
    %c1_135 = arith.constant 1 : index
    %c0_136 = arith.constant 0 : index
    %c0_137 = arith.constant 0 : index
    %558 = vector.load %arg13[%c1_135, %c0_136, %c0_137] : memref<2x2x128xf32, #tpu.memory_space<vmem>>, vector<1x2x128xf32>
    %559 = vector.shape_cast %558 : vector<1x2x128xf32> to vector<2x128xf32>
    %560 = vector.shape_cast %554 : vector<2x128xf32> to vector<1x2x128xf32>
    tpu.vector_store %arg13[%c1_135, %c0_136, %c0_137], %560 {strides = array<i32>} : memref<2x2x128xf32, #tpu.memory_space<vmem>>, vector<1x2x128xf32>,
    %c0_138 = arith.constant 0 : index
    %c0_139 = arith.constant 0 : index
    %c0_140 = arith.constant 0 : index
    %561 = vector.load %arg14[%c0_138, %c0_139, %c0_140] : memref<2x8x128xf32, #tpu.memory_space<vmem>>, vector<2x8x128xf32>
    %562 = vector.shape_cast %561 : vector<2x8x128xf32> to vector<16x128xf32>
    %c0_141 = arith.constant 0 : index
    %c0_142 = arith.constant 0 : index
    %563 = vector.load %arg10[%c0_141, %c0_142] : memref<128x128xf32, #tpu.memory_space<vmem>>, vector<128x128xf32>
    %cst_143 = arith.constant dense<0.000000e+00> : vector<16x128xf32>
    %564 = tpu.matmul %562, %563, %cst_143 {dimension_numbers = #tpu.dot_dimension_numbers<[1], [0], [0], [1], [0, 0, 1, 1], [], []>} : vector<16x128xf32>, vector<128x128xf32>, vector<16x128xf32> -> vector<16x128xf32>
    %c0_144 = arith.constant 0 : index
    %c0_145 = arith.constant 0 : index
    %565 = vector.load %arg11[%c0_144, %c0_145] : memref<1x128xf32, #tpu.memory_space<vmem>>, vector<1x128xf32>
    %566 = vector.broadcast %565 : vector<1x128xf32> to vector<16x128xf32>
    %567 = arith.addf %564, %566 : vector<16x128xf32>
    %c0_146 = arith.constant 0 : index
    %c0_147 = arith.constant 0 : index
    %568 = vector.load %arg12[%c0_146, %c0_147] : memref<16x128xf32, #tpu.memory_space<vmem>>, vector<16x128xf32>
    tpu.vector_store %arg12[%c0_146, %c0_147], %567 {strides = array<i32>} : memref<16x128xf32, #tpu.memory_space<vmem>>, vector<16x128xf32>,
    return
  }
}

</mosaic_0001>

<bundles_post_ra>
// kernel: tpu_custom_call.1
= control target key start
LH: loop header
LB: loop body
LE: loop exit
PB: predicated region body
PF: predicated region fallthrough
CT: control target
= control target key end

     0   :  { %19 = vsyncpa [#allocation4], 0  ;;  %s6326_s0 = inlined_call_operand.hbm [shape: f32[16,32], index: 0, kind: input, shape index: {}]   ;;  %s6327_s1 = inlined_call_operand.hbm [shape: f32[2,2,128], index: 1, kind: input, shape index: {}]   ;;  %s6328_s2 = inlined_call_operand.hbm [shape: f32[32,384], index: 2, kind: input, shape index: {}]   ;;  %s6329_s3 = inlined_call_operand.hbm [shape: f32[128,384], index: 3, kind: input, shape index: {}]   ;;  %s6330_s4 = inlined_call_operand.vmem [shape: f32[1,384], index: 4, kind: input, shape index: {}]   ;;  %s6331_s5 = inlined_call_operand.hbm [shape: f32[1,384], index: 5, kind: input, shape index: {}]   ;;  %s6332_s6 = inlined_call_operand.hbm [shape: f32[128,384], index: 6, kind: input, shape index: {}]   ;;  %s6333_s7 = inlined_call_operand.hbm [shape: f32[128,384], index: 7, kind: input, shape index: {}]   ;;  %s6334_s8 = inlined_call_operand.vmem [shape: f32[1,384], index: 8, kind: input, shape index: {}]   ;;  %s6335_s9 = inlined_call_operand.hbm [shape: f32[1,384], index: 9, kind: input, shape index: {}]   ;;  %s6336_s10 = inlined_call_operand.hbm [shape: f32[128,128], index: 10, kind: input, shape index: {}]   ;;  %s6337_s11 = inlined_call_operand.vmem [shape: f32[1,128], index: 11, kind: input, shape index: {}]   ;;  %s6338_s12 = inlined_call_operand.hbm [shape: f32[16,128], index: 12, kind: output, shape index: {0}]   ;;  %s6339_s13 = inlined_call_operand.hbm [shape: f32[2,2,128], index: 13, kind: output, shape index: {1}]  }
   0x1   :  { %20 = vsyncpa [#allocation7], 0 }
   0x2   :  { %21 = vsyncpa [#allocation10], 0 }
   0x3   :  { %22 = vsyncpa [#allocation13], 0 }
   0x4   :  { %23 = vsyncpa [#allocation16], 0 }
   0x5   :  { %24 = vsyncpa [#allocation5], 0  ;;  %s43_s27 = sshll.u32 %s6327_s1, 4  ;;  %s44_s27 = int_to_ptr.hbm [resolvable:$true] %s43_s27 }
   0x6   :  { %25 = vsyncpa [#allocation20], 0  ;;  %s4273_s28 = smov [#allocation6]   ;;  %s4274_s30 = smov 32  }
   0x7   :  { %s45_s29 = sshll.u32 %s4273_s28, 4  ;;  %s4275_s14 = smov 2   ;;  %s46_s29 = int_to_ptr.vmem [resolvable:$true] %s45_s29 }
   0x8   :  { %51 = dma.hbm_to_vmem [thread:$0]  %s44_s27, 64, %s46_s29, [#allocation7], %s4274_s30, %s4274_s30, %s4275_s14  }
   0x9   :  { %s69_s17 = sshll.u32 %s6329_s3, 4  ;;  %s4276_s18 = smov [#allocation9]   ;;  %s70_s17 = int_to_ptr.hbm [resolvable:$true] %s69_s17 }
   0xa   :  { %s71_s19 = sshll.u32 %s4276_s18, 4  ;;  %s95_s21 = sshll.u32 %s6332_s6, 4  ;;  %s72_s19 = int_to_ptr.vmem [resolvable:$true] %s71_s19  ;;  %s96_s21 = int_to_ptr.hbm [resolvable:$true] %s95_s21 }
   0xb   :  { %s4277_s22 = smov 384   ;;  %s4278_s23 = smov 24  }
   0xc   :  { %77 = dma.hbm_to_vmem [thread:$0]  %s70_s17, 6144, %s72_s19, [#allocation10], %s4277_s22, %s4277_s22, %s4278_s23  }
   0xd   :  { %s124_s26 = sshll.u32 %s6335_s9, 4  ;;  %s4279_s3 = smov [#allocation12]   ;;  %s125_s26 = int_to_ptr.hbm [resolvable:$true] %s124_s26 }
   0xe   :  { %s97_s27 = sshll.u32 %s4279_s3, 4  ;;  %s4280_s6 = smov [#allocation15]   ;;  %s98_s27 = int_to_ptr.vmem [resolvable:$true] %s97_s27 }
   0xf   :  { %103 = dma.hbm_to_vmem [thread:$0]  %s96_s21, 6144, %s98_s27, [#allocation13], %s4277_s22, %s4277_s22, %s4278_s23  }
  0x10   :  { %s126_s28 = sshll.u32 %s4280_s6, 4  ;;  %s30_s16 = sshll.u32 %s6326_s0, 4  ;;  %s127_s28 = int_to_ptr.vmem [resolvable:$true] %s126_s28  ;;  %s31_s16 = int_to_ptr.hbm [resolvable:$true] %s30_s16 }
  0x11   :  { %129 = dma.hbm_to_vmem [thread:$0]  %s125_s26, 48, %s127_s28, [#allocation16]  }
  0x12   :  { %s4281_s17 = smov [#allocation3]   ;;  %s56_s20 = sshll.u32 %s6328_s2, 4  ;;  %s57_s20 = int_to_ptr.hbm [resolvable:$true] %s56_s20 }
  0x13   :  { %s32_s18 = sshll.u32 %s4281_s17, 4  ;;  %s4282_s1 = smov 128   ;;  %s33_s18 = int_to_ptr.vmem [resolvable:$true] %s32_s18 }
  0x14   :  { %s4283_s24 = smov 8   ;;  %s4284_s21 = smov [#allocation8]  }
  0x15   :  { %38 = dma.hbm_to_vmem [thread:$0]  %s31_s16, 256, %s33_s18, [#allocation4], %s4282_s1, %s4282_s1, %s4283_s24  }
  0x16   :  { %s58_s25 = sshll.u32 %s4284_s21, 4  ;;  %s85_s26 = sshll.u32 %s6331_s5, 4  ;;  %s59_s25 = int_to_ptr.vmem [resolvable:$true] %s58_s25  ;;  %s86_s26 = int_to_ptr.hbm [resolvable:$true] %s85_s26 }
  0x17   :  { %64 = dma.hbm_to_vmem [thread:$0]  %s57_s20, 1536, %s59_s25, [#allocation7], %s4277_s22, %s4277_s22, %s4278_s23  }
  0x18   :  { %s108_s6 = sshll.u32 %s6333_s7, 4  ;;  %s4285_s28 = smov [#allocation11]   ;;  %s109_s6 = int_to_ptr.hbm [resolvable:$true] %s108_s6 }
  0x19   :  { %s87_s29 = sshll.u32 %s4285_s28, 4  ;;  %s4286_s15 = smov [#allocation14]   ;;  %s88_s29 = int_to_ptr.vmem [resolvable:$true] %s87_s29 }
  0x1a   :  { %90 = dma.hbm_to_vmem [thread:$0]  %s86_s26, 48, %s88_s29, [#allocation10]  }
  0x1b   :  { %s110_s16 = sshll.u32 %s4286_s15, 4  ;;  %s134_s5 = sshll.u32 %s6336_s10, 4  ;;  %s111_s16 = int_to_ptr.vmem [resolvable:$true] %s110_s16  ;;  %s135_s5 = int_to_ptr.hbm [resolvable:$true] %s134_s5 }
  0x1c   :  { %116 = dma.hbm_to_vmem [thread:$0]  %s109_s6, 6144, %s111_s16, [#allocation13], %s4277_s22, %s4277_s22, %s4278_s23  }
  0x1d   :  { %s4287_s9 = smov [#allocation17]  }
  0x1e   :  { %s136_s19 = sshll.u32 %s4287_s9, 4  ;;  %s137_s19 = int_to_ptr.vmem [resolvable:$true] %s136_s19 }
  0x1f   :  { %142 = dma.hbm_to_vmem [thread:$0]  %s135_s5, 2048, %s137_s19, [#allocation16], %s4282_s1, %s4282_s1, %s4283_s24  }
  0x20   :  { %4259 = dma.done.wait [#allocation4], 256  }
  0x21   :  { %4260 = vsyncadd [#allocation4], 4294967040 }
  0x22   :  { %4261 = dma.done.wait [#allocation7], 1600  }
  0x23   :  { %4262 = vsyncadd [#allocation7], 4294965696 }
  0x24   :  { %4263 = dma.done.wait [#allocation10], 6192  }
  0x25   :  { %4264 = vsyncadd [#allocation10], 4294961104 }
  0x26   :  { %4265 = dma.done.wait [#allocation13], 12288  }
  0x27   :  { %4266 = vsyncadd [#allocation13], 4294955008 }
  0x28   :  { %4267 = dma.done.wait [#allocation16], 2096  }
  0x29   :  { %4268 = vsyncadd [#allocation16], 4294965200  ;;  %v192_v0 = vld [vmem:[#allocation8 + $0x48] sm:$0xff]  ;;  %v194_v1 = vld [vmem:[#allocation8 + $0x58] sm:$0xff]  ;;  %vm203_vm0 = vcmask 261120   ;;  %s3469_s25 = sshll.u32 %s6339_s13, 4  ;;  %s3470_s25 = int_to_ptr.hbm [resolvable:$true] %s3469_s25 }
  0x2a   :  { %v189_v2 = vld [vmem:[#allocation8 + $0x30] sm:$0xff]  ;;  %222 = vmatpush.msra.mxu0 %v192_v0  ;;  %268 = vmatpush.msra.mxu3 %v194_v1  ;;  %v191_v3 = vld [vmem:[#allocation8 + $0x40] sm:$0xff]  ;;  %v186_v4 = vld [vmem:[#allocation8 + $0x18] sm:$0xff]  ;;  %s4289_s26 = smov [#allocation18]   ;;  %s3456_s28 = sshll.u32 %s6338_s12, 4  ;;  %s3457_s28 = int_to_ptr.hbm [resolvable:$true] %s3456_s28 }
  0x2b   :  { %v188_v5 = vld [vmem:[#allocation8 + $0x28] sm:$0xff]  ;;  %v183_v7 = vld [vmem:[#allocation8] sm:$0xff]  ;;  %v185_v8 = vld [vmem:[#allocation8 + $0x10] sm:$0xff]  ;;  %s3454_s2 = sshll.u32 %s4289_s26, 4  ;;  %s3455_s2 = int_to_ptr.vmem [resolvable:$true] %s3454_s2 }
  0x2c   :  { %223 = vmatpush.msra.mxu0 %v189_v2  ;;  %269 = vmatpush.msra.mxu3 %v191_v3  ;;  %v4408_v6 = vld [vmem:[#allocation9 + $0x168] sm:$0xff]  ;;  %v4411_v9 = vld [vmem:[#allocation9 + $0x170] sm:$0xff]  ;;  %v4416_v11 = vld [vmem:[#allocation9 + $0x158] sm:$0xff] }
  0x2d   :  { %514 = vmatpush.msra.mxu2 %v4408_v6  ;;  %v4413_v10 = vld [vmem:[#allocation9 + $0x150] sm:$0xff]  ;;  %v4420_v13 = vld [vmem:[#allocation9 + $0x138] sm:$0xff]  ;;  %v4422_v14 = vld [vmem:[#allocation9 + $0x140] sm:$0xff] }
  0x2e   :  { %224 = vmatpush.msra.mxu0 %v186_v4  ;;  %270 = vmatpush.msra.mxu3 %v188_v5  ;;  %v181_v12 = vld [vmem:[#allocation3] sm:$0xff]  ;;  %v190_v16 = vld [vmem:[#allocation8 + $0x38] sm:$0xff]  ;;  %v4428_v17 = vld [vmem:[#allocation9 + $0x120] sm:$0xff] }
  0x2f   :  { %515 = vmatpush.msra.mxu2 %v4413_v10  ;;  %v193_v15 = vld [vmem:[#allocation8 + $0x50] sm:$0xff]  ;;  %v4430_v18 = vld [vmem:[#allocation9 + $0x128] sm:$0xff]  ;;  %v187_v19 = vld [vmem:[#allocation8 + $0x20] sm:$0xff] }
  0x30   :  { %225 = vmatpush.msra.mxu0 %v183_v7  ;;  %271 = vmatpush.msra.mxu3 %v185_v8  ;;  %v4435_v20 = vld [vmem:[#allocation9 + $0x108] sm:$0xff]  ;;  %v4437_v21 = vld [vmem:[#allocation9 + $0x110] sm:$0xff]  ;;  %v4444_v24 = vld [vmem:[#allocation9 + $0xf8] sm:$0xff] }
  0x31   :  { %3491 = vmatmul.msk.f32.vlgmr.msra.gmra.mxu0 %vm203_vm0, %v181_v12  ;;  %3495 = vmatmul.msk.f32.vlgmr.msra.gmra.mxu3 %vm203_vm0, %v181_v12  ;;  %v182_v22 = vld [vmem:[#allocation3 + $0x8] sm:$0xff]  ;;  %v184_v25 = vld [vmem:[#allocation8 + $0x8] sm:$0xff]  ;;  %v4451_v27 = vld [vmem:[#allocation9 + $0xe0] sm:$0xff] }
  0x32   :  { %336 = vmatpush.msrb.mxu3 %v4408_v6  ;;  %356 = vmatpush.msrb.mxu0 %v4411_v9  ;;  %v4442_v23 = vld [vmem:[#allocation9 + $0xf0] sm:$0xff]  ;;  %v4449_v26 = vld [vmem:[#allocation9 + $0xd8] sm:$0xff]  ;;  %v4457_v28 = vld [vmem:[#allocation9 + $0xc0] sm:$0xff] }
  0x33   :  { %245 = vmatpush.msra.mxu1 %v193_v15  ;;  %516 = vmatpush.msra.mxu2 %v4420_v13  ;;  %v4459_v29 = vld [vmem:[#allocation9 + $0xc8] sm:$0xff]  ;;  %v4464_v30 = vld [vmem:[#allocation9 + $0x178] sm:$0xff]  ;;  %v4468_v32 = vld [vmem:[#allocation9 + $0xb0] sm:$0xff] }
  0x34   :  { %337 = vmatpush.msrb.mxu3 %v4413_v10  ;;  %357 = vmatpush.msrb.mxu0 %v4416_v11  ;;  %v4466_v31 = vld [vmem:[#allocation9 + $0xa8] sm:$0xff]  ;;  %v4474_v33 = vld [vmem:[#allocation9 + $0x160] sm:$0xff]  ;;  %v4476_v34 = vld [vmem:[#allocation9 + $0x90] sm:$0xff] }
  0x35   :  { %246 = vmatpush.msra.mxu1 %v190_v16  ;;  %517 = vmatpush.msra.mxu2 %v4428_v17  ;;  %v4478_v35 = vld [vmem:[#allocation9 + $0x98] sm:$0xff]  ;;  %v4484_v36 = vld [vmem:[#allocation9 + $0x148] sm:$0xff]  ;;  %v4488_v38 = vld [vmem:[#allocation9 + $0x80] sm:$0xff] }
  0x36   :  { %338 = vmatpush.msrb.mxu3 %v4420_v13  ;;  %358 = vmatpush.msrb.mxu0 %v4422_v14  ;;  %v4486_v37 = vld [vmem:[#allocation9 + $0x78] sm:$0xff]  ;;  %6472 = vst [vmem:[#allocation28_spill] sm:$0xff] %v4488_v38  ;;  %v4494_v39 = vld [vmem:[#allocation9 + $0x60] sm:$0xff]  ;;  %v4496_v40 = vld [vmem:[#allocation9 + $0x68] sm:$0xff] }
  0x37   :  { %247 = vmatpush.msra.mxu1 %v187_v19  ;;  %518 = vmatpush.msra.mxu2 %v4435_v20  ;;  %6473 = vst [vmem:[#allocation29_spill] sm:$0xff] %v4494_v39  ;;  %v4502_v41 = vld [vmem:[#allocation9 + $0x130] sm:$0xff]  ;;  %v4504_v42 = vld [vmem:[#allocation9 + $0x48] sm:$0xff]  ;;  %v4512_v44 = vld [vmem:[#allocation9 + $0x118] sm:$0xff] }
  0x38   :  { %339 = vmatpush.msrb.mxu3 %v4428_v17  ;;  %359 = vmatpush.msrb.mxu0 %v4430_v18  ;;  %6474 = vst [vmem:[#allocation30_spill] sm:$0xff] %v4496_v40  ;;  %v4506_v43 = vld [vmem:[#allocation9 + $0x50] sm:$0xff]  ;;  %v4516_v46 = vld [vmem:[#allocation9 + $0x38] sm:$0xff]  ;;  %v4522_v47 = vld [vmem:[#allocation9 + $0x100] sm:$0xff] }
  0x39   :  { %3492 = vmatmul.msk.f32.gmra.mxu0 %vm203_vm0, %v182_v22  ;;  %3496 = vmatmul.msk.f32.gmra.mxu3 %vm203_vm0, %v182_v22  ;;  %6475 = vst [vmem:[#allocation31_spill] sm:$0xff] %v4504_v42  ;;  %v4514_v45 = vld [vmem:[#allocation9 + $0x30] sm:$0xff]  ;;  %v4524_v48 = vld [vmem:[#allocation9 + $0x18] sm:$0xff]  ;;  %v4526_v49 = vld [vmem:[#allocation9 + $0x20] sm:$0xff] }
  0x3a   :  { %340 = vmatpush.msrb.mxu3 %v4435_v20  ;;  %360 = vmatpush.msrb.mxu0 %v4437_v21  ;;  %6476 = vst [vmem:[#allocation32_spill] sm:$0xff] %v4506_v43  ;;  %v4532_v50 = vld [vmem:[#allocation9 + $0xe8] sm:$0xff]  ;;  %v4534_v51 = vld [vmem:[#allocation9] sm:$0xff]  ;;  %v4542_v53 = vld [vmem:[#allocation6] sm:$0x3] }
  0x3b   :  { %248 = vmatpush.msra.mxu1 %v184_v25  ;;  %519 = vmatpush.msra.mxu2 %v4442_v23  ;;  %6477 = vst [vmem:[#allocation33_spill] sm:$0xff] %v4514_v45  ;;  %v4536_v52 = vld [vmem:[#allocation9 + $0x8] sm:$0xff]  ;;  %v4545_v54 = vld [vmem:[#allocation9 + $0xd0] sm:$0xff]  ;;  %v4552_v55 = vld [vmem:[#allocation9 + $0xb8] sm:$0xff] }
  0x3c   :  { %341 = vmatpush.msrb.mxu3 %v4442_v23  ;;  %361 = vmatpush.msrb.mxu0 %v4444_v24  ;;  %6478 = vst [vmem:[#allocation34_spill] sm:$0xff] %v4516_v46  ;;  %v4556_v56 = vld [vmem:[#allocation9 + $0xa0] sm:$0xff]  ;;  %v4562_v57 = vld [vmem:[#allocation9 + $0x88] sm:$0xff]  ;;  %v4568_v58 = vld [vmem:[#allocation9 + $0x70] sm:$0xff] }
  0x3d   :  { %3493 = vmatmul.msk.f32.vlgmr.msra.gmra.mxu1 %vm203_vm0, %v181_v12  ;;  %520 = vmatpush.msra.mxu2 %v4449_v26  ;;  %6479 = vst [vmem:[#allocation35_spill] sm:$0xff] %v4524_v48  ;;  %v4574_v59 = vld [vmem:[#allocation9 + $0x58] sm:$0xff]  ;;  %v4580_v60 = vld [vmem:[#allocation9 + $0x40] sm:$0xff]  ;;  %v4586_v61 = vld [vmem:[#allocation9 + $0x28] sm:$0xff] }
  0x3e   :  { %342 = vmatpush.msrb.mxu3 %v4449_v26  ;;  %362 = vmatpush.msrb.mxu0 %v4451_v27  ;;  %6480 = vst [vmem:[#allocation36_spill] sm:$0xff] %v4526_v49  ;;  %v4592_v62 = vld [vmem:[#allocation9 + $0x10] sm:$0xff]  ;;  %v4694_v3 = vld [vmem:[%s6330_s4] sm:$0x7]  ;;  %v327_v4 = vld [vmem:[#allocation11] sm:$0x7] }
  0x3f   :  { %376 = vmatpush.msrb.mxu1 %v4464_v30  ;;  %521 = vmatpush.msra.mxu2 %v4457_v28  ;;  %6481 = vst [vmem:[#allocation37_spill] sm:$0xff] %v4534_v51  ;;  %v198_v5 = vperm.slane %v4694_v3, 1  ;;  %v4699_v8 = vperm.slane %v327_v4, 1  ;;  %v197_v25 = vperm.slane %v4694_v3, 0 }
  0x40   :  { %343 = vmatpush.msrb.mxu3 %v4457_v28  ;;  %363 = vmatpush.msrb.mxu0 %v4459_v29  ;;  %6482 = vst [vmem:[#allocation38_spill] sm:$0xff] %v4536_v52 }
  0x41   :  { %377 = vmatpush.msrb.mxu1 %v4474_v33  ;;  %522 = vmatpush.msra.mxu2 %v4466_v31  ;;  %6483 = vst [vmem:[#allocation39_spill] sm:$0xff] %v4568_v58 }
  0x42   :  { %344 = vmatpush.msrb.mxu3 %v4466_v31  ;;  %364 = vmatpush.msrb.mxu0 %v4468_v32  ;;  %6484 = vst [vmem:[#allocation40_spill] sm:$0xff] %v4574_v59 }
  0x43   :  { %378 = vmatpush.msrb.mxu1 %v4484_v36  ;;  %523 = vmatpush.msra.mxu2 %v4476_v34  ;;  %6485 = vst [vmem:[#allocation41_spill] sm:$0xff] %v4580_v60 }
  0x44   :  { %345 = vmatpush.msrb.mxu3 %v4476_v34  ;;  %365 = vmatpush.msrb.mxu0 %v4478_v35  ;;  %6486 = vst [vmem:[#allocation42_spill] sm:$0xff] %v4586_v61 }
  0x45   :  { %3494 = vmatmul.msk.f32.gmra.mxu1 %vm203_vm0, %v182_v22  ;;  %524 = vmatpush.msra.mxu2 %v4486_v37  ;;  %6487 = vst [vmem:[#allocation43_spill] sm:$0xff] %v4592_v62 }
  0x46   :  { %346 = vmatpush.msrb.mxu3 %v4486_v37  ;;  %366 = vmatpush.msrb.mxu0 %v4488_v38  ;;  %6488 = vst [vmem:[#allocation44_spill] sm:$0xff] %v4699_v8 }
  0x47   :  { %379 = vmatpush.msrb.mxu1 %v4502_v41  ;;  %525 = vmatpush.msra.mxu2 %v4494_v39 }
  0x48   :  { %347 = vmatpush.msrb.mxu3 %v4494_v39  ;;  %367 = vmatpush.msrb.mxu0 %v4496_v40 }
  0x49   :  { %380 = vmatpush.msrb.mxu1 %v4512_v44  ;;  %526 = vmatpush.msra.mxu2 %v4504_v42 }
  0x4a   :  { %348 = vmatpush.msrb.mxu3 %v4504_v42  ;;  %368 = vmatpush.msrb.mxu0 %v4506_v43 }
  0x4b   :  { %381 = vmatpush.msrb.mxu1 %v4522_v47  ;;  %527 = vmatpush.msra.mxu2 %v4514_v45 }
  0x4c   :  { %349 = vmatpush.msrb.mxu3 %v4514_v45  ;;  %369 = vmatpush.msrb.mxu0 %v4516_v46 }
  0x4d   :  { %382 = vmatpush.msrb.mxu1 %v4532_v50  ;;  %528 = vmatpush.msra.mxu2 %v4524_v48 }
  0x4e   :  { %350 = vmatpush.msrb.mxu3 %v4524_v48  ;;  %370 = vmatpush.msrb.mxu0 %v4526_v49 }
  0x4f   :  { %383 = vmatpush.msrb.mxu1 %v4545_v54  ;;  %529 = vmatpush.msra.mxu2 %v4534_v51 }
  0x50   :  { %351 = vmatpush.msrb.mxu3 %v4534_v51  ;;  %371 = vmatpush.msrb.mxu0 %v4536_v52 }
  0x51   :  { %352 = vmatmul.f32.vlgmr.msrb.gmra.mxu3 %v4542_v53  ;;  %372 = vmatmul.f32.vlgmr.msrb.gmra.mxu0 %v4542_v53 }
  0x52   :  { %534 = vmatpush.msra.mxu3 %v4411_v9  ;;  %554 = vmatpush.msra.mxu0 %v4464_v30 }
  0x53   :  { %384 = vmatpush.msrb.mxu1 %v4552_v55  ;;  %710 = vmatpush.msrb.mxu2 %v4411_v9 }
  0x54   :  { %535 = vmatpush.msra.mxu3 %v4416_v11  ;;  %555 = vmatpush.msra.mxu0 %v4474_v33 }
  0x55   :  { %385 = vmatpush.msrb.mxu1 %v4556_v56  ;;  %711 = vmatpush.msrb.mxu2 %v4416_v11 }
  0x56   :  { %536 = vmatpush.msra.mxu3 %v4422_v14  ;;  %556 = vmatpush.msra.mxu0 %v4484_v36 }
  0x57   :  { %386 = vmatpush.msrb.mxu1 %v4562_v57  ;;  %712 = vmatpush.msrb.mxu2 %v4422_v14 }
  0x58   :  { %537 = vmatpush.msra.mxu3 %v4430_v18  ;;  %557 = vmatpush.msra.mxu0 %v4502_v41 }
  0x59   :  { %387 = vmatpush.msrb.mxu1 %v4568_v58  ;;  %713 = vmatpush.msrb.mxu2 %v4430_v18 }
  0x5a   :  { %538 = vmatpush.msra.mxu3 %v4437_v21  ;;  %558 = vmatpush.msra.mxu0 %v4512_v44 }
  0x5b   :  { %388 = vmatpush.msrb.mxu1 %v4574_v59  ;;  %714 = vmatpush.msrb.mxu2 %v4437_v21 }
  0x5c   :  { %539 = vmatpush.msra.mxu3 %v4444_v24  ;;  %559 = vmatpush.msra.mxu0 %v4522_v47 }
  0x5d   :  { %389 = vmatpush.msrb.mxu1 %v4580_v60  ;;  %715 = vmatpush.msrb.mxu2 %v4444_v24 }
  0x5e   :  { %540 = vmatpush.msra.mxu3 %v4451_v27  ;;  %560 = vmatpush.msra.mxu0 %v4532_v50 }
  0x5f   :  { %390 = vmatpush.msrb.mxu1 %v4586_v61  ;;  %716 = vmatpush.msrb.mxu2 %v4451_v27 }
  0x60   :  { %541 = vmatpush.msra.mxu3 %v4459_v29  ;;  %561 = vmatpush.msra.mxu0 %v4545_v54 }
  0x61   :  { %391 = vmatpush.msrb.mxu1 %v4592_v62  ;;  %717 = vmatpush.msrb.mxu2 %v4459_v29 }
  0x62   :  { %542 = vmatpush.msra.mxu3 %v4468_v32  ;;  %392 = vmatmul.f32.vlgmr.msrb.gmra.mxu1 %v4542_v53 }
  0x63   :  { %562 = vmatpush.msra.mxu0 %v4552_v55  ;;  %690 = vmatpush.msra.mxu1 %v4408_v6 }
  0x64   :  { %543 = vmatpush.msra.mxu3 %v4478_v35  ;;  %718 = vmatpush.msrb.mxu2 %v4468_v32 }
  0x65   :  { %563 = vmatpush.msra.mxu0 %v4556_v56  ;;  %691 = vmatpush.msra.mxu1 %v4413_v10 }
  0x66   :  { %544 = vmatpush.msra.mxu3 %v4488_v38  ;;  %719 = vmatpush.msrb.mxu2 %v4478_v35 }
  0x67   :  { %564 = vmatpush.msra.mxu0 %v4562_v57  ;;  %692 = vmatpush.msra.mxu1 %v4420_v13 }
  0x68   :  { %545 = vmatpush.msra.mxu3 %v4496_v40  ;;  %720 = vmatpush.msrb.mxu2 %v4488_v38 }
  0x69   :  { %565 = vmatpush.msra.mxu0 %v4568_v58  ;;  %693 = vmatpush.msra.mxu1 %v4428_v17 }
  0x6a   :  { %546 = vmatpush.msra.mxu3 %v4506_v43  ;;  %721 = vmatpush.msrb.mxu2 %v4496_v40 }
  0x6b   :  { %566 = vmatpush.msra.mxu0 %v4574_v59  ;;  %694 = vmatpush.msra.mxu1 %v4435_v20 }
  0x6c   :  { %547 = vmatpush.msra.mxu3 %v4516_v46  ;;  %722 = vmatpush.msrb.mxu2 %v4506_v43 }
  0x6d   :  { %567 = vmatpush.msra.mxu0 %v4580_v60  ;;  %695 = vmatpush.msra.mxu1 %v4442_v23 }
  0x6e   :  { %548 = vmatpush.msra.mxu3 %v4526_v49  ;;  %723 = vmatpush.msrb.mxu2 %v4516_v46 }
  0x6f   :  { %568 = vmatpush.msra.mxu0 %v4586_v61  ;;  %696 = vmatpush.msra.mxu1 %v4449_v26 }
  0x70   :  { %549 = vmatpush.msra.mxu3 %v4536_v52  ;;  %724 = vmatpush.msrb.mxu2 %v4526_v49 }
  0x71   :  { %569 = vmatpush.msra.mxu0 %v4592_v62  ;;  %697 = vmatpush.msra.mxu1 %v4457_v28 }
  0x72   :  { %730 = vmatpush.msrb.mxu3 %v4464_v30  ;;  %725 = vmatpush.msrb.mxu2 %v4536_v52 }
  0x73   :  { %871 = vmatpush.msrb.mxu0 %v4408_v6  ;;  %698 = vmatpush.msra.mxu1 %v4466_v31 }
  0x74   :  { %731 = vmatpush.msrb.mxu3 %v4474_v33 }
  0x75   :  { %872 = vmatpush.msrb.mxu0 %v4413_v10  ;;  %699 = vmatpush.msra.mxu1 %v4476_v34 }
  0x76   :  { %732 = vmatpush.msrb.mxu3 %v4484_v36 }
  0x77   :  { %873 = vmatpush.msrb.mxu0 %v4420_v13  ;;  %700 = vmatpush.msra.mxu1 %v4486_v37 }
  0x78   :  { %733 = vmatpush.msrb.mxu3 %v4502_v41 }
  0x79   :  { %874 = vmatpush.msrb.mxu0 %v4428_v17  ;;  %701 = vmatpush.msra.mxu1 %v4494_v39 }
  0x7a   :  { %734 = vmatpush.msrb.mxu3 %v4512_v44 }
  0x7b   :  { %875 = vmatpush.msrb.mxu0 %v4435_v20  ;;  %702 = vmatpush.msra.mxu1 %v4504_v42 }
  0x7c   :  { %735 = vmatpush.msrb.mxu3 %v4522_v47 }
  0x7d   :  { %876 = vmatpush.msrb.mxu0 %v4442_v23  ;;  %703 = vmatpush.msra.mxu1 %v4514_v45 }
  0x7e   :  { %736 = vmatpush.msrb.mxu3 %v4532_v50 }
  0x7f   :  { %877 = vmatpush.msrb.mxu0 %v4449_v26  ;;  %704 = vmatpush.msra.mxu1 %v4524_v48 }
  0x80   :  { %737 = vmatpush.msrb.mxu3 %v4545_v54 }
  0x81   :  { %878 = vmatpush.msrb.mxu0 %v4457_v28  ;;  %705 = vmatpush.msra.mxu1 %v4534_v51 }
  0x82   :  { %738 = vmatpush.msrb.mxu3 %v4552_v55 }
  0x83   :  { %891 = vmatpush.msrb.mxu1 %v4411_v9  ;;  %879 = vmatpush.msrb.mxu0 %v4466_v31 }
  0x84   :  { %739 = vmatpush.msrb.mxu3 %v4556_v56 }
  0x85   :  { %892 = vmatpush.msrb.mxu1 %v4416_v11  ;;  %880 = vmatpush.msrb.mxu0 %v4476_v34 }
  0x86   :  { %740 = vmatpush.msrb.mxu3 %v4562_v57 }
  0x87   :  { %893 = vmatpush.msrb.mxu1 %v4422_v14  ;;  %881 = vmatpush.msrb.mxu0 %v4486_v37 }
  0x88   :  { %741 = vmatpush.msrb.mxu3 %v4568_v58 }
  0x89   :  { %894 = vmatpush.msrb.mxu1 %v4430_v18  ;;  %882 = vmatpush.msrb.mxu0 %v4494_v39 }
  0x8a   :  { %742 = vmatpush.msrb.mxu3 %v4574_v59 }
  0x8b   :  { %895 = vmatpush.msrb.mxu1 %v4437_v21  ;;  %883 = vmatpush.msrb.mxu0 %v4504_v42 }
  0x8c   :  { %743 = vmatpush.msrb.mxu3 %v4580_v60 }
  0x8d   :  { %896 = vmatpush.msrb.mxu1 %v4444_v24  ;;  %884 = vmatpush.msrb.mxu0 %v4514_v45 }
  0x8e   :  { %744 = vmatpush.msrb.mxu3 %v4586_v61 }
  0x8f   :  { %897 = vmatpush.msrb.mxu1 %v4451_v27  ;;  %885 = vmatpush.msrb.mxu0 %v4524_v48 }
  0x90   :  { %745 = vmatpush.msrb.mxu3 %v4592_v62  ;;  %v4708_v62 = vperm.slane %v327_v4, 0 }
  0x91   :  { %898 = vmatpush.msrb.mxu1 %v4459_v29  ;;  %886 = vmatpush.msrb.mxu0 %v4534_v51 }
  0x92   :  { %6491 = vst [vmem:[#allocation47_spill] sm:$0xff] %v4708_v62 }
  0x93   :  { %899 = vmatpush.msrb.mxu1 %v4468_v32 }
  0x95   :  { %900 = vmatpush.msrb.mxu1 %v4478_v35 }
  0x97   :  { %901 = vmatpush.msrb.mxu1 %v4488_v38 }
  0x99   :  { %902 = vmatpush.msrb.mxu1 %v4496_v40 }
  0x9b   :  { %903 = vmatpush.msrb.mxu1 %v4506_v43 }
  0x9d   :  { %904 = vmatpush.msrb.mxu1 %v4516_v46 }
  0x9f   :  { %905 = vmatpush.msrb.mxu1 %v4526_v49 }
  0xa1   :  { %906 = vmatpush.msrb.mxu1 %v4536_v52 }
  0xae   :  { %v227_v63 = vpop.f32.mrf.mxu0 }
  0xaf   :  { %v4711_v61 = vadd.f32 %v227_v63, %v197_v25 }
  0xb1   :  { %6492 = vst [vmem:[#allocation48_spill] sm:$0xff] %v4711_v61 }
  0xb4   :  { %v273_v0 = vpop.f32.mrf.mxu3 }
  0xb6   :  { %v230_v2 = vpop.f32.mrf.mxu0 }
  0xba   :  { %v250_v1 = vpop.f32.mrf.mxu1 }
  0xbb   :  { %v4701_v15 = vadd.f32 %v250_v1, %v198_v5  ;;  %v4713_v1 = vadd.f32 %v230_v2, %v197_v25 }
  0xbc   :  { %v4697_v7 = vpop.f32.mrf.mxu3 }
  0xbd   :  { %6489 = vst [vmem:[#allocation45_spill] sm:$0xff] %v4701_v15 }
  0xbe   :  { %6493 = vst [vmem:[#allocation49_spill] sm:$0xff] %v4713_v1 }
  0xc2   :  { %v253_v12 = vpop.f32.mrf.mxu1 }
  0xc3   :  { %v4704_v22 = vadd.f32 %v253_v12, %v198_v5 }
  0xc5   :  { %6490 = vst [vmem:[#allocation46_spill] sm:$0xff] %v4704_v22 }
  0xce   :  { %v373_v16 = vpop.f32.mrf.mxu0 }
  0xcf   :  { %v374_v19 = vadd.f32 %v373_v16, %v4699_v8 }
  0xd1   :  { %v441_v52 = vrot.slane %v374_v19, 1  ;;  %v444_v51 = vadd.f32 %v374_v19, %v4701_v15 }
  0xd3   :  { %v3499_v49 = vmul.f32 -1.442695, %v444_v51  ;;  %v445_v48 = vadd.f32 %v441_v52, %v4704_v22 }
  0xd4   :  { %v353_v46 = vpop.f32.mrf.mxu3 }
  0xd5   :  { %3579 = vpow2.f32 %v3499_v49  ;;  %v354_v16 = vadd.f32 %v353_v46, %v4708_v62  ;;  %v3500_v5 = vmul.f32 -1.442695, %v445_v48 }
  0xd7   :  { %v397_v12 = vrot.slane %v354_v16, 1  ;;  %v400_v8 = vadd.f32 %v354_v16, %v4711_v61  ;;  %3581 = vpow2.f32 %v3500_v5 }
  0xd9   :  { %v401_v19 = vadd.f32 %v397_v12, %v4713_v1  ;;  %v3497_v15 = vmul.f32 -1.442695, %v400_v8  ;;  %v4731_v12 = vperm.slane %v327_v4, 2 }
  0xdb   :  { %v3580_v45 = vpop.eup %3579  ;;  %3583 = vpow2.f32 %v3497_v15  ;;  %v3498_v51 = vmul.f32 -1.442695, %v401_v19  ;;  %v199_v15 = vperm.slane %v4694_v3, 2  ;;  %6494 = vst [vmem:[#allocation50_spill] sm:$0xff] %v4731_v12 }
  0xdc   :  { %v4718_v52 = vadd.f32 1.0, %v3580_v45 }
  0xdd   :  { %v3582_v63 = vpop.eup %3581  ;;  %3585 = vpow2.f32 %v3498_v51  ;;  %v4735_v61 = vadd.f32 %v273_v0, %v199_v15 }
  0xde   :  { %v4720_v2 = vadd.f32 1.0, %v3582_v63  ;;  %3587 = vrcp.f32 %v4718_v52  ;;  %vm459_vm1 = vweird.f32 %v4718_v52  ;;  %v465_v3 = vand.u32 2147483648, %v4718_v52 }
  0xdf   :  { %v393_v51 = vpop.f32.mrf.mxu1 }
  0xe0   :  { %3589 = vrcp.f32 %v4720_v2  ;;  %v394_v62 = vadd.f32 %v393_v51, %v4731_v12  ;;  %vm474_vm4 = vweird.f32 %v4720_v2 }
  0xe1   :  { %v3584_v46 = vpop.eup %3583 }
  0xe2   :  { %v408_v48 = vadd.f32 1.0, %v3584_v46  ;;  %v485_v12 = vrot.slane %v394_v62, 1 }
  0xe3   :  { %v3586_v49 = vpop.eup %3585 }
  0xe4   :  { %v409_v25 = vadd.f32 1.0, %v3586_v49  ;;  %3591 = vrcp.f32 %v408_v48  ;;  %v4724_v16 = vpop.eup %3587  ;;  %v421_v60 = vand.u32 2147483648, %v408_v48  ;;  %v419_v42 = vand.u32 2147483647, %v408_v48 }
  0xe5   :  { %v455_v45 = vmul.f32 %v4724_v16, %v4718_v52  ;;  %vm415_vm3 = vweird.f32 %v408_v48  ;;  %vm460_vm7 = vweird.f32 %v4724_v16 }
  0xe6   :  { %3593 = vrcp.f32 %v409_v25  ;;  %v4726_v8 = vpop.eup %3589  ;;  %v436_v40 = vand.u32 2147483648, %v409_v25  ;;  %v434_v39 = vand.u32 2147483647, %v409_v25  ;;  %v422_v51 = vor.u32 1.1754944e-38, %v421_v60  ;;  %vm4751_vm13 = vmor %vm459_vm1, %vm460_vm7 }
  0xe7   :  { %v470_v19 = vmul.f32 %v4726_v8, %v4720_v2  ;;  %v456_v49 = vsub.f32 1.0, %v455_v45  ;;  %vm420_vm8 = vcmp.eq.f32.partialorder %v419_v42, 8.507059e+37  ;;  %vm430_vm9 = vweird.f32 %v409_v25 }
  0xe8   :  { %vm475_vm11 = vweird.f32 %v4726_v8  ;;  %vm435_vm12 = vcmp.eq.f32.partialorder %v434_v39, 8.507059e+37  ;;  %v480_v60 = vand.u32 2147483648, %v4720_v2  ;;  %v4759_v39 = vadd.f32 %v4697_v7, %v199_v15 }
  0xe9   :  { %v471_v4 = vsub.f32 1.0, %v470_v19  ;;  %v457_v45 = vmul.f32 %v4724_v16, %v456_v49  ;;  %v437_v49 = vor.u32 1.1754944e-38, %v436_v40  ;;  %v463_v40 = vand.u32 2147483647, %v4718_v52  ;;  %vm476_vm14 = vmor %vm474_vm4, %vm475_vm11 }
  0xea   :  { %v3592_v5 = vpop.eup %3591  ;;  %v466_v52 = vor.u32 1.1754944e-38, %v465_v3  ;;  %v499_v15 = vrot.slane %v4542_v53, 1  ;;  %vm511_vm1 = vcmask 1041409  }
  0xeb   :  { %v411_v63 = vmul.f32 %v3592_v5, %v408_v48  ;;  %vm416_vm2 = vweird.f32 %v3592_v5  ;;  %v458_v58 = vadd.f32 %v4724_v16, %v457_v45  ;;  %vm464_vm15 = vcmp.eq.f32.partialorder %v463_v40, 8.507059e+37  ;;  %v6515_v40 = vld [vmem:[#allocation49_spill] sm:$0xff] }
  0xec   :  { %v3594_v46 = vpop.eup %3593  ;;  %vm417_vm6 = vmor %vm415_vm3, %vm416_vm2 }
  0xed   :  { %v412_v22 = vsub.f32 1.0, %v411_v63  ;;  %v426_v1 = vmul.f32 %v3594_v46, %v409_v25  ;;  %vm431_vm5 = vweird.f32 %v3594_v46 }
  0xee   :  { %vm432_vm10 = vmor %vm430_vm9, %vm431_vm5 }
  0xef   :  { %v413_v43 = vmul.f32 %v3592_v5, %v412_v22  ;;  %v427_v59 = vsub.f32 1.0, %v426_v1  ;;  %v472_v22 = vmul.f32 %v4726_v8, %v471_v4  ;;  %v462_v4 = vsel %vm4751_vm13, %v4724_v16, %v458_v58 }
  0xf1   :  { %v414_v0 = vadd.f32 %v3592_v5, %v413_v43  ;;  %v428_v63 = vmul.f32 %v3594_v46, %v427_v59  ;;  %v473_v25 = vadd.f32 %v4726_v8, %v472_v22 }
  0xf3   :  { %v418_v19 = vsel %vm417_vm6, %v3592_v5, %v414_v0  ;;  %v429_v1 = vadd.f32 %v3594_v46, %v428_v63  ;;  %v478_v5 = vand.u32 2147483647, %v4720_v2  ;;  %v481_v0 = vor.u32 1.1754944e-38, %v480_v60 }
  0xf4   :  { %v423_v48 = vsel %vm420_vm8, %v422_v51, %v418_v19  ;;  %v477_v63 = vsel %vm476_vm14, %v4726_v8, %v473_v25 }
  0xf5   :  { %v433_v43 = vsel %vm432_vm10, %v3594_v46, %v429_v1  ;;  %v488_v59 = vmul.f32 %v423_v48, %v394_v62  ;;  %vm479_vm0 = vcmp.eq.f32.partialorder %v478_v5, 8.507059e+37 }
  0xf6   :  { %v438_v38 = vsel %vm435_vm12, %v437_v49, %v433_v43  ;;  %v482_v7 = vsel %vm479_vm0, %v481_v0, %v477_v63  ;;  %v6518_v0 = vld [vmem:[#allocation45_spill] sm:$0xff] }
  0xf7   :  { %v489_v62 = vmul.f32 %v485_v12, %v438_v38  ;;  %v490_v46 = vadd.f32 %v488_v59, %v4735_v61  ;;  %v467_v38 = vsel %vm464_vm15, %v466_v52, %v462_v4  ;;  %v495_v51 = vsub.f32 1.0, %v482_v7  ;;  %v6514_v59 = vld [vmem:[#allocation44_spill] sm:$0xff] }
  0xf8   :  { %v494_v2 = vsub.f32 1.0, %v467_v38  ;;  %v502_v58 = vmul.f32 %v467_v38, %v4542_v53  ;;  %v503_v1 = vmul.f32 %v499_v15, %v482_v7  ;;  %v6513_v53 = vld [vmem:[#allocation47_spill] sm:$0xff]  ;;  %v6517_v4 = vld [vmem:[#allocation48_spill] sm:$0xff] }
  0xf9   :  { %v491_v45 = vadd.f32 %v489_v62, %v4759_v39  ;;  %3595 = vtanh.f32 %v490_v46  ;;  %v6516_v62 = vld [vmem:[#allocation46_spill] sm:$0xff] }
  0xfb   :  { %3597 = vtanh.f32 %v491_v45 }
  0xff   :  { %v3596_v12 = vpop.eup %3595 }
 0x100   :  { %v496_v22 = vmul.f32 %v3596_v12, %v494_v2 }
 0x101   :  { %v3598_v16 = vpop.eup %3597 }
 0x102   :  { %v497_v19 = vmul.f32 %v3598_v16, %v495_v51  ;;  %v4771_v3 = vadd.f32 %v502_v58, %v496_v22 }
 0x104   :  { %v4773_v48 = vadd.f32 %v503_v1, %v497_v19  ;;  %506 = vst [vmem:[#allocation2] sm:$0x1] %v4771_v3 }
 0x106   :  { %507 = vst [vmem:[#allocation2 + $0x8] sm:$0x1] %v4773_v48  ;;  %v6386_v8 = vrot.slane %v4773_v48, 7 }
 0x108   :  { %v512_v49 = vsel %vm511_vm1, %v6386_v8, %v4771_v3 }
 0x109   :  { %530 = vmatmul.f32.vlgmr.msra.gmra.mxu2 %v512_v49  ;;  %550 = vmatmul.f32.vlgmr.msra.gmra.mxu3 %v512_v49 }
 0x10a   :  { %570 = vmatmul.f32.vlgmr.msra.gmra.mxu0 %v512_v49  ;;  %911 = vmatpush.msra.mxu2 %v4464_v30 }
 0x10b   :  { %1052 = vmatpush.msra.mxu3 %v4408_v6  ;;  %1072 = vmatpush.msra.mxu0 %v4411_v9  ;;  %v6497_v6 = vld [vmem:[#allocation28_spill] sm:$0xff]  ;;  %v6498_v9 = vld [vmem:[#allocation39_spill] sm:$0xff] }
 0x10c   :  { %912 = vmatpush.msra.mxu2 %v4474_v33 }
 0x10d   :  { %1053 = vmatpush.msra.mxu3 %v4413_v10  ;;  %1073 = vmatpush.msra.mxu0 %v4416_v11  ;;  %v6499_v10 = vld [vmem:[#allocation29_spill] sm:$0xff]  ;;  %v6500_v11 = vld [vmem:[#allocation30_spill] sm:$0xff] }
 0x10e   :  { %913 = vmatpush.msra.mxu2 %v4484_v36 }
 0x10f   :  { %1054 = vmatpush.msra.mxu3 %v4420_v13  ;;  %1074 = vmatpush.msra.mxu0 %v4422_v14  ;;  %v6501_v13 = vld [vmem:[#allocation40_spill] sm:$0xff]  ;;  %v6502_v14 = vld [vmem:[#allocation31_spill] sm:$0xff] }
 0x110   :  { %914 = vmatpush.msra.mxu2 %v4502_v41 }
 0x111   :  { %1055 = vmatpush.msra.mxu3 %v4428_v17  ;;  %1075 = vmatpush.msra.mxu0 %v4430_v18  ;;  %v6503_v17 = vld [vmem:[#allocation32_spill] sm:$0xff]  ;;  %v6504_v18 = vld [vmem:[#allocation41_spill] sm:$0xff] }
 0x112   :  { %915 = vmatpush.msra.mxu2 %v4512_v44 }
 0x113   :  { %1056 = vmatpush.msra.mxu3 %v4435_v20  ;;  %1076 = vmatpush.msra.mxu0 %v4437_v21  ;;  %v6505_v20 = vld [vmem:[#allocation33_spill] sm:$0xff]  ;;  %v6506_v21 = vld [vmem:[#allocation34_spill] sm:$0xff] }
 0x114   :  { %916 = vmatpush.msra.mxu2 %v4522_v47 }
 0x115   :  { %1057 = vmatpush.msra.mxu3 %v4442_v23  ;;  %1077 = vmatpush.msra.mxu0 %v4444_v24  ;;  %v6507_v23 = vld [vmem:[#allocation42_spill] sm:$0xff]  ;;  %v6508_v24 = vld [vmem:[#allocation35_spill] sm:$0xff] }
 0x116   :  { %917 = vmatpush.msra.mxu2 %v4532_v50 }
 0x117   :  { %1058 = vmatpush.msra.mxu3 %v4449_v26  ;;  %1078 = vmatpush.msra.mxu0 %v4451_v27  ;;  %v6509_v26 = vld [vmem:[#allocation36_spill] sm:$0xff]  ;;  %v6510_v27 = vld [vmem:[#allocation43_spill] sm:$0xff] }
 0x118   :  { %918 = vmatpush.msra.mxu2 %v4545_v54 }
 0x119   :  { %1059 = vmatpush.msra.mxu3 %v4457_v28  ;;  %1079 = vmatpush.msra.mxu0 %v4459_v29  ;;  %v6511_v28 = vld [vmem:[#allocation37_spill] sm:$0xff]  ;;  %v6512_v29 = vld [vmem:[#allocation38_spill] sm:$0xff] }
 0x11a   :  { %919 = vmatpush.msra.mxu2 %v4552_v55 }
 0x11b   :  { %1060 = vmatpush.msra.mxu3 %v4466_v31  ;;  %1080 = vmatpush.msra.mxu0 %v4468_v32 }
 0x11c   :  { %920 = vmatpush.msra.mxu2 %v4556_v56 }
 0x11d   :  { %1061 = vmatpush.msra.mxu3 %v4476_v34  ;;  %1081 = vmatpush.msra.mxu0 %v4478_v35 }
 0x11e   :  { %921 = vmatpush.msra.mxu2 %v4562_v57 }
 0x11f   :  { %1062 = vmatpush.msra.mxu3 %v4486_v37  ;;  %1082 = vmatpush.msra.mxu0 %v6497_v6 }
 0x120   :  { %922 = vmatpush.msra.mxu2 %v6498_v9 }
 0x121   :  { %1063 = vmatpush.msra.mxu3 %v6499_v10  ;;  %1083 = vmatpush.msra.mxu0 %v6500_v11 }
 0x122   :  { %923 = vmatpush.msra.mxu2 %v6501_v13 }
 0x123   :  { %1064 = vmatpush.msra.mxu3 %v6502_v14  ;;  %1084 = vmatpush.msra.mxu0 %v6503_v17 }
 0x124   :  { %924 = vmatpush.msra.mxu2 %v6504_v18 }
 0x125   :  { %1065 = vmatpush.msra.mxu3 %v6505_v20  ;;  %1085 = vmatpush.msra.mxu0 %v6506_v21 }
 0x126   :  { %925 = vmatpush.msra.mxu2 %v6507_v23 }
 0x127   :  { %1066 = vmatpush.msra.mxu3 %v6508_v24  ;;  %1086 = vmatpush.msra.mxu0 %v6509_v26 }
 0x128   :  { %926 = vmatpush.msra.mxu2 %v6510_v27 }
 0x129   :  { %1067 = vmatpush.msra.mxu3 %v6511_v28  ;;  %1087 = vmatpush.msra.mxu0 %v6512_v29 }
 0x18c   :  { %v531_v31 = vpop.f32.mrf.mxu2  ;;  %v551_v32 = vpop.f32.mrf.mxu3 }
 0x18d   :  { %v532_v43 = vadd.f32 %v531_v31, %v6513_v53  ;;  %v552_v60 = vadd.f32 %v551_v32, %v6514_v59  ;;  %v571_v32 = vpop.f32.mrf.mxu0 }
 0x18f   :  { %v575_v42 = vrot.slane %v532_v43, 7  ;;  %v579_v25 = vadd.f32 %v532_v43, %v6515_v40  ;;  %v619_v5 = vrot.slane %v552_v60, 7  ;;  %v623_v46 = vadd.f32 %v552_v60, %v6516_v62 }
 0x191   :  { %v578_v45 = vadd.f32 %v575_v42, %v6517_v4  ;;  %v3502_v52 = vmul.f32 -1.442695, %v579_v25  ;;  %v622_v63 = vadd.f32 %v619_v5, %v6518_v0  ;;  %v3504_v38 = vmul.f32 -1.442695, %v623_v46 }
 0x193   :  { %v3501_v7 = vmul.f32 -1.442695, %v578_v45  ;;  %3599 = vpow2.f32 %v3502_v52  ;;  %v3503_v15 = vmul.f32 -1.442695, %v622_v63  ;;  %v6519_v45 = vld [vmem:[#allocation50_spill] sm:$0xff] }
 0x194   :  { %3601 = vpow2.f32 %v3504_v38  ;;  %v572_v52 = vadd.f32 %v571_v32, %v6519_v45 }
 0x195   :  { %3603 = vpow2.f32 %v3501_v7 }
 0x196   :  { %3605 = vpow2.f32 %v3503_v15  ;;  %v663_v40 = vrot.slane %v572_v52, 7 }
 0x199   :  { %v3600_v2 = vpop.eup %3599 }
 0x19a   :  { %v3602_v12 = vpop.eup %3601  ;;  %v587_v51 = vadd.f32 1.0, %v3600_v2 }
 0x19b   :  { %v3604_v22 = vpop.eup %3603  ;;  %v4836_v58 = vadd.f32 1.0, %v3602_v12 }
 0x19c   :  { %v3606_v16 = vpop.eup %3605  ;;  %v586_v19 = vadd.f32 1.0, %v3604_v22  ;;  %3607 = vrcp.f32 %v587_v51  ;;  %v614_v63 = vand.u32 2147483648, %v587_v51  ;;  %v612_v12 = vand.u32 2147483647, %v587_v51 }
 0x19d   :  { %v4838_v1 = vadd.f32 1.0, %v3606_v16  ;;  %3609 = vrcp.f32 %v4836_v58  ;;  %vm608_vm3 = vweird.f32 %v587_v51  ;;  %vm652_vm6 = vweird.f32 %v4836_v58 }
 0x19e   :  { %3611 = vrcp.f32 %v586_v19  ;;  %v599_v22 = vand.u32 2147483648, %v586_v19  ;;  %v597_v0 = vand.u32 2147483647, %v586_v19  ;;  %vm593_vm7 = vweird.f32 %v586_v19 }
 0x19f   :  { %3613 = vrcp.f32 %v4838_v1  ;;  %vm613_vm8 = vcmp.eq.f32.partialorder %v612_v12, 8.507059e+37  ;;  %vm637_vm14 = vweird.f32 %v4838_v1 }
 0x1a0   :  { %vm598_vm11 = vcmp.eq.f32.partialorder %v597_v0, 8.507059e+37 }
 0x1a2   :  { %v3608_v49 = vpop.eup %3607 }
 0x1a3   :  { %v3610_v31 = vpop.eup %3609  ;;  %v604_v43 = vmul.f32 %v3608_v49, %v587_v51  ;;  %vm609_vm2 = vweird.f32 %v3608_v49 }
 0x1a4   :  { %v3612_v60 = vpop.eup %3611  ;;  %v648_v42 = vmul.f32 %v3610_v31, %v4836_v58  ;;  %vm610_vm5 = vmor %vm608_vm3, %vm609_vm2  ;;  %vm653_vm10 = vweird.f32 %v3610_v31 }
 0x1a5   :  { %v3614_v25 = vpop.eup %3613  ;;  %v589_v5 = vmul.f32 %v3612_v60, %v586_v19  ;;  %v605_v46 = vsub.f32 1.0, %v604_v43  ;;  %vm594_vm4 = vweird.f32 %v3612_v60  ;;  %v615_v43 = vor.u32 1.1754944e-38, %v614_v63  ;;  %vm654_vm13 = vmor %vm652_vm6, %vm653_vm10 }
 0x1a6   :  { %v633_v38 = vmul.f32 %v3614_v25, %v4838_v1  ;;  %v649_v7 = vsub.f32 1.0, %v648_v42  ;;  %vm595_vm9 = vmor %vm593_vm7, %vm594_vm4  ;;  %vm638_vm12 = vweird.f32 %v3614_v25  ;;  %v656_v63 = vand.u32 2147483647, %v4836_v58 }
 0x1a7   :  { %v590_v15 = vsub.f32 1.0, %v589_v5  ;;  %v606_v2 = vmul.f32 %v3608_v49, %v605_v46  ;;  %v600_v5 = vor.u32 1.1754944e-38, %v599_v22  ;;  %vm639_vm15 = vmor %vm637_vm14, %vm638_vm12  ;;  %v676_v22 = vrot.slane %v4771_v3, 7 }
 0x1a8   :  { %v634_v16 = vsub.f32 1.0, %v633_v38  ;;  %v650_v8 = vmul.f32 %v3610_v31, %v649_v7  ;;  %v658_v7 = vand.u32 2147483648, %v4836_v58  ;;  %vm657_vm0 = vcmp.eq.f32.partialorder %v656_v63, 8.507059e+37  ;;  %v4892_v63 = vld [vmem:[#allocation9 + $0x128] sm:$0xff] }
 0x1a9   :  { %v591_v62 = vmul.f32 %v3612_v60, %v590_v15  ;;  %v607_v59 = vadd.f32 %v3608_v49, %v606_v2 }
 0x1aa   :  { %v635_v32 = vmul.f32 %v3614_v25, %v634_v16  ;;  %v651_v51 = vadd.f32 %v3610_v31, %v650_v8  ;;  %v641_v8 = vand.u32 2147483647, %v4838_v1  ;;  %v659_v19 = vor.u32 1.1754944e-38, %v658_v7  ;;  %v4875_v7 = vld [vmem:[#allocation9 + $0x150] sm:$0xff] }
 0x1ab   :  { %v592_v45 = vadd.f32 %v3612_v60, %v591_v62  ;;  %v611_v42 = vsel %vm610_vm5, %v3608_v49, %v607_v59  ;;  %v643_v62 = vand.u32 2147483648, %v4838_v1  ;;  %v6520_v1 = vrot.slane %v4773_v48, 7  ;;  %v4868_v48 = vld [vmem:[#allocation9 + $0x168] sm:$0xff] }
 0x1ac   :  { %v616_v46 = vsel %vm613_vm8, %v615_v43, %v611_v42  ;;  %v636_v4 = vadd.f32 %v3614_v25, %v635_v32  ;;  %v655_v0 = vsel %vm654_vm13, %v3610_v31, %v651_v51  ;;  %vm642_vm2 = vcmp.eq.f32.partialorder %v641_v8, 8.507059e+37  ;;  %v4920_v8 = vld [vmem:[#allocation9 + $0xc8] sm:$0xff] }
 0x1ad   :  { %v596_v38 = vsel %vm595_vm9, %v3612_v60, %v592_v45  ;;  %v667_v15 = vmul.f32 %v616_v46, %v572_v52  ;;  %v660_v45 = vsel %vm657_vm0, %v659_v19, %v655_v0  ;;  %v4927_v0 = vld [vmem:[#allocation9 + $0xb0] sm:$0xff] }
 0x1ae   :  { %v601_v2 = vsel %vm598_vm11, %v600_v5, %v596_v38  ;;  %v640_v60 = vsel %vm639_vm15, %v3614_v25, %v636_v4  ;;  %v673_v52 = vsub.f32 1.0, %v660_v45  ;;  %v680_v31 = vmul.f32 %v660_v45, %v6520_v1  ;;  %v4871_v38 = vld [vmem:[#allocation9 + $0x170] sm:$0xff] }
 0x1af   :  { %v666_v16 = vmul.f32 %v663_v40, %v601_v2  ;;  %v669_v59 = vadd.f32 %v667_v15, %v4759_v39  ;;  %v644_v40 = vor.u32 1.1754944e-38, %v643_v62  ;;  %v4878_v15 = vld [vmem:[#allocation9 + $0x158] sm:$0xff]  ;;  %v4885_v2 = vld [vmem:[#allocation9 + $0x140] sm:$0xff] }
 0x1b0   :  { %v4906_v62 = vld [vmem:[#allocation9 + $0xf8] sm:$0xff] }
 0x1b1   :  { %v668_v49 = vadd.f32 %v666_v16, %v4735_v61  ;;  %3615 = vtanh.f32 %v669_v59  ;;  %v645_v58 = vsel %vm642_vm2, %v644_v40, %v640_v60  ;;  %v4899_v16 = vld [vmem:[#allocation9 + $0x110] sm:$0xff]  ;;  %v4913_v59 = vld [vmem:[#allocation9 + $0xe0] sm:$0xff] }
 0x1b2   :  { %v672_v43 = vsub.f32 1.0, %v645_v58  ;;  %v679_v46 = vmul.f32 %v676_v22, %v645_v58 }
 0x1b3   :  { %3617 = vtanh.f32 %v668_v49 }
 0x1b7   :  { %v3616_v12 = vpop.eup %3615 }
 0x1b8   :  { %v675_v32 = vmul.f32 %v3616_v12, %v673_v52 }
 0x1b9   :  { %v3618_v42 = vpop.eup %3617 }
 0x1ba   :  { %v674_v5 = vmul.f32 %v3618_v42, %v672_v43  ;;  %v4858_v51 = vadd.f32 %v680_v31, %v675_v32  ;;  %v6526_v43 = vld [vmem:[#allocation50_spill] sm:$0xff] }
 0x1bc   :  { %v4860_v4 = vadd.f32 %v679_v46, %v674_v5  ;;  %684 = vst [vmem:[#allocation2 + $0x8] sm:$0x2] %v4858_v51 }
 0x1be   :  { %683 = vst [vmem:[#allocation2] sm:$0x2] %v4860_v4  ;;  %v687_v25 = vrot.slane %v4860_v4, 1 }
 0x1c0   :  { %v688_v3 = vsel %vm511_vm1, %v4858_v51, %v687_v25 }
 0x1c1   :  { %706 = vmatmul.f32.vlgmr.msra.gmra.mxu1 %v688_v3  ;;  %726 = vmatmul.f32.vlgmr.msrb.gmra.mxu2 %v688_v3 }
 0x1c2   :  { %746 = vmatmul.f32.vlgmr.msrb.gmra.mxu3 %v688_v3  ;;  %1092 = vmatpush.msra.mxu1 %v4464_v30  ;;  %v4882_v30 = vld [vmem:[#allocation9 + $0x138] sm:$0xff] }
 0x1c3   :  { %1233 = vmatpush.msrb.mxu2 %v4868_v48  ;;  %1253 = vmatpush.msrb.mxu3 %v4871_v38 }
 0x1c4   :  { %1093 = vmatpush.msra.mxu1 %v4474_v33  ;;  %v4889_v33 = vld [vmem:[#allocation9 + $0x120] sm:$0xff] }
 0x1c5   :  { %1234 = vmatpush.msrb.mxu2 %v4875_v7  ;;  %1254 = vmatpush.msrb.mxu3 %v4878_v15 }
 0x1c6   :  { %1094 = vmatpush.msra.mxu1 %v4484_v36  ;;  %v4896_v36 = vld [vmem:[#allocation9 + $0x108] sm:$0xff] }
 0x1c7   :  { %1235 = vmatpush.msrb.mxu2 %v4882_v30  ;;  %1255 = vmatpush.msrb.mxu3 %v4885_v2 }
 0x1c8   :  { %1095 = vmatpush.msra.mxu1 %v4502_v41  ;;  %v4903_v41 = vld [vmem:[#allocation9 + $0xf0] sm:$0xff] }
 0x1c9   :  { %1236 = vmatpush.msrb.mxu2 %v4889_v33  ;;  %1256 = vmatpush.msrb.mxu3 %v4892_v63 }
 0x1ca   :  { %1096 = vmatpush.msra.mxu1 %v4512_v44  ;;  %v4910_v44 = vld [vmem:[#allocation9 + $0xd8] sm:$0xff] }
 0x1cb   :  { %1237 = vmatpush.msrb.mxu2 %v4896_v36  ;;  %1257 = vmatpush.msrb.mxu3 %v4899_v16 }
 0x1cc   :  { %1097 = vmatpush.msra.mxu1 %v4522_v47  ;;  %v4917_v47 = vld [vmem:[#allocation9 + $0xc0] sm:$0xff] }
 0x1cd   :  { %1238 = vmatpush.msrb.mxu2 %v4903_v41  ;;  %1258 = vmatpush.msrb.mxu3 %v4906_v62 }
 0x1ce   :  { %1098 = vmatpush.msra.mxu1 %v4532_v50  ;;  %v4924_v50 = vld [vmem:[#allocation9 + $0xa8] sm:$0xff] }
 0x1cf   :  { %1239 = vmatpush.msrb.mxu2 %v4910_v44  ;;  %1259 = vmatpush.msrb.mxu3 %v4913_v59 }
 0x1d0   :  { %1099 = vmatpush.msra.mxu1 %v4545_v54 }
 0x1d1   :  { %1240 = vmatpush.msrb.mxu2 %v4917_v47  ;;  %1260 = vmatpush.msrb.mxu3 %v4920_v8 }
 0x1d2   :  { %1100 = vmatpush.msra.mxu1 %v4552_v55  ;;  %v6521_v55 = vld [vmem:[#allocation48_spill] sm:$0xff] }
 0x1d3   :  { %1241 = vmatpush.msrb.mxu2 %v4924_v50  ;;  %1261 = vmatpush.msrb.mxu3 %v4927_v0 }
 0x1d4   :  { %1101 = vmatpush.msra.mxu1 %v4556_v56 }
 0x1d5   :  { %1242 = vmatpush.msrb.mxu2 %v4476_v34  ;;  %1262 = vmatpush.msrb.mxu3 %v4478_v35 }
 0x1d6   :  { %1102 = vmatpush.msra.mxu1 %v4562_v57  ;;  %v6522_v57 = vld [vmem:[#allocation49_spill] sm:$0xff] }
 0x1d7   :  { %1243 = vmatpush.msrb.mxu2 %v4486_v37  ;;  %1263 = vmatpush.msrb.mxu3 %v6497_v6 }
 0x1d8   :  { %1103 = vmatpush.msra.mxu1 %v6498_v9 }
 0x1d9   :  { %1244 = vmatpush.msrb.mxu2 %v6499_v10  ;;  %1264 = vmatpush.msrb.mxu3 %v6500_v11 }
 0x1da   :  { %1104 = vmatpush.msra.mxu1 %v6501_v13  ;;  %v6523_v13 = vld [vmem:[#allocation44_spill] sm:$0xff] }
 0x1db   :  { %1245 = vmatpush.msrb.mxu2 %v6502_v14  ;;  %1265 = vmatpush.msrb.mxu3 %v6503_v17 }
 0x1dc   :  { %1105 = vmatpush.msra.mxu1 %v6504_v18 }
 0x1dd   :  { %1246 = vmatpush.msrb.mxu2 %v6505_v20  ;;  %1266 = vmatpush.msrb.mxu3 %v6506_v21  ;;  %v6524_v20 = vld [vmem:[#allocation45_spill] sm:$0xff] }
 0x1de   :  { %1106 = vmatpush.msra.mxu1 %v6507_v23  ;;  %v6525_v23 = vld [vmem:[#allocation46_spill] sm:$0xff] }
 0x1df   :  { %1247 = vmatpush.msrb.mxu2 %v6508_v24  ;;  %1267 = vmatpush.msrb.mxu3 %v6509_v26 }
 0x1e0   :  { %1107 = vmatpush.msra.mxu1 %v6510_v27 }
 0x1e1   :  { %1248 = vmatpush.msrb.mxu2 %v6511_v28  ;;  %1268 = vmatpush.msrb.mxu3 %v6512_v29 }
 0x23e   :  { %v707_v34 = vpop.f32.mrf.mxu1 }
 0x23f   :  { %v708_v35 = vadd.f32 %v707_v34, %v6513_v53 }
 0x241   :  { %v751_v37 = vrot.slane %v708_v35, 6  ;;  %v752_v54 = vrot.slane %v708_v35, 7 }
 0x243   :  { %v755_v56 = vadd.f32 %v751_v37, %v6521_v55  ;;  %v756_v6 = vadd.f32 %v752_v54, %v6522_v57 }
 0x244   :  { %v727_v9 = vpop.f32.mrf.mxu2 }
 0x245   :  { %v3505_v10 = vmul.f32 -1.442695, %v755_v56  ;;  %v3506_v11 = vmul.f32 -1.442695, %v756_v6  ;;  %v728_v14 = vadd.f32 %v727_v9, %v6523_v13  ;;  %v747_v58 = vpop.f32.mrf.mxu3 }
 0x246   :  { %v748_v32 = vadd.f32 %v747_v58, %v6526_v43 }
 0x247   :  { %3619 = vpow2.f32 %v3505_v10  ;;  %v796_v17 = vrot.slane %v728_v14, 6  ;;  %v797_v18 = vrot.slane %v728_v14, 7 }
 0x248   :  { %3621 = vpow2.f32 %v3506_v11  ;;  %v841_v37 = vrot.slane %v748_v32, 6  ;;  %v842_v6 = vrot.slane %v748_v32, 7 }
 0x249   :  { %v800_v21 = vadd.f32 %v796_v17, %v6524_v20  ;;  %v801_v24 = vadd.f32 %v797_v18, %v6525_v23 }
 0x24b   :  { %v3507_v26 = vmul.f32 -1.442695, %v800_v21  ;;  %v3508_v27 = vmul.f32 -1.442695, %v801_v24 }
 0x24d   :  { %v3620_v28 = vpop.eup %3619  ;;  %3623 = vpow2.f32 %v3507_v26 }
 0x24e   :  { %v3622_v29 = vpop.eup %3621  ;;  %v763_v19 = vadd.f32 1.0, %v3620_v28  ;;  %3625 = vpow2.f32 %v3508_v27 }
 0x24f   :  { %v764_v49 = vadd.f32 1.0, %v3622_v29 }
 0x250   :  { %3627 = vrcp.f32 %v763_v19  ;;  %v774_v5 = vand.u32 2147483647, %v763_v19  ;;  %v776_v46 = vand.u32 2147483648, %v763_v19  ;;  %vm770_vm4 = vweird.f32 %v763_v19 }
 0x251   :  { %3629 = vrcp.f32 %v764_v49  ;;  %v789_v3 = vand.u32 2147483647, %v764_v49  ;;  %v791_v35 = vand.u32 2147483648, %v764_v49  ;;  %vm785_vm7 = vweird.f32 %v764_v49 }
 0x252   :  { %vm775_vm6 = vcmp.eq.f32.partialorder %v774_v5, 8.507059e+37  ;;  %v777_v17 = vor.u32 1.1754944e-38, %v776_v46 }
 0x253   :  { %v3624_v60 = vpop.eup %3623  ;;  %vm790_vm9 = vcmp.eq.f32.partialorder %v789_v3, 8.507059e+37  ;;  %v792_v27 = vor.u32 1.1754944e-38, %v791_v35 }
 0x254   :  { %v3626_v40 = vpop.eup %3625  ;;  %v4957_v45 = vadd.f32 1.0, %v3624_v60 }
 0x255   :  { %v4959_v52 = vadd.f32 1.0, %v3626_v40 }
 0x256   :  { %v3628_v12 = vpop.eup %3627  ;;  %3631 = vrcp.f32 %v4957_v45  ;;  %v821_v24 = vand.u32 2147483648, %v4957_v45  ;;  %v819_v60 = vand.u32 2147483647, %v4957_v45  ;;  %vm815_vm13 = vweird.f32 %v4957_v45 }
 0x257   :  { %v3630_v22 = vpop.eup %3629  ;;  %3633 = vrcp.f32 %v4959_v52  ;;  %v766_v1 = vmul.f32 %v3628_v12, %v763_v19  ;;  %vm771_vm3 = vweird.f32 %v3628_v12  ;;  %vm830_vm15 = vweird.f32 %v4959_v52 }
 0x258   :  { %v781_v31 = vmul.f32 %v3630_v22, %v764_v49  ;;  %vm786_vm5 = vweird.f32 %v3630_v22  ;;  %vm772_vm8 = vmor %vm770_vm4, %vm771_vm3  ;;  %vm820_vm2 = vcmp.eq.f32.partialorder %v819_v60, 8.507059e+37  ;;  %v5006_v60 = vld [vmem:[#allocation9 + $0x118] sm:$0xff] }
 0x259   :  { %v767_v42 = vsub.f32 1.0, %v766_v1  ;;  %vm787_vm10 = vmor %vm785_vm7, %vm786_vm5  ;;  %v836_v1 = vand.u32 2147483648, %v4959_v52 }
 0x25a   :  { %v782_v25 = vsub.f32 1.0, %v781_v31 }
 0x25b   :  { %v768_v34 = vmul.f32 %v3628_v12, %v767_v42  ;;  %v834_v42 = vand.u32 2147483647, %v4959_v52 }
 0x25c   :  { %v3632_v54 = vpop.eup %3631  ;;  %v783_v56 = vmul.f32 %v3630_v22, %v782_v25  ;;  %v822_v25 = vor.u32 1.1754944e-38, %v821_v24 }
 0x25d   :  { %v3634_v9 = vpop.eup %3633  ;;  %v811_v10 = vmul.f32 %v3632_v54, %v4957_v45  ;;  %v769_v11 = vadd.f32 %v3628_v12, %v768_v34  ;;  %vm816_vm11 = vweird.f32 %v3632_v54  ;;  %v837_v34 = vor.u32 1.1754944e-38, %v836_v1  ;;  %v5031_v1 = vld [vmem:[#allocation9 + $0xa0] sm:$0xff] }
 0x25e   :  { %v826_v14 = vmul.f32 %v3634_v9, %v4959_v52  ;;  %v784_v18 = vadd.f32 %v3630_v22, %v783_v56  ;;  %vm831_vm12 = vweird.f32 %v3634_v9  ;;  %vm817_vm14 = vmor %vm815_vm13, %vm816_vm11  ;;  %vm835_vm3 = vcmp.eq.f32.partialorder %v834_v42, 8.507059e+37  ;;  %v5040_v42 = vld [vmem:[#allocation9 + $0x88] sm:$0xff] }
 0x25f   :  { %v812_v21 = vsub.f32 1.0, %v811_v10  ;;  %v773_v26 = vsel %vm772_vm8, %v3628_v12, %v769_v11  ;;  %vm832_vm0 = vmor %vm830_vm15, %vm831_vm12  ;;  %v856_v52 = vrot.slane %v4858_v51, 7  ;;  %6527 = vst [vmem:[#allocation28_spill] sm:$0xff] %v5040_v42 }
 0x260   :  { %v827_v28 = vsub.f32 1.0, %v826_v14  ;;  %v778_v29 = vsel %vm775_vm6, %v777_v17, %v773_v26  ;;  %v788_v19 = vsel %vm787_vm10, %v3630_v22, %v784_v18 }
 0x261   :  { %v813_v40 = vmul.f32 %v3632_v54, %v812_v21  ;;  %v793_v49 = vsel %vm790_vm9, %v792_v27, %v788_v19  ;;  %v845_v58 = vmul.f32 %v841_v37, %v778_v29  ;;  %v4986_v27 = vld [vmem:[#allocation9 + $0x178] sm:$0xff]  ;;  %v4996_v29 = vld [vmem:[#allocation9 + $0x148] sm:$0xff]  ;;  %v5001_v19 = vld [vmem:[#allocation9 + $0x130] sm:$0xff] }
 0x262   :  { %v828_v32 = vmul.f32 %v3634_v9, %v827_v28  ;;  %v846_v31 = vmul.f32 %v842_v6, %v793_v49  ;;  %v855_v6 = vrot.slane %v4860_v4, 7  ;;  %v4991_v28 = vld [vmem:[#allocation9 + $0x160] sm:$0xff]  ;;  %v5016_v49 = vld [vmem:[#allocation9 + $0xe8] sm:$0xff] }
 0x263   :  { %v814_v12 = vadd.f32 %v3632_v54, %v813_v40  ;;  %v847_v5 = vadd.f32 %v845_v58, %v4735_v61  ;;  %v5011_v40 = vld [vmem:[#allocation9 + $0x100] sm:$0xff]  ;;  %v5021_v58 = vld [vmem:[#allocation9 + $0xd0] sm:$0xff] }
 0x264   :  { %v829_v22 = vadd.f32 %v3634_v9, %v828_v32  ;;  %v848_v46 = vadd.f32 %v846_v31, %v4759_v39  ;;  %v5026_v32 = vld [vmem:[#allocation9 + $0xb8] sm:$0xff]  ;;  %v5034_v31 = vld [vmem:[#allocation9 + $0x90] sm:$0xff] }
 0x265   :  { %v818_v3 = vsel %vm817_vm14, %v3632_v54, %v814_v12  ;;  %3635 = vtanh.f32 %v847_v5  ;;  %v5037_v12 = vld [vmem:[#allocation9 + $0x98] sm:$0xff] }
 0x266   :  { %v833_v35 = vsel %vm832_vm0, %v3634_v9, %v829_v22  ;;  %3637 = vtanh.f32 %v848_v46  ;;  %v823_v45 = vsel %vm820_vm2, %v822_v25, %v818_v3  ;;  %v5043_v5 = vld [vmem:[#allocation9 + $0x78] sm:$0xff]  ;;  %v5046_v22 = vld [vmem:[#allocation9 + $0x80] sm:$0xff]  ;;  %v5049_v46 = vld [vmem:[#allocation9 + $0x70] sm:$0xff] }
 0x267   :  { %v838_v37 = vsel %vm835_vm3, %v837_v34, %v833_v35  ;;  %v851_v56 = vsub.f32 1.0, %v823_v45  ;;  %v859_v18 = vmul.f32 %v855_v6, %v823_v45  ;;  %6528 = vst [vmem:[#allocation39_spill] sm:$0xff] %v5043_v5  ;;  %v5052_v25 = vld [vmem:[#allocation9 + $0x60] sm:$0xff]  ;;  %v5055_v3 = vld [vmem:[#allocation9 + $0x68] sm:$0xff]  ;;  %v5058_v34 = vld [vmem:[#allocation9 + $0x58] sm:$0xff] }
 0x268   :  { %v852_v11 = vsub.f32 1.0, %v838_v37  ;;  %v860_v54 = vmul.f32 %v856_v52, %v838_v37  ;;  %6529 = vst [vmem:[#allocation29_spill] sm:$0xff] %v5046_v22  ;;  %v5061_v35 = vld [vmem:[#allocation9 + $0x48] sm:$0xff]  ;;  %v5064_v45 = vld [vmem:[#allocation9 + $0x50] sm:$0xff]  ;;  %v5067_v37 = vld [vmem:[#allocation9 + $0x40] sm:$0xff] }
 0x269   :  { %6530 = vst [vmem:[#allocation30_spill] sm:$0xff] %v5049_v46  ;;  %v5073_v6 = vld [vmem:[#allocation9 + $0x38] sm:$0xff] }
 0x26a   :  { %6531 = vst [vmem:[#allocation40_spill] sm:$0xff] %v5052_v25  ;;  %v5079_v52 = vld [vmem:[#allocation9 + $0x18] sm:$0xff] }
 0x26b   :  { %v3636_v10 = vpop.eup %3635  ;;  %6532 = vst [vmem:[#allocation31_spill] sm:$0xff] %v5055_v3 }
 0x26c   :  { %v3638_v14 = vpop.eup %3637  ;;  %v853_v17 = vmul.f32 %v3636_v10, %v851_v56  ;;  %6533 = vst [vmem:[#allocation32_spill] sm:$0xff] %v5058_v34  ;;  %v5070_v56 = vld [vmem:[#allocation9 + $0x30] sm:$0xff]  ;;  %v5076_v10 = vld [vmem:[#allocation9 + $0x28] sm:$0xff] }
 0x26d   :  { %v854_v21 = vmul.f32 %v3638_v14, %v852_v11  ;;  %6534 = vst [vmem:[#allocation41_spill] sm:$0xff] %v5061_v35  ;;  %v5082_v11 = vld [vmem:[#allocation9 + $0x20] sm:$0xff]  ;;  %v5085_v14 = vld [vmem:[#allocation9 + $0x10] sm:$0xff] }
 0x26e   :  { %v4977_v24 = vadd.f32 %v859_v18, %v853_v17  ;;  %6535 = vst [vmem:[#allocation33_spill] sm:$0xff] %v5064_v45  ;;  %v5088_v17 = vld [vmem:[#allocation9] sm:$0xff]  ;;  %v5091_v18 = vld [vmem:[#allocation9 + $0x8] sm:$0xff] }
 0x26f   :  { %v4979_v26 = vadd.f32 %v860_v54, %v854_v21  ;;  %6536 = vst [vmem:[#allocation34_spill] sm:$0xff] %v5067_v37 }
 0x270   :  { %863 = vst [vmem:[#allocation2] sm:$0x4] %v4977_v24  ;;  %v867_v9 = vrot.slane %v4977_v24, 2 }
 0x271   :  { %864 = vst [vmem:[#allocation2 + $0x8] sm:$0x4] %v4979_v26  ;;  %v868_v4 = vrot.slane %v4979_v26, 1 }
 0x272   :  { %6537 = vst [vmem:[#allocation42_spill] sm:$0xff] %v5070_v56 }
 0x273   :  { %v869_v51 = vsel %vm511_vm1, %v868_v4, %v867_v9  ;;  %6538 = vst [vmem:[#allocation35_spill] sm:$0xff] %v5073_v6 }
 0x274   :  { %887 = vmatmul.f32.vlgmr.msrb.gmra.mxu0 %v869_v51  ;;  %907 = vmatmul.f32.vlgmr.msrb.gmra.mxu1 %v869_v51  ;;  %6539 = vst [vmem:[#allocation36_spill] sm:$0xff] %v5076_v10 }
 0x275   :  { %927 = vmatmul.f32.vlgmr.msra.gmra.mxu2 %v869_v51  ;;  %1273 = vmatpush.msrb.mxu0 %v4986_v27  ;;  %6540 = vst [vmem:[#allocation43_spill] sm:$0xff] %v5079_v52 }
 0x276   :  { %1414 = vmatpush.msrb.mxu1 %v4868_v48  ;;  %1434 = vmatpush.msra.mxu2 %v4871_v38  ;;  %6541 = vst [vmem:[#allocation37_spill] sm:$0xff] %v5082_v11 }
 0x277   :  { %1274 = vmatpush.msrb.mxu0 %v4991_v28  ;;  %6542 = vst [vmem:[#allocation38_spill] sm:$0xff] %v5085_v14 }
 0x278   :  { %1415 = vmatpush.msrb.mxu1 %v4875_v7  ;;  %1435 = vmatpush.msra.mxu2 %v4878_v15  ;;  %6543 = vst [vmem:[#allocation51_spill] sm:$0xff] %v5088_v17 }
 0x279   :  { %1275 = vmatpush.msrb.mxu0 %v4996_v29  ;;  %6544 = vst [vmem:[#allocation52_spill] sm:$0xff] %v5091_v18 }
 0x27a   :  { %1416 = vmatpush.msrb.mxu1 %v4882_v30  ;;  %1436 = vmatpush.msra.mxu2 %v4885_v2 }
 0x27b   :  { %1276 = vmatpush.msrb.mxu0 %v5001_v19 }
 0x27c   :  { %1417 = vmatpush.msrb.mxu1 %v4889_v33  ;;  %1437 = vmatpush.msra.mxu2 %v4892_v63 }
 0x27d   :  { %1277 = vmatpush.msrb.mxu0 %v5006_v60 }
 0x27e   :  { %1418 = vmatpush.msrb.mxu1 %v4896_v36  ;;  %1438 = vmatpush.msra.mxu2 %v4899_v16 }
 0x27f   :  { %1278 = vmatpush.msrb.mxu0 %v5011_v40 }
 0x280   :  { %1419 = vmatpush.msrb.mxu1 %v4903_v41  ;;  %1439 = vmatpush.msra.mxu2 %v4906_v62 }
 0x281   :  { %1279 = vmatpush.msrb.mxu0 %v5016_v49 }
 0x282   :  { %1420 = vmatpush.msrb.mxu1 %v4910_v44  ;;  %1440 = vmatpush.msra.mxu2 %v4913_v59 }
 0x283   :  { %1280 = vmatpush.msrb.mxu0 %v5021_v58 }
 0x284   :  { %1421 = vmatpush.msrb.mxu1 %v4917_v47  ;;  %1441 = vmatpush.msra.mxu2 %v4920_v8 }
 0x285   :  { %1281 = vmatpush.msrb.mxu0 %v5026_v32 }
 0x286   :  { %1422 = vmatpush.msrb.mxu1 %v4924_v50  ;;  %1442 = vmatpush.msra.mxu2 %v4927_v0 }
 0x287   :  { %1282 = vmatpush.msrb.mxu0 %v5031_v1 }
 0x288   :  { %1423 = vmatpush.msrb.mxu1 %v5034_v31  ;;  %1443 = vmatpush.msra.mxu2 %v5037_v12 }
 0x289   :  { %1283 = vmatpush.msrb.mxu0 %v5040_v42 }
 0x28a   :  { %1424 = vmatpush.msrb.mxu1 %v5043_v5  ;;  %1444 = vmatpush.msra.mxu2 %v5046_v22 }
 0x28b   :  { %1284 = vmatpush.msrb.mxu0 %v5049_v46 }
 0x28c   :  { %1425 = vmatpush.msrb.mxu1 %v5052_v25  ;;  %1445 = vmatpush.msra.mxu2 %v5055_v3 }
 0x28d   :  { %1285 = vmatpush.msrb.mxu0 %v5058_v34 }
 0x28e   :  { %1426 = vmatpush.msrb.mxu1 %v5061_v35  ;;  %1446 = vmatpush.msra.mxu2 %v5064_v45 }
 0x28f   :  { %1286 = vmatpush.msrb.mxu0 %v5067_v37 }
 0x290   :  { %1427 = vmatpush.msrb.mxu1 %v5070_v56  ;;  %1447 = vmatpush.msra.mxu2 %v5073_v6 }
 0x291   :  { %1287 = vmatpush.msrb.mxu0 %v5076_v10 }
 0x292   :  { %1428 = vmatpush.msrb.mxu1 %v5079_v52  ;;  %1448 = vmatpush.msra.mxu2 %v5082_v11 }
 0x293   :  { %1288 = vmatpush.msrb.mxu0 %v5085_v14 }
 0x294   :  { %1429 = vmatpush.msrb.mxu1 %v5088_v17  ;;  %1449 = vmatpush.msra.mxu2 %v5091_v18 }
 0x2f1   :  { %v888_v21 = vpop.f32.mrf.mxu0  ;;  %v908_v54 = vpop.f32.mrf.mxu1 }
 0x2f2   :  { %v889_v9 = vadd.f32 %v888_v21, %v6513_v53  ;;  %v909_v4 = vadd.f32 %v908_v54, %v6523_v13 }
 0x2f4   :  { %v932_v51 = vrot.slane %v889_v9, 5  ;;  %v933_v11 = vrot.slane %v889_v9, 6  ;;  %v977_v52 = vrot.slane %v909_v4, 5  ;;  %v978_v10 = vrot.slane %v909_v4, 6 }
 0x2f6   :  { %v936_v14 = vadd.f32 %v932_v51, %v6521_v55  ;;  %v937_v6 = vadd.f32 %v933_v11, %v6522_v57  ;;  %v981_v17 = vadd.f32 %v977_v52, %v6524_v20  ;;  %v982_v56 = vadd.f32 %v978_v10, %v6525_v23 }
 0x2f8   :  { %v3509_v37 = vmul.f32 -1.442695, %v936_v14  ;;  %v3510_v18 = vmul.f32 -1.442695, %v937_v6  ;;  %v3511_v45 = vmul.f32 -1.442695, %v981_v17  ;;  %v928_v6 = vpop.f32.mrf.mxu2 }
 0x2f9   :  { %v3512_v35 = vmul.f32 -1.442695, %v982_v56 }
 0x2fa   :  { %3639 = vpow2.f32 %v3509_v37 }
 0x2fb   :  { %3641 = vpow2.f32 %v3510_v18 }
 0x2fc   :  { %3643 = vpow2.f32 %v3511_v45  ;;  %v929_v45 = vadd.f32 %v928_v6, %v6526_v43 }
 0x2fd   :  { %3645 = vpow2.f32 %v3512_v35 }
 0x2fe   :  { %v1023_v3 = vrot.slane %v929_v45, 6 }
 0x300   :  { %v3640_v21 = vpop.eup %3639 }
 0x301   :  { %v3642_v54 = vpop.eup %3641  ;;  %v944_v9 = vadd.f32 1.0, %v3640_v21 }
 0x302   :  { %v3644_v4 = vpop.eup %3643  ;;  %v945_v53 = vadd.f32 1.0, %v3642_v54 }
 0x303   :  { %v3646_v51 = vpop.eup %3645  ;;  %3647 = vrcp.f32 %v944_v9  ;;  %v5100_v11 = vadd.f32 1.0, %v3644_v4  ;;  %v955_v54 = vand.u32 2147483647, %v944_v9  ;;  %v1022_v4 = vrot.slane %v929_v45, 5 }
 0x304   :  { %3649 = vrcp.f32 %v945_v53  ;;  %v5102_v52 = vadd.f32 1.0, %v3646_v51  ;;  %v957_v57 = vand.u32 2147483648, %v944_v9  ;;  %v970_v23 = vand.u32 2147483647, %v945_v53 }
 0x305   :  { %3651 = vrcp.f32 %v5100_v11  ;;  %v972_v6 = vand.u32 2147483648, %v945_v53  ;;  %vm951_vm6 = vweird.f32 %v944_v9  ;;  %vm966_vm7 = vweird.f32 %v945_v53 }
 0x306   :  { %3653 = vrcp.f32 %v5102_v52  ;;  %v958_v5 = vor.u32 1.1754944e-38, %v957_v57  ;;  %vm956_vm9 = vcmp.eq.f32.partialorder %v955_v54, 8.507059e+37  ;;  %vm971_vm11 = vcmp.eq.f32.partialorder %v970_v23, 8.507059e+37 }
 0x307   :  { %vm996_vm14 = vweird.f32 %v5100_v11  ;;  %v1000_v57 = vand.u32 2147483647, %v5100_v11  ;;  %vm1011_vm0 = vweird.f32 %v5102_v52  ;;  %v1015_v23 = vand.u32 2147483647, %v5102_v52 }
 0x308   :  { %v1037_v54 = vrot.slane %v4979_v26, 7 }
 0x309   :  { %v3648_v35 = vpop.eup %3647  ;;  %vm1001_vm3 = vcmp.eq.f32.partialorder %v1000_v57, 8.507059e+37 }
 0x30a   :  { %v3650_v37 = vpop.eup %3649  ;;  %v947_v56 = vmul.f32 %v3648_v35, %v944_v9  ;;  %vm952_vm4 = vweird.f32 %v3648_v35 }
 0x30b   :  { %v3652_v10 = vpop.eup %3651  ;;  %v962_v14 = vmul.f32 %v3650_v37, %v945_v53  ;;  %vm967_vm5 = vweird.f32 %v3650_v37  ;;  %vm953_vm8 = vmor %vm951_vm6, %vm952_vm4  ;;  %v1017_v53 = vand.u32 2147483648, %v5102_v52  ;;  %vm1016_vm4 = vcmp.eq.f32.partialorder %v1015_v23, 8.507059e+37 }
 0x30c   :  { %v3654_v17 = vpop.eup %3653  ;;  %v992_v18 = vmul.f32 %v3652_v10, %v5100_v11  ;;  %v948_v21 = vsub.f32 1.0, %v947_v56  ;;  %v1002_v56 = vand.u32 2147483648, %v5100_v11  ;;  %vm968_vm10 = vmor %vm966_vm7, %vm967_vm5  ;;  %vm997_vm12 = vweird.f32 %v3652_v10 }
 0x30d   :  { %v1007_v51 = vmul.f32 %v3654_v17, %v5102_v52  ;;  %v963_v55 = vsub.f32 1.0, %v962_v14  ;;  %vm1012_vm13 = vweird.f32 %v3654_v17  ;;  %vm998_vm15 = vmor %vm996_vm14, %vm997_vm12 }
 0x30e   :  { %v993_v20 = vsub.f32 1.0, %v992_v18  ;;  %v949_v13 = vmul.f32 %v3648_v35, %v948_v21  ;;  %v973_v18 = vor.u32 1.1754944e-38, %v972_v6  ;;  %vm1013_vm2 = vmor %vm1011_vm0, %vm1012_vm13 }
 0x30f   :  { %v1008_v43 = vsub.f32 1.0, %v1007_v51  ;;  %v964_v34 = vmul.f32 %v3650_v37, %v963_v55 }
 0x310   :  { %v994_v25 = vmul.f32 %v3652_v10, %v993_v20  ;;  %v950_v46 = vadd.f32 %v3648_v35, %v949_v13 }
 0x311   :  { %v1009_v22 = vmul.f32 %v3654_v17, %v1008_v43  ;;  %v965_v42 = vadd.f32 %v3650_v37, %v964_v34  ;;  %v1018_v34 = vor.u32 1.1754944e-38, %v1017_v53  ;;  %v6565_v53 = vld [vmem:[#allocation46_spill] sm:$0xff] }
 0x312   :  { %v954_v14 = vsel %vm953_vm8, %v3648_v35, %v950_v46  ;;  %v995_v51 = vadd.f32 %v3652_v10, %v994_v25  ;;  %v1036_v35 = vrot.slane %v4977_v24, 7 }
 0x313   :  { %v959_v21 = vsel %vm956_vm9, %v958_v5, %v954_v14  ;;  %v969_v55 = vsel %vm968_vm10, %v3650_v37, %v965_v42  ;;  %v1010_v13 = vadd.f32 %v3654_v17, %v1009_v22  ;;  %v1003_v22 = vor.u32 1.1754944e-38, %v1002_v56 }
 0x314   :  { %v974_v20 = vsel %vm971_vm11, %v973_v18, %v969_v55  ;;  %v1026_v9 = vmul.f32 %v1022_v4, %v959_v21  ;;  %v999_v42 = vsel %vm998_vm15, %v3652_v10, %v995_v51 }
 0x315   :  { %v1027_v43 = vmul.f32 %v1023_v3, %v974_v20  ;;  %v1014_v25 = vsel %vm1013_vm2, %v3654_v17, %v1010_v13  ;;  %v1004_v45 = vsel %vm1001_vm3, %v1003_v22, %v999_v42  ;;  %v6564_v13 = vld [vmem:[#allocation45_spill] sm:$0xff]  ;;  %v6566_v42 = vld [vmem:[#allocation47_spill] sm:$0xff] }
 0x316   :  { %v1028_v5 = vadd.f32 %v1026_v9, %v4735_v61  ;;  %v1019_v3 = vsel %vm1016_vm4, %v1018_v34, %v1014_v25  ;;  %v1032_v11 = vsub.f32 1.0, %v1004_v45  ;;  %v1040_v6 = vmul.f32 %v1036_v35, %v1004_v45  ;;  %v6567_v34 = vld [vmem:[#allocation48_spill] sm:$0xff] }
 0x317   :  { %v1029_v46 = vadd.f32 %v1027_v43, %v4759_v39  ;;  %v1033_v52 = vsub.f32 1.0, %v1019_v3  ;;  %v1041_v56 = vmul.f32 %v1037_v54, %v1019_v3  ;;  %v6568_v3 = vld [vmem:[#allocation49_spill] sm:$0xff] }
 0x318   :  { %3655 = vtanh.f32 %v1028_v5 }
 0x319   :  { %3657 = vtanh.f32 %v1029_v46 }
 0x31e   :  { %v3656_v37 = vpop.eup %3655 }
 0x31f   :  { %v3658_v4 = vpop.eup %3657  ;;  %v1034_v10 = vmul.f32 %v3656_v37, %v1032_v11 }
 0x320   :  { %v1035_v14 = vmul.f32 %v3658_v4, %v1033_v52 }
 0x321   :  { %v5119_v17 = vadd.f32 %v1040_v6, %v1034_v10 }
 0x322   :  { %v5121_v18 = vadd.f32 %v1041_v56, %v1035_v14 }
 0x323   :  { %1044 = vst [vmem:[#allocation2] sm:$0x8] %v5119_v17  ;;  %v1048_v21 = vrot.slane %v5119_v17, 3 }
 0x324   :  { %1045 = vst [vmem:[#allocation2 + $0x8] sm:$0x8] %v5121_v18  ;;  %v1049_v24 = vrot.slane %v5121_v18, 2 }
 0x326   :  { %v1050_v55 = vsel %vm511_vm1, %v1049_v24, %v1048_v21 }
 0x327   :  { %1068 = vmatmul.f32.vlgmr.msra.gmra.mxu3 %v1050_v55  ;;  %1088 = vmatmul.f32.vlgmr.msra.gmra.mxu0 %v1050_v55 }
 0x328   :  { %1108 = vmatmul.f32.vlgmr.msra.gmra.mxu1 %v1050_v55  ;;  %1454 = vmatpush.msra.mxu3 %v4986_v27 }
 0x329   :  { %1595 = vmatpush.msra.mxu0 %v4868_v48  ;;  %1615 = vmatpush.msra.mxu1 %v4871_v38  ;;  %v6545_v48 = vld [vmem:[#allocation28_spill] sm:$0xff]  ;;  %v6546_v38 = vld [vmem:[#allocation39_spill] sm:$0xff] }
 0x32a   :  { %1455 = vmatpush.msra.mxu3 %v4991_v28 }
 0x32b   :  { %1596 = vmatpush.msra.mxu0 %v4875_v7  ;;  %1616 = vmatpush.msra.mxu1 %v4878_v15  ;;  %v6547_v7 = vld [vmem:[#allocation29_spill] sm:$0xff]  ;;  %v6548_v15 = vld [vmem:[#allocation30_spill] sm:$0xff] }
 0x32c   :  { %1456 = vmatpush.msra.mxu3 %v4996_v29 }
 0x32d   :  { %1597 = vmatpush.msra.mxu0 %v4882_v30  ;;  %1617 = vmatpush.msra.mxu1 %v4885_v2  ;;  %v6549_v30 = vld [vmem:[#allocation40_spill] sm:$0xff]  ;;  %v6550_v2 = vld [vmem:[#allocation31_spill] sm:$0xff] }
 0x32e   :  { %1457 = vmatpush.msra.mxu3 %v5001_v19 }
 0x32f   :  { %1598 = vmatpush.msra.mxu0 %v4889_v33  ;;  %1618 = vmatpush.msra.mxu1 %v4892_v63  ;;  %v6551_v33 = vld [vmem:[#allocation32_spill] sm:$0xff]  ;;  %v6552_v63 = vld [vmem:[#allocation41_spill] sm:$0xff] }
 0x330   :  { %1458 = vmatpush.msra.mxu3 %v5006_v60 }
 0x331   :  { %1599 = vmatpush.msra.mxu0 %v4896_v36  ;;  %1619 = vmatpush.msra.mxu1 %v4899_v16  ;;  %v6553_v36 = vld [vmem:[#allocation33_spill] sm:$0xff]  ;;  %v6554_v16 = vld [vmem:[#allocation34_spill] sm:$0xff] }
 0x332   :  { %1459 = vmatpush.msra.mxu3 %v5011_v40 }
 0x333   :  { %1600 = vmatpush.msra.mxu0 %v4903_v41  ;;  %1620 = vmatpush.msra.mxu1 %v4906_v62  ;;  %v6555_v41 = vld [vmem:[#allocation42_spill] sm:$0xff]  ;;  %v6556_v62 = vld [vmem:[#allocation35_spill] sm:$0xff] }
 0x334   :  { %1460 = vmatpush.msra.mxu3 %v5016_v49 }
 0x335   :  { %1601 = vmatpush.msra.mxu0 %v4910_v44  ;;  %1621 = vmatpush.msra.mxu1 %v4913_v59  ;;  %v6557_v44 = vld [vmem:[#allocation36_spill] sm:$0xff]  ;;  %v6558_v59 = vld [vmem:[#allocation43_spill] sm:$0xff] }
 0x336   :  { %1461 = vmatpush.msra.mxu3 %v5021_v58 }
 0x337   :  { %1602 = vmatpush.msra.mxu0 %v4917_v47  ;;  %1622 = vmatpush.msra.mxu1 %v4920_v8  ;;  %v6559_v47 = vld [vmem:[#allocation37_spill] sm:$0xff]  ;;  %v6560_v8 = vld [vmem:[#allocation38_spill] sm:$0xff] }
 0x338   :  { %1462 = vmatpush.msra.mxu3 %v5026_v32 }
 0x339   :  { %1603 = vmatpush.msra.mxu0 %v4924_v50  ;;  %1623 = vmatpush.msra.mxu1 %v4927_v0  ;;  %v6561_v50 = vld [vmem:[#allocation51_spill] sm:$0xff]  ;;  %v6562_v0 = vld [vmem:[#allocation52_spill] sm:$0xff] }
 0x33a   :  { %1463 = vmatpush.msra.mxu3 %v5031_v1 }
 0x33b   :  { %1604 = vmatpush.msra.mxu0 %v5034_v31  ;;  %1624 = vmatpush.msra.mxu1 %v5037_v12  ;;  %v6563_v31 = vld [vmem:[#allocation44_spill] sm:$0xff] }
 0x33c   :  { %1464 = vmatpush.msra.mxu3 %v6545_v48 }
 0x33d   :  { %1605 = vmatpush.msra.mxu0 %v6546_v38  ;;  %1625 = vmatpush.msra.mxu1 %v6547_v7 }
 0x33e   :  { %1465 = vmatpush.msra.mxu3 %v6548_v15 }
 0x33f   :  { %1606 = vmatpush.msra.mxu0 %v6549_v30  ;;  %1626 = vmatpush.msra.mxu1 %v6550_v2 }
 0x340   :  { %1466 = vmatpush.msra.mxu3 %v6551_v33 }
 0x341   :  { %1607 = vmatpush.msra.mxu0 %v6552_v63  ;;  %1627 = vmatpush.msra.mxu1 %v6553_v36 }
 0x342   :  { %1467 = vmatpush.msra.mxu3 %v6554_v16 }
 0x343   :  { %1608 = vmatpush.msra.mxu0 %v6555_v41  ;;  %1628 = vmatpush.msra.mxu1 %v6556_v62  ;;  %v6569_v62 = vld [vmem:[#allocation50_spill] sm:$0xff] }
 0x344   :  { %1468 = vmatpush.msra.mxu3 %v6557_v44 }
 0x345   :  { %1609 = vmatpush.msra.mxu0 %v6558_v59  ;;  %1629 = vmatpush.msra.mxu1 %v6559_v47 }
 0x346   :  { %1469 = vmatpush.msra.mxu3 %v6560_v8 }
 0x347   :  { %1610 = vmatpush.msra.mxu0 %v6561_v50  ;;  %1630 = vmatpush.msra.mxu1 %v6562_v0 }
 0x3a4   :  { %v1089_v26 = vpop.f32.mrf.mxu0 }
 0x3a5   :  { %v1090_v12 = vadd.f32 %v1089_v26, %v6563_v31  ;;  %v1109_v30 = vpop.f32.mrf.mxu1 }
 0x3a6   :  { %v1110_v59 = vadd.f32 %v1109_v30, %v6569_v62 }
 0x3a7   :  { %v1158_v51 = vrot.slane %v1090_v12, 4  ;;  %v1159_v20 = vrot.slane %v1090_v12, 5 }
 0x3a9   :  { %v1162_v9 = vadd.f32 %v1158_v51, %v6564_v13  ;;  %v1163_v57 = vadd.f32 %v1159_v20, %v6565_v53 }
 0x3aa   :  { %v1069_v43 = vpop.f32.mrf.mxu3 }
 0x3ab   :  { %v3515_v23 = vmul.f32 -1.442695, %v1162_v9  ;;  %v3516_v5 = vmul.f32 -1.442695, %v1163_v57  ;;  %v1070_v46 = vadd.f32 %v1069_v43, %v6566_v42 }
 0x3ad   :  { %3659 = vpow2.f32 %v3515_v23  ;;  %v1113_v22 = vrot.slane %v1070_v46, 4  ;;  %v1114_v25 = vrot.slane %v1070_v46, 5  ;;  %v1203_v23 = vrot.slane %v1110_v59, 4 }
 0x3ae   :  { %3661 = vpow2.f32 %v3516_v5 }
 0x3af   :  { %v1117_v45 = vadd.f32 %v1113_v22, %v6567_v34  ;;  %v1118_v11 = vadd.f32 %v1114_v25, %v6568_v3  ;;  %v1204_v22 = vrot.slane %v1110_v59, 5 }
 0x3b1   :  { %v3513_v35 = vmul.f32 -1.442695, %v1117_v45  ;;  %v3514_v37 = vmul.f32 -1.442695, %v1118_v11 }
 0x3b3   :  { %v3660_v52 = vpop.eup %3659  ;;  %3663 = vpow2.f32 %v3513_v35 }
 0x3b4   :  { %v3662_v54 = vpop.eup %3661  ;;  %v5182_v4 = vadd.f32 1.0, %v3660_v52  ;;  %3665 = vpow2.f32 %v3514_v37 }
 0x3b5   :  { %v5184_v10 = vadd.f32 1.0, %v3662_v54 }
 0x3b6   :  { %3667 = vrcp.f32 %v5182_v4  ;;  %v1183_v45 = vand.u32 2147483648, %v5182_v4  ;;  %vm1177_vm15 = vweird.f32 %v5182_v4 }
 0x3b7   :  { %3669 = vrcp.f32 %v5184_v10  ;;  %vm1192_vm0 = vweird.f32 %v5184_v10 }
 0x3b9   :  { %v3664_v6 = vpop.eup %3663 }
 0x3ba   :  { %v3666_v14 = vpop.eup %3665  ;;  %v1125_v56 = vadd.f32 1.0, %v3664_v6 }
 0x3bb   :  { %v1126_v21 = vadd.f32 1.0, %v3666_v14 }
 0x3bc   :  { %3671 = vrcp.f32 %v1125_v56  ;;  %v5188_v24 = vpop.eup %3667  ;;  %v1136_v26 = vand.u32 2147483647, %v1125_v56  ;;  %v1138_v12 = vand.u32 2147483648, %v1125_v56  ;;  %vm1132_vm7 = vweird.f32 %v1125_v56 }
 0x3bd   :  { %3673 = vrcp.f32 %v1126_v21  ;;  %v5190_v55 = vpop.eup %3669  ;;  %v1173_v38 = vmul.f32 %v5188_v24, %v5182_v4  ;;  %v1151_v9 = vand.u32 2147483647, %v1126_v21  ;;  %v1153_v57 = vand.u32 2147483648, %v1126_v21 }
 0x3be   :  { %v1188_v7 = vmul.f32 %v5190_v55, %v5184_v10  ;;  %v1139_v11 = vor.u32 1.1754944e-38, %v1138_v12  ;;  %vm1147_vm9 = vweird.f32 %v1126_v21  ;;  %vm1137_vm10 = vcmp.eq.f32.partialorder %v1136_v26, 8.507059e+37 }
 0x3bf   :  { %v1174_v41 = vsub.f32 1.0, %v1173_v38  ;;  %vm1152_vm12 = vcmp.eq.f32.partialorder %v1151_v9, 8.507059e+37  ;;  %v1154_v52 = vor.u32 1.1754944e-38, %v1153_v57  ;;  %vm1178_vm13 = vweird.f32 %v5188_v24 }
 0x3c0   :  { %v1189_v50 = vsub.f32 1.0, %v1188_v7  ;;  %vm1193_vm14 = vweird.f32 %v5190_v55  ;;  %vm1179_vm2 = vmor %vm1177_vm15, %vm1178_vm13 }
 0x3c1   :  { %v1175_v43 = vmul.f32 %v5188_v24, %v1174_v41  ;;  %vm1194_vm3 = vmor %vm1192_vm0, %vm1193_vm14 }
 0x3c2   :  { %v3672_v2 = vpop.eup %3671  ;;  %v1190_v46 = vmul.f32 %v5190_v55, %v1189_v50 }
 0x3c3   :  { %v3674_v63 = vpop.eup %3673  ;;  %v1128_v36 = vmul.f32 %v3672_v2, %v1125_v56  ;;  %vm1133_vm5 = vweird.f32 %v3672_v2  ;;  %v1176_v14 = vadd.f32 %v5188_v24, %v1175_v43 }
 0x3c4   :  { %v1143_v47 = vmul.f32 %v3674_v63, %v1126_v21  ;;  %vm1148_vm6 = vweird.f32 %v3674_v63  ;;  %vm1134_vm8 = vmor %vm1132_vm7, %vm1133_vm5  ;;  %v1191_v56 = vadd.f32 %v5190_v55, %v1190_v46  ;;  %v1198_v21 = vand.u32 2147483648, %v5184_v10 }
 0x3c5   :  { %v1129_v0 = vsub.f32 1.0, %v1128_v36  ;;  %vm1149_vm11 = vmor %vm1147_vm9, %vm1148_vm6  ;;  %v1180_v41 = vsel %vm1179_vm2, %v5188_v24, %v1176_v14  ;;  %v1218_v24 = vrot.slane %v5121_v18, 7 }
 0x3c6   :  { %v1144_v51 = vsub.f32 1.0, %v1143_v47  ;;  %v1184_v47 = vor.u32 1.1754944e-38, %v1183_v45  ;;  %v1195_v50 = vsel %vm1194_vm3, %v5190_v55, %v1191_v56 }
 0x3c7   :  { %v1130_v20 = vmul.f32 %v3672_v2, %v1129_v0  ;;  %v1199_v0 = vor.u32 1.1754944e-38, %v1198_v21 }
 0x3c8   :  { %v1145_v5 = vmul.f32 %v3674_v63, %v1144_v51 }
 0x3c9   :  { %v1131_v25 = vadd.f32 %v3672_v2, %v1130_v20 }
 0x3ca   :  { %v1146_v35 = vadd.f32 %v3674_v63, %v1145_v5 }
 0x3cb   :  { %v1135_v37 = vsel %vm1134_vm8, %v3672_v2, %v1131_v25  ;;  %v1181_v2 = vand.u32 2147483647, %v5182_v4 }
 0x3cc   :  { %v1140_v54 = vsel %vm1137_vm10, %v1139_v11, %v1135_v37  ;;  %v1150_v6 = vsel %vm1149_vm11, %v3674_v63, %v1146_v35  ;;  %v1196_v63 = vand.u32 2147483647, %v5184_v10  ;;  %v1217_v10 = vrot.slane %v5119_v17, 7 }
 0x3cd   :  { %v1155_v38 = vsel %vm1152_vm12, %v1154_v52, %v1150_v6  ;;  %v1207_v7 = vmul.f32 %v1203_v23, %v1140_v54  ;;  %vm1182_vm4 = vcmp.eq.f32.partialorder %v1181_v2, 8.507059e+37 }
 0x3ce   :  { %v1208_v30 = vmul.f32 %v1204_v22, %v1155_v38  ;;  %v1185_v4 = vsel %vm1182_vm4, %v1184_v47, %v1180_v41  ;;  %vm1197_vm5 = vcmp.eq.f32.partialorder %v1196_v63, 8.507059e+37 }
 0x3cf   :  { %v1209_v36 = vadd.f32 %v1207_v7, %v4735_v61  ;;  %v1200_v26 = vsel %vm1197_vm5, %v1199_v0, %v1195_v50  ;;  %v1213_v12 = vsub.f32 1.0, %v1185_v4  ;;  %v1221_v43 = vmul.f32 %v1217_v10, %v1185_v4 }
 0x3d0   :  { %v1210_v59 = vadd.f32 %v1208_v30, %v4759_v39  ;;  %v1214_v20 = vsub.f32 1.0, %v1200_v26  ;;  %v1222_v5 = vmul.f32 %v1218_v24, %v1200_v26 }
 0x3d1   :  { %3675 = vtanh.f32 %v1209_v36 }
 0x3d2   :  { %3677 = vtanh.f32 %v1210_v59 }
 0x3d7   :  { %v3676_v51 = vpop.eup %3675 }
 0x3d8   :  { %v3678_v9 = vpop.eup %3677  ;;  %v1215_v57 = vmul.f32 %v3676_v51, %v1213_v12 }
 0x3d9   :  { %v1216_v23 = vmul.f32 %v3678_v9, %v1214_v20 }
 0x3da   :  { %v5215_v55 = vadd.f32 %v1221_v43, %v1215_v57 }
 0x3db   :  { %v5217_v46 = vadd.f32 %v1222_v5, %v1216_v23 }
 0x3dc   :  { %1225 = vst [vmem:[#allocation2] sm:$0x10] %v5215_v55  ;;  %v1229_v22 = vrot.slane %v5215_v55, 4 }
 0x3dd   :  { %1226 = vst [vmem:[#allocation2 + $0x8] sm:$0x10] %v5217_v46  ;;  %v1230_v17 = vrot.slane %v5217_v46, 3 }
 0x3df   :  { %v1231_v25 = vsel %vm511_vm1, %v1230_v17, %v1229_v22 }
 0x3e0   :  { %1249 = vmatmul.f32.vlgmr.msrb.gmra.mxu2 %v1231_v25  ;;  %1269 = vmatmul.f32.vlgmr.msrb.gmra.mxu3 %v1231_v25 }
 0x3e1   :  { %1289 = vmatmul.f32.vlgmr.msrb.gmra.mxu0 %v1231_v25  ;;  %1635 = vmatpush.msrb.mxu2 %v4986_v27 }
 0x3e3   :  { %1636 = vmatpush.msrb.mxu2 %v4991_v28 }
 0x3e5   :  { %1637 = vmatpush.msrb.mxu2 %v4996_v29 }
 0x3e7   :  { %1638 = vmatpush.msrb.mxu2 %v5001_v19 }
 0x3e9   :  { %1639 = vmatpush.msrb.mxu2 %v5006_v60 }
 0x3eb   :  { %1640 = vmatpush.msrb.mxu2 %v5011_v40 }
 0x3ed   :  { %1641 = vmatpush.msrb.mxu2 %v5016_v49 }
 0x3ef   :  { %1642 = vmatpush.msrb.mxu2 %v5021_v58 }
 0x3f1   :  { %1643 = vmatpush.msrb.mxu2 %v5026_v32 }
 0x3f3   :  { %1644 = vmatpush.msrb.mxu2 %v5031_v1 }
 0x3f5   :  { %1645 = vmatpush.msrb.mxu2 %v6545_v48 }
 0x3f7   :  { %1646 = vmatpush.msrb.mxu2 %v6548_v15 }
 0x3f9   :  { %1647 = vmatpush.msrb.mxu2 %v6551_v33 }
 0x3fb   :  { %1648 = vmatpush.msrb.mxu2 %v6554_v16 }
 0x3fd   :  { %1649 = vmatpush.msrb.mxu2 %v6557_v44 }
 0x3ff   :  { %1650 = vmatpush.msrb.mxu2 %v6560_v8 }
 0x45e   :  { %v1290_v54 = vpop.f32.mrf.mxu0 }
 0x45f   :  { %v1291_v38 = vadd.f32 %v1290_v54, %v6569_v62 }
 0x461   :  { %v1384_v2 = vrot.slane %v1291_v38, 3  ;;  %v1385_v47 = vrot.slane %v1291_v38, 4 }
 0x463   :  { %v1250_v27 = vpop.f32.mrf.mxu2  ;;  %v1270_v28 = vpop.f32.mrf.mxu3 }
 0x464   :  { %v1251_v29 = vadd.f32 %v1250_v27, %v6566_v42  ;;  %v1271_v19 = vadd.f32 %v1270_v28, %v6563_v31 }
 0x466   :  { %v1294_v60 = vrot.slane %v1251_v29, 3  ;;  %v1295_v40 = vrot.slane %v1251_v29, 4  ;;  %v1339_v49 = vrot.slane %v1271_v19, 3  ;;  %v1340_v58 = vrot.slane %v1271_v19, 4 }
 0x468   :  { %v1298_v32 = vadd.f32 %v1294_v60, %v6567_v34  ;;  %v1299_v1 = vadd.f32 %v1295_v40, %v6568_v3  ;;  %v1343_v18 = vadd.f32 %v1339_v49, %v6564_v13  ;;  %v1344_v48 = vadd.f32 %v1340_v58, %v6565_v53 }
 0x46a   :  { %v3517_v15 = vmul.f32 -1.442695, %v1298_v32  ;;  %v3518_v33 = vmul.f32 -1.442695, %v1299_v1  ;;  %v3519_v16 = vmul.f32 -1.442695, %v1343_v18 }
 0x46b   :  { %v3520_v44 = vmul.f32 -1.442695, %v1344_v48 }
 0x46c   :  { %3679 = vpow2.f32 %v3517_v15 }
 0x46d   :  { %3681 = vpow2.f32 %v3518_v33 }
 0x46e   :  { %3683 = vpow2.f32 %v3519_v16 }
 0x46f   :  { %3685 = vpow2.f32 %v3520_v44 }
 0x472   :  { %v3680_v8 = vpop.eup %3679 }
 0x473   :  { %v3682_v45 = vpop.eup %3681  ;;  %v1306_v11 = vadd.f32 1.0, %v3680_v8 }
 0x474   :  { %v3684_v35 = vpop.eup %3683  ;;  %v1307_v37 = vadd.f32 1.0, %v3682_v45 }
 0x475   :  { %v3686_v52 = vpop.eup %3685  ;;  %3687 = vrcp.f32 %v1306_v11  ;;  %v5246_v6 = vadd.f32 1.0, %v3684_v35  ;;  %v1317_v36 = vand.u32 2147483647, %v1306_v11  ;;  %v1319_v41 = vand.u32 2147483648, %v1306_v11 }
 0x476   :  { %3689 = vrcp.f32 %v1307_v37  ;;  %v5248_v14 = vadd.f32 1.0, %v3686_v52  ;;  %v1332_v0 = vand.u32 2147483647, %v1307_v37  ;;  %v1334_v4 = vand.u32 2147483648, %v1307_v37 }
 0x477   :  { %3691 = vrcp.f32 %v5246_v6  ;;  %vm1313_vm6 = vweird.f32 %v1306_v11  ;;  %vm1328_vm8 = vweird.f32 %v1307_v37  ;;  %vm1318_vm10 = vcmp.eq.f32.partialorder %v1317_v36, 8.507059e+37 }
 0x478   :  { %3693 = vrcp.f32 %v5248_v14  ;;  %v1320_v9 = vor.u32 1.1754944e-38, %v1319_v41  ;;  %vm1333_vm12 = vcmp.eq.f32.partialorder %v1332_v0, 8.507059e+37  ;;  %v1335_v23 = vor.u32 1.1754944e-38, %v1334_v4 }
 0x479   :  { %vm1358_vm14 = vweird.f32 %v5246_v6  ;;  %v1364_v25 = vand.u32 2147483648, %v5246_v6  ;;  %v1379_v58 = vand.u32 2147483648, %v5248_v14  ;;  %v1362_v32 = vand.u32 2147483647, %v5246_v6 }
 0x47a   :  { %vm1373_vm2 = vweird.f32 %v5248_v14  ;;  %v1377_v18 = vand.u32 2147483647, %v5248_v14 }
 0x47b   :  { %v3688_v7 = vpop.eup %3687  ;;  %v1365_v16 = vor.u32 1.1754944e-38, %v1364_v25  ;;  %vm1363_vm5 = vcmp.eq.f32.partialorder %v1362_v32, 8.507059e+37  ;;  %v1380_v8 = vor.u32 1.1754944e-38, %v1379_v58 }
 0x47c   :  { %v3690_v56 = vpop.eup %3689  ;;  %v1309_v21 = vmul.f32 %v3688_v7, %v1306_v11  ;;  %vm1314_vm7 = vweird.f32 %v3688_v7 }
 0x47d   :  { %v1324_v30 = vmul.f32 %v3690_v56, %v1307_v37  ;;  %v3692_v59 = vpop.eup %3691  ;;  %vm1329_vm9 = vweird.f32 %v3690_v56  ;;  %vm1315_vm11 = vmor %vm1313_vm6, %vm1314_vm7  ;;  %vm1378_vm6 = vcmp.eq.f32.partialorder %v1377_v18, 8.507059e+37  ;;  %v1398_v37 = vrot.slane %v5215_v55, 7 }
 0x47e   :  { %v1310_v63 = vsub.f32 1.0, %v1309_v21  ;;  %v3694_v26 = vpop.eup %3693  ;;  %v1354_v10 = vmul.f32 %v3692_v59, %v5246_v6  ;;  %vm1330_vm13 = vmor %vm1328_vm8, %vm1329_vm9  ;;  %vm1359_vm15 = vweird.f32 %v3692_v59  ;;  %v1399_v6 = vrot.slane %v5217_v46, 7 }
 0x47f   :  { %v1325_v50 = vsub.f32 1.0, %v1324_v30  ;;  %v1369_v20 = vmul.f32 %v3694_v26, %v5248_v14  ;;  %vm1374_vm0 = vweird.f32 %v3694_v26  ;;  %vm1360_vm3 = vmor %vm1358_vm14, %vm1359_vm15 }
 0x480   :  { %v1311_v12 = vmul.f32 %v3688_v7, %v1310_v63  ;;  %v1355_v57 = vsub.f32 1.0, %v1354_v10  ;;  %vm1375_vm4 = vmor %vm1373_vm2, %vm1374_vm0 }
 0x481   :  { %v1326_v51 = vmul.f32 %v3690_v56, %v1325_v50  ;;  %v1370_v5 = vsub.f32 1.0, %v1369_v20 }
 0x482   :  { %v1312_v24 = vadd.f32 %v3688_v7, %v1311_v12  ;;  %v1356_v17 = vmul.f32 %v3692_v59, %v1355_v57 }
 0x483   :  { %v1327_v43 = vadd.f32 %v3690_v56, %v1326_v51  ;;  %v1371_v29 = vmul.f32 %v3694_v26, %v1370_v5 }
 0x484   :  { %v1316_v22 = vsel %vm1315_vm11, %v3688_v7, %v1312_v24  ;;  %v1357_v40 = vadd.f32 %v3692_v59, %v1356_v17 }
 0x485   :  { %v1321_v27 = vsel %vm1318_vm10, %v1320_v9, %v1316_v22  ;;  %v1331_v28 = vsel %vm1330_vm13, %v3690_v56, %v1327_v43  ;;  %v1372_v1 = vadd.f32 %v3694_v26, %v1371_v29 }
 0x486   :  { %v1336_v19 = vsel %vm1333_vm12, %v1335_v23, %v1331_v28  ;;  %v1388_v60 = vmul.f32 %v1384_v2, %v1321_v27  ;;  %v1361_v15 = vsel %vm1360_vm3, %v3692_v59, %v1357_v40 }
 0x487   :  { %v1389_v49 = vmul.f32 %v1385_v47, %v1336_v19  ;;  %v1376_v44 = vsel %vm1375_vm4, %v3694_v26, %v1372_v1  ;;  %v1366_v45 = vsel %vm1363_vm5, %v1365_v16, %v1361_v15 }
 0x488   :  { %v1390_v48 = vadd.f32 %v1388_v60, %v4735_v61  ;;  %v1381_v11 = vsel %vm1378_vm6, %v1380_v8, %v1376_v44  ;;  %v1394_v35 = vsub.f32 1.0, %v1366_v45  ;;  %v1402_v7 = vmul.f32 %v1398_v37, %v1366_v45 }
 0x489   :  { %v1391_v33 = vadd.f32 %v1389_v49, %v4759_v39  ;;  %v1395_v54 = vsub.f32 1.0, %v1381_v11  ;;  %v1403_v21 = vmul.f32 %v1399_v6, %v1381_v11 }
 0x48a   :  { %3695 = vtanh.f32 %v1390_v48 }
 0x48b   :  { %3697 = vtanh.f32 %v1391_v33 }
 0x490   :  { %v3696_v52 = vpop.eup %3695 }
 0x491   :  { %v3698_v14 = vpop.eup %3697  ;;  %v1396_v38 = vmul.f32 %v3696_v52, %v1394_v35 }
 0x492   :  { %v1397_v56 = vmul.f32 %v3698_v14, %v1395_v54 }
 0x493   :  { %v5267_v30 = vadd.f32 %v1402_v7, %v1396_v38 }
 0x494   :  { %v5269_v2 = vadd.f32 %v1403_v21, %v1397_v56 }
 0x495   :  { %1406 = vst [vmem:[#allocation2] sm:$0x20] %v5267_v30  ;;  %v1410_v63 = vrot.slane %v5267_v30, 5 }
 0x496   :  { %1407 = vst [vmem:[#allocation2 + $0x8] sm:$0x20] %v5269_v2  ;;  %v1411_v55 = vrot.slane %v5269_v2, 4 }
 0x498   :  { %v1412_v36 = vsel %vm511_vm1, %v1411_v55, %v1410_v63 }
 0x499   :  { %1430 = vmatmul.f32.vlgmr.msrb.gmra.mxu1 %v1412_v36  ;;  %1450 = vmatmul.f32.vlgmr.msra.gmra.mxu2 %v1412_v36 }
 0x49a   :  { %1470 = vmatmul.f32.vlgmr.msra.gmra.mxu3 %v1412_v36 }
 0x516   :  { %v1431_v46 = vpop.f32.mrf.mxu1 }
 0x517   :  { %v1432_v41 = vadd.f32 %v1431_v46, %v6566_v42 }
 0x519   :  { %v1475_v59 = vrot.slane %v1432_v41, 2  ;;  %v1476_v47 = vrot.slane %v1432_v41, 3 }
 0x51b   :  { %v1479_v50 = vadd.f32 %v1475_v59, %v6567_v34  ;;  %v1480_v0 = vadd.f32 %v1476_v47, %v6568_v3 }
 0x51c   :  { %v1451_v4 = vpop.f32.mrf.mxu2 }
 0x51d   :  { %v3521_v26 = vmul.f32 -1.442695, %v1479_v50  ;;  %v3522_v12 = vmul.f32 -1.442695, %v1480_v0  ;;  %v1452_v10 = vadd.f32 %v1451_v4, %v6563_v31  ;;  %v1471_v29 = vpop.f32.mrf.mxu3 }
 0x51e   :  { %v1472_v49 = vadd.f32 %v1471_v29, %v6569_v62  ;;  %v1580_v29 = vrot.slane %v5269_v2, 7  ;;  %v1824_v2 = vld [vmem:[#allocation12 + $0x168] sm:$0xff] }
 0x51f   :  { %3699 = vpow2.f32 %v3521_v26  ;;  %v1520_v51 = vrot.slane %v1452_v10, 2  ;;  %v1521_v20 = vrot.slane %v1452_v10, 3  ;;  %1835 = vmatpush.msrb.mxu3 %v1824_v2  ;;  %v5340_v2 = vld [vmem:[#allocation14 + $0xa8] sm:$0xff] }
 0x520   :  { %3701 = vpow2.f32 %v3522_v12  ;;  %v1565_v8 = vrot.slane %v1472_v49, 2  ;;  %v1566_v35 = vrot.slane %v1472_v49, 3 }
 0x521   :  { %v1524_v24 = vadd.f32 %v1520_v51, %v6564_v13  ;;  %v1525_v9 = vadd.f32 %v1521_v20, %v6565_v53 }
 0x523   :  { %v3523_v57 = vmul.f32 -1.442695, %v1524_v24  ;;  %v3524_v43 = vmul.f32 -1.442695, %v1525_v9 }
 0x525   :  { %v3700_v23 = vpop.eup %3699  ;;  %3703 = vpow2.f32 %v3523_v57 }
 0x526   :  { %v3702_v5 = vpop.eup %3701  ;;  %v1487_v22 = vadd.f32 1.0, %v3700_v23  ;;  %3705 = vpow2.f32 %v3524_v43 }
 0x527   :  { %v1488_v17 = vadd.f32 1.0, %v3702_v5 }
 0x528   :  { %3707 = vrcp.f32 %v1487_v22  ;;  %v1498_v18 = vand.u32 2147483647, %v1487_v22  ;;  %v1500_v48 = vand.u32 2147483648, %v1487_v22  ;;  %vm1494_vm8 = vweird.f32 %v1487_v22 }
 0x529   :  { %3709 = vrcp.f32 %v1488_v17  ;;  %v1513_v33 = vand.u32 2147483647, %v1488_v17  ;;  %v1515_v44 = vand.u32 2147483648, %v1488_v17  ;;  %vm1509_vm11 = vweird.f32 %v1488_v17 }
 0x52a   :  { %vm1499_vm10 = vcmp.eq.f32.partialorder %v1498_v18, 8.507059e+37  ;;  %v1501_v14 = vor.u32 1.1754944e-38, %v1500_v48 }
 0x52b   :  { %v3704_v25 = vpop.eup %3703  ;;  %vm1514_vm13 = vcmp.eq.f32.partialorder %v1513_v33, 8.507059e+37  ;;  %v1516_v63 = vor.u32 1.1754944e-38, %v1515_v44  ;;  %v1818_v33 = vld [vmem:[#allocation12 + $0x138] sm:$0xff]  ;;  %v1812_v44 = vld [vmem:[#allocation12 + $0x108] sm:$0xff] }
 0x52c   :  { %v3706_v27 = vpop.eup %3705  ;;  %v5282_v28 = vadd.f32 1.0, %v3704_v25  ;;  %v1579_v25 = vrot.slane %v5267_v30, 7 }
 0x52d   :  { %v5284_v19 = vadd.f32 1.0, %v3706_v27 }
 0x52e   :  { %v3708_v60 = vpop.eup %3707  ;;  %3711 = vrcp.f32 %v5282_v28  ;;  %v1545_v56 = vand.u32 2147483648, %v5282_v28  ;;  %v1543_v41 = vand.u32 2147483647, %v5282_v28  ;;  %vm1539_vm2 = vweird.f32 %v5282_v28 }
 0x52f   :  { %v3710_v40 = vpop.eup %3709  ;;  %3713 = vrcp.f32 %v5284_v19  ;;  %v1490_v58 = vmul.f32 %v3708_v60, %v1487_v22  ;;  %vm1495_vm7 = vweird.f32 %v3708_v60  ;;  %v1560_v4 = vand.u32 2147483648, %v5284_v19 }
 0x530   :  { %v1505_v32 = vmul.f32 %v3710_v40, %v1488_v17  ;;  %vm1510_vm9 = vweird.f32 %v3710_v40  ;;  %vm1496_vm12 = vmor %vm1494_vm8, %vm1495_vm7  ;;  %v1558_v10 = vand.u32 2147483647, %v5284_v19  ;;  %vm1554_vm4 = vweird.f32 %v5284_v19 }
 0x531   :  { %v1491_v1 = vsub.f32 1.0, %v1490_v58  ;;  %vm1511_vm14 = vmor %vm1509_vm11, %vm1510_vm9  ;;  %v1546_v9 = vor.u32 1.1754944e-38, %v1545_v56  ;;  %v1561_v43 = vor.u32 1.1754944e-38, %v1560_v4  ;;  %vm1544_vm6 = vcmp.eq.f32.partialorder %v1543_v41, 8.507059e+37  ;;  %v1822_v56 = vld [vmem:[#allocation12 + $0x158] sm:$0xff] }
 0x532   :  { %v1506_v15 = vsub.f32 1.0, %v1505_v32  ;;  %vm1559_vm7 = vcmp.eq.f32.partialorder %v1558_v10, 8.507059e+37  ;;  %v1816_v10 = vld [vmem:[#allocation12 + $0x128] sm:$0xff] }
 0x533   :  { %v1492_v16 = vmul.f32 %v3708_v60, %v1491_v1 }
 0x534   :  { %v3712_v45 = vpop.eup %3711  ;;  %v1507_v11 = vmul.f32 %v3710_v40, %v1506_v15  ;;  %v1821_v15 = vld [vmem:[#allocation12 + $0x150] sm:$0xff] }
 0x535   :  { %v3714_v37 = vpop.eup %3713  ;;  %v1535_v52 = vmul.f32 %v3712_v45, %v5282_v28  ;;  %v1493_v54 = vadd.f32 %v3708_v60, %v1492_v16  ;;  %vm1540_vm15 = vweird.f32 %v3712_v45  ;;  %1836 = vmatpush.msrb.mxu3 %v1821_v15  ;;  %v1815_v16 = vld [vmem:[#allocation12 + $0x120] sm:$0xff] }
 0x536   :  { %v1550_v6 = vmul.f32 %v3714_v37, %v5284_v19  ;;  %v1508_v38 = vadd.f32 %v3710_v40, %v1507_v11  ;;  %vm1555_vm0 = vweird.f32 %v3714_v37  ;;  %vm1541_vm3 = vmor %vm1539_vm2, %vm1540_vm15  ;;  %v1803_v11 = vld [vmem:[#allocation12 + $0xc0] sm:$0xff] }
 0x537   :  { %v1536_v7 = vsub.f32 1.0, %v1535_v52  ;;  %v1497_v21 = vsel %vm1496_vm12, %v3708_v60, %v1493_v54  ;;  %vm1556_vm5 = vmor %vm1554_vm4, %vm1555_vm0  ;;  %1837 = vmatpush.msrb.mxu3 %v1818_v33  ;;  %v5311_v52 = vld [vmem:[#allocation14 + $0x168] sm:$0xff] }
 0x538   :  { %v1551_v55 = vsub.f32 1.0, %v1550_v6  ;;  %v1502_v36 = vsel %vm1499_vm10, %v1501_v14, %v1497_v21  ;;  %v1512_v46 = vsel %vm1511_vm14, %v3710_v40, %v1508_v38  ;;  %v1800_v14 = vld [vmem:[#allocation12 + $0xa8] sm:$0xff]  ;;  %1962 = vmatpush.msra.mxu2 %v5311_v52  ;;  %v1823_v21 = vld [vmem:[#allocation12 + $0x160] sm:$0xff] }
 0x539   :  { %v1537_v59 = vmul.f32 %v3712_v45, %v1536_v7  ;;  %v1517_v47 = vsel %vm1514_vm13, %v1516_v63, %v1512_v46  ;;  %v1569_v50 = vmul.f32 %v1565_v8, %v1502_v36  ;;  %1838 = vmatpush.msrb.mxu3 %v1815_v16  ;;  %v1809_v8 = vld [vmem:[#allocation12 + $0xf0] sm:$0xff] }
 0x53a   :  { %v1552_v0 = vmul.f32 %v3714_v37, %v1551_v55  ;;  %v1570_v26 = vmul.f32 %v1566_v35, %v1517_v47  ;;  %v1825_v35 = vld [vmem:[#allocation12 + $0x170] sm:$0xff]  ;;  %v1820_v47 = vld [vmem:[#allocation12 + $0x148] sm:$0xff] }
 0x53b   :  { %v1538_v12 = vadd.f32 %v3712_v45, %v1537_v59  ;;  %v1571_v51 = vadd.f32 %v1569_v50, %v4735_v61  ;;  %1839 = vmatpush.msrb.mxu3 %v1812_v44  ;;  %1858 = vmatpush.msrb.mxu0 %v1825_v35  ;;  %v5316_v63 = vld [vmem:[#allocation14 + $0x150] sm:$0xff]  ;;  %v1794_v50 = vld [vmem:[#allocation12 + $0x78] sm:$0xff] }
 0x53c   :  { %v1553_v20 = vadd.f32 %v3714_v37, %v1552_v0  ;;  %v1572_v24 = vadd.f32 %v1570_v26, %v4759_v39  ;;  %v1797_v55 = vld [vmem:[#allocation12 + $0x90] sm:$0xff]  ;;  %1963 = vmatpush.msra.mxu2 %v5316_v63 }
 0x53d   :  { %v1542_v57 = vsel %vm1541_vm3, %v3712_v45, %v1538_v12  ;;  %3715 = vtanh.f32 %v1571_v51  ;;  %1840 = vmatpush.msrb.mxu3 %v1809_v8  ;;  %v1806_v45 = vld [vmem:[#allocation12 + $0xd8] sm:$0xff]  ;;  %1859 = vmatpush.msrb.mxu0 %v1822_v56  ;;  %v1817_v51 = vld [vmem:[#allocation12 + $0x130] sm:$0xff] }
 0x53e   :  { %v1557_v23 = vsel %vm1556_vm5, %v3714_v37, %v1553_v20  ;;  %3717 = vtanh.f32 %v1572_v24  ;;  %v1547_v5 = vsel %vm1544_vm6, %v1546_v9, %v1542_v57  ;;  %v1826_v37 = vld [vmem:[#allocation12 + $0x178] sm:$0xff]  ;;  %v5326_v20 = vld [vmem:[#allocation14 + $0x120] sm:$0xff]  ;;  %v5345_v16 = vld [vmem:[#allocation14 + $0x170] sm:$0xff] }
 0x53f   :  { %v1562_v22 = vsel %vm1559_vm7, %v1561_v43, %v1557_v23  ;;  %v1575_v17 = vsub.f32 1.0, %v1547_v5  ;;  %v1583_v40 = vmul.f32 %v1579_v25, %v1547_v5  ;;  %1841 = vmatpush.msrb.mxu3 %v1806_v45  ;;  %1881 = vmatpush.msrb.mxu1 %v1826_v37  ;;  %v1791_v24 = vld [vmem:[#allocation12 + $0x60] sm:$0xff]  ;;  %v1788_v23 = vld [vmem:[#allocation12 + $0x48] sm:$0xff]  ;;  %v1810_v5 = vld [vmem:[#allocation12 + $0xf8] sm:$0xff] }
 0x540   :  { %v1576_v28 = vsub.f32 1.0, %v1562_v22  ;;  %v1584_v58 = vmul.f32 %v1580_v29, %v1562_v22  ;;  %v1811_v22 = vld [vmem:[#allocation12 + $0x100] sm:$0xff]  ;;  %v1785_v25 = vld [vmem:[#allocation12 + $0x30] sm:$0xff]  ;;  %v5334_v29 = vld [vmem:[#allocation14 + $0xd8] sm:$0xff] }
 0x541   :  { %1842 = vmatpush.msrb.mxu3 %v1803_v11  ;;  %1882 = vmatpush.msrb.mxu1 %v1823_v21  ;;  %v1798_v45 = vld [vmem:[#allocation12 + $0x98] sm:$0xff]  ;;  %v1799_v11 = vld [vmem:[#allocation12 + $0xa0] sm:$0xff]  ;;  %v5349_v35 = vld [vmem:[#allocation14 + $0x90] sm:$0xff] }
 0x542   :  { %v5361_v56 = vld [vmem:[#allocation14 + $0x78] sm:$0xff] }
 0x543   :  { %v3716_v27 = vpop.eup %3715  ;;  %1843 = vmatpush.msrb.mxu3 %v1800_v14  ;;  %1883 = vmatpush.msrb.mxu1 %v1820_v47 }
 0x544   :  { %v3718_v19 = vpop.eup %3717  ;;  %v1577_v60 = vmul.f32 %v3716_v27, %v1575_v17  ;;  %v5332_v17 = vld [vmem:[#allocation14 + $0xf0] sm:$0xff]  ;;  %v1807_v27 = vld [vmem:[#allocation12 + $0xe0] sm:$0xff] }
 0x545   :  { %v1578_v49 = vmul.f32 %v3718_v19, %v1576_v28  ;;  %1844 = vmatpush.msrb.mxu3 %v1797_v55  ;;  %1884 = vmatpush.msrb.mxu1 %v1817_v51  ;;  %v1808_v28 = vld [vmem:[#allocation12 + $0xe8] sm:$0xff]  ;;  %v1782_v19 = vld [vmem:[#allocation12 + $0x18] sm:$0xff]  ;;  %v5366_v55 = vld [vmem:[#allocation14 + $0x140] sm:$0xff] }
 0x546   :  { %v5302_v32 = vadd.f32 %v1583_v40, %v1577_v60  ;;  %v1804_v60 = vld [vmem:[#allocation12 + $0xc8] sm:$0xff]  ;;  %v1805_v40 = vld [vmem:[#allocation12 + $0xd0] sm:$0xff] }
 0x547   :  { %v5304_v1 = vadd.f32 %v1584_v58, %v1578_v49  ;;  %1845 = vmatpush.msrb.mxu3 %v1794_v50  ;;  %v5337_v49 = vld [vmem:[#allocation14 + $0xc0] sm:$0xff]  ;;  %v1790_v50 = vld [vmem:[#allocation12 + $0x58] sm:$0xff] }
 0x548   :  { %1587 = vst [vmem:[#allocation2] sm:$0x40] %v5302_v32  ;;  %v1591_v18 = vrot.slane %v5302_v32, 6  ;;  %v1779_v58 = vld [vmem:[#allocation12] sm:$0xff] }
 0x549   :  { %1588 = vst [vmem:[#allocation2 + $0x8] sm:$0x40] %v5304_v1  ;;  %v1592_v30 = vrot.slane %v5304_v1, 5  ;;  %1846 = vmatpush.msrb.mxu3 %v1791_v24  ;;  %v5390_v24 = vld [vmem:[#allocation14 + $0x30] sm:$0xff] }
 0x54b   :  { %v1593_v48 = vsel %vm511_vm1, %v1592_v30, %v1591_v18  ;;  %1847 = vmatpush.msrb.mxu3 %v1788_v23  ;;  %v1801_v30 = vld [vmem:[#allocation12 + $0xb0] sm:$0xff] }
 0x54c   :  { %1611 = vmatmul.f32.vlgmr.msra.gmra.mxu0 %v1593_v48  ;;  %1631 = vmatmul.f32.vlgmr.msra.gmra.mxu1 %v1593_v48 }
 0x54d   :  { %1651 = vmatmul.f32.vlgmr.msrb.gmra.mxu2 %v1593_v48  ;;  %1848 = vmatpush.msrb.mxu3 %v1785_v25  ;;  %v1802_v48 = vld [vmem:[#allocation12 + $0xb8] sm:$0xff] }
 0x54f   :  { %1849 = vmatpush.msrb.mxu3 %v1782_v19 }
 0x551   :  { %1850 = vmatpush.msrb.mxu3 %v1779_v58 }
 0x553   :  { %1982 = vmatpush.msra.mxu3 %v5345_v16 }
 0x5c9   :  { %v1612_v54 = vpop.f32.mrf.mxu0  ;;  %v1632_v6 = vpop.f32.mrf.mxu1 }
 0x5ca   :  { %v1613_v38 = vadd.f32 %v1612_v54, %v6566_v42  ;;  %v1633_v7 = vadd.f32 %v1632_v6, %v6563_v31  ;;  %v1819_v42 = vld [vmem:[#allocation12 + $0x140] sm:$0xff]  ;;  %v5319_v31 = vld [vmem:[#allocation14 + $0x138] sm:$0xff] }
 0x5cb   :  { %1860 = vmatpush.msrb.mxu0 %v1819_v42  ;;  %1964 = vmatpush.msra.mxu2 %v5319_v31  ;;  %v5356_v6 = vld [vmem:[#allocation14 + $0x158] sm:$0xff]  ;;  %v1789_v42 = vld [vmem:[#allocation12 + $0x50] sm:$0xff] }
 0x5cc   :  { %v1656_v36 = vrot.slane %v1613_v38, 1  ;;  %v1657_v46 = vrot.slane %v1613_v38, 2  ;;  %v1701_v41 = vrot.slane %v1633_v7, 1  ;;  %v1702_v59 = vrot.slane %v1633_v7, 2  ;;  %v1795_v38 = vld [vmem:[#allocation12 + $0x80] sm:$0xff]  ;;  %v1796_v7 = vld [vmem:[#allocation12 + $0x88] sm:$0xff]  ;;  %1983 = vmatpush.msra.mxu3 %v5356_v6 }
 0x5cd   :  { %1861 = vmatpush.msrb.mxu0 %v1816_v10  ;;  %1965 = vmatpush.msra.mxu2 %v5326_v20  ;;  %v1787_v10 = vld [vmem:[#allocation12 + $0x40] sm:$0xff] }
 0x5ce   :  { %v1660_v0 = vadd.f32 %v1656_v36, %v6567_v34  ;;  %v1661_v4 = vadd.f32 %v1657_v46, %v6568_v3  ;;  %v1705_v26 = vadd.f32 %v1701_v41, %v6564_v13  ;;  %v1706_v12 = vadd.f32 %v1702_v59, %v6565_v53  ;;  %v1813_v13 = vld [vmem:[#allocation12 + $0x110] sm:$0xff]  ;;  %v1814_v3 = vld [vmem:[#allocation12 + $0x118] sm:$0xff]  ;;  %v5329_v53 = vld [vmem:[#allocation14 + $0x108] sm:$0xff]  ;;  %1984 = vmatpush.msra.mxu3 %v5366_v55 }
 0x5cf   :  { %1862 = vmatpush.msrb.mxu0 %v1813_v13  ;;  %1885 = vmatpush.msrb.mxu1 %v1814_v3  ;;  %v1792_v36 = vld [vmem:[#allocation12 + $0x68] sm:$0xff]  ;;  %v1793_v46 = vld [vmem:[#allocation12 + $0x70] sm:$0xff]  ;;  %v5369_v41 = vld [vmem:[#allocation14 + $0x60] sm:$0xff] }
 0x5d0   :  { %v3525_v9 = vmul.f32 -1.442695, %v1660_v0  ;;  %v3526_v57 = vmul.f32 -1.442695, %v1661_v4  ;;  %v3527_v43 = vmul.f32 -1.442695, %v1705_v26  ;;  %1966 = vmatpush.msra.mxu2 %v5329_v53  ;;  %v1652_v21 = vpop.f32.mrf.mxu2 }
 0x5d1   :  { %v3528_v34 = vmul.f32 -1.442695, %v1706_v12  ;;  %1863 = vmatpush.msrb.mxu0 %v1810_v5  ;;  %1886 = vmatpush.msrb.mxu1 %v1811_v22  ;;  %v5371_v59 = vld [vmem:[#allocation14 + $0x128] sm:$0xff]  ;;  %v5376_v47 = vadd.f32 %v1652_v21, %v6569_v62  ;;  %v5380_v4 = vld [vmem:[#allocation14 + $0x110] sm:$0xff]  ;;  %v1786_v12 = vld [vmem:[#allocation12 + $0x38] sm:$0xff] }
 0x5d2   :  { %3719 = vpow2.f32 %v3525_v9  ;;  %1967 = vmatpush.msra.mxu2 %v5332_v17  ;;  %v5378_v0 = vld [vmem:[#allocation14 + $0x48] sm:$0xff]  ;;  %1985 = vmatpush.msra.mxu3 %v5371_v59  ;;  %v5392_v9 = vld [vmem:[#allocation14 + $0xf8] sm:$0xff] }
 0x5d3   :  { %3721 = vpow2.f32 %v3526_v57  ;;  %1864 = vmatpush.msrb.mxu0 %v1807_v27  ;;  %1887 = vmatpush.msrb.mxu1 %v1808_v28  ;;  %v1784_v13 = vld [vmem:[#allocation12 + $0x28] sm:$0xff]  ;;  %v1746_v25 = vrot.slane %v5376_v47, 1  ;;  %v5406_v27 = vld [vmem:[#allocation14 + $0x18] sm:$0xff]  ;;  %v5408_v28 = vld [vmem:[#allocation14 + $0xe0] sm:$0xff] }
 0x5d4   :  { %3723 = vpow2.f32 %v3527_v43  ;;  %1968 = vmatpush.msra.mxu2 %v5334_v29  ;;  %1986 = vmatpush.msra.mxu3 %v5380_v4  ;;  %6570 = vst [vmem:[#allocation28_spill] sm:$0xff] %v5406_v27  ;;  %v5428_v21 = vld [vmem:[#allocation6 + $0x2] sm:$0x3] }
 0x5d5   :  { %3725 = vpow2.f32 %v3528_v34  ;;  %1865 = vmatpush.msrb.mxu0 %v1804_v60  ;;  %1888 = vmatpush.msrb.mxu1 %v1805_v40  ;;  %v1783_v34 = vld [vmem:[#allocation12 + $0x20] sm:$0xff] }
 0x5d6   :  { %1969 = vmatpush.msra.mxu2 %v5337_v49  ;;  %1987 = vmatpush.msra.mxu3 %v5392_v9 }
 0x5d7   :  { %1866 = vmatpush.msrb.mxu0 %v1801_v30  ;;  %1889 = vmatpush.msrb.mxu1 %v1802_v48  ;;  %v1781_v30 = vld [vmem:[#allocation12 + $0x10] sm:$0xff] }
 0x5d8   :  { %v3720_v18 = vpop.eup %3719  ;;  %1970 = vmatpush.msra.mxu2 %v5340_v2  ;;  %1988 = vmatpush.msra.mxu3 %v5408_v28 }
 0x5d9   :  { %v3722_v15 = vpop.eup %3721  ;;  %v5342_v33 = vadd.f32 1.0, %v3720_v18  ;;  %1867 = vmatpush.msrb.mxu0 %v1798_v45  ;;  %1890 = vmatpush.msrb.mxu1 %v1799_v11  ;;  %v1780_v18 = vld [vmem:[#allocation12 + $0x8] sm:$0xff]  ;;  %v5419_v45 = vld [vmem:[#allocation14] sm:$0xff] }
 0x5da   :  { %v3724_v44 = vpop.eup %3723  ;;  %v5347_v8 = vadd.f32 1.0, %v3722_v15  ;;  %1971 = vmatpush.msra.mxu2 %v5349_v35  ;;  %6571 = vst [vmem:[#allocation39_spill] sm:$0xff] %v5419_v45  ;;  %v5421_v11 = vld [vmem:[#allocation14 + $0xc8] sm:$0xff] }
 0x5db   :  { %v3726_v37 = vpop.eup %3725  ;;  %3727 = vrcp.f32 %v5342_v33  ;;  %v5352_v54 = vadd.f32 1.0, %v3724_v44  ;;  %1868 = vmatpush.msrb.mxu0 %v1795_v38  ;;  %1891 = vmatpush.msrb.mxu1 %v1796_v7  ;;  %v1679_v22 = vand.u32 2147483647, %v5342_v33  ;;  %v1681_v60 = vand.u32 2147483648, %v5342_v33 }
 0x5dc   :  { %3729 = vrcp.f32 %v5347_v8  ;;  %v5359_v14 = vadd.f32 1.0, %v3726_v37  ;;  %1972 = vmatpush.msra.mxu2 %v5361_v56  ;;  %v1694_v58 = vand.u32 2147483647, %v5347_v8  ;;  %v1696_v44 = vand.u32 2147483648, %v5347_v8  ;;  %1989 = vmatpush.msra.mxu3 %v5421_v11 }
 0x5dd   :  { %3731 = vrcp.f32 %v5352_v54  ;;  %1869 = vmatpush.msrb.mxu0 %v1792_v36  ;;  %1892 = vmatpush.msrb.mxu1 %v1793_v46  ;;  %v1747_v7 = vrot.slane %v5376_v47, 2  ;;  %v5430_v36 = vld [vmem:[#allocation14 + $0x178] sm:$0xff]  ;;  %vm1675_vm10 = vweird.f32 %v5342_v33  ;;  %vm1690_vm11 = vweird.f32 %v5347_v8 }
 0x5de   :  { %3733 = vrcp.f32 %v5359_v14  ;;  %1973 = vmatpush.msra.mxu2 %v5369_v41  ;;  %v1726_v47 = vand.u32 2147483648, %v5352_v54  ;;  %vm1680_vm13 = vcmp.eq.f32.partialorder %v1679_v22, 8.507059e+37  ;;  %vm1695_vm15 = vcmp.eq.f32.partialorder %v1694_v58, 8.507059e+37  ;;  %v5470_v58 = vld [vmem:[#allocation14 + $0x148] sm:$0xff] }
 0x5df   :  { %1870 = vmatpush.msrb.mxu0 %v1789_v42  ;;  %1893 = vmatpush.msrb.mxu1 %v1790_v50  ;;  %v5436_v50 = vld [vmem:[#allocation14 + $0xb0] sm:$0xff]  ;;  %vm1720_vm3 = vweird.f32 %v5352_v54  ;;  %vm1735_vm5 = vweird.f32 %v5359_v14 }
 0x5e0   :  { %1974 = vmatpush.msra.mxu2 %v5378_v0  ;;  %1990 = vmatpush.msra.mxu3 %v5436_v50 }
 0x5e1   :  { %v5382_v26 = vpop.eup %3727  ;;  %1871 = vmatpush.msrb.mxu0 %v1786_v12  ;;  %1894 = vmatpush.msrb.mxu1 %v1787_v10  ;;  %v5523_v10 = vld [vmem:[#allocation14 + $0xe8] sm:$0xff] }
 0x5e2   :  { %v5386_v51 = vpop.eup %3729  ;;  %v1671_v62 = vmul.f32 %v5382_v26, %v5342_v33  ;;  %1975 = vmatpush.msra.mxu2 %v5390_v24  ;;  %vm1676_vm8 = vweird.f32 %v5382_v26  ;;  %v5449_v33 = vld [vmem:[#allocation14 + $0x160] sm:$0xff] }
 0x5e3   :  { %v5394_v57 = vpop.eup %3731  ;;  %v1686_v43 = vmul.f32 %v5386_v51, %v5347_v8  ;;  %1872 = vmatpush.msrb.mxu0 %v1783_v34  ;;  %1895 = vmatpush.msrb.mxu1 %v1784_v13  ;;  %vm1691_vm9 = vweird.f32 %v5386_v51  ;;  %vm5442_vm12 = vmor %vm1675_vm10, %vm1676_vm8  ;;  %v1697_v34 = vor.u32 1.1754944e-38, %v1696_v44  ;;  %v5457_v13 = vld [vmem:[#allocation14 + $0x98] sm:$0xff] }
 0x5e4   :  { %v5400_v3 = vpop.eup %3733  ;;  %v1716_v23 = vmul.f32 %v5394_v57, %v5352_v54  ;;  %v1672_v5 = vsub.f32 1.0, %v1671_v62  ;;  %1976 = vmatpush.msra.mxu2 %v5406_v27  ;;  %v1682_v62 = vor.u32 1.1754944e-38, %v1681_v60  ;;  %vm1692_vm14 = vmor %vm1690_vm11, %vm1691_vm9  ;;  %vm1721_vm0 = vweird.f32 %v5394_v57  ;;  %1991 = vmatpush.msra.mxu3 %v5457_v13 }
 0x5e5   :  { %v1731_v19 = vmul.f32 %v5400_v3, %v5359_v14  ;;  %v1687_v40 = vsub.f32 1.0, %v1686_v43  ;;  %1873 = vmatpush.msrb.mxu0 %v1780_v18  ;;  %1896 = vmatpush.msrb.mxu1 %v1781_v30  ;;  %vm1736_vm2 = vweird.f32 %v5400_v3  ;;  %v1724_v18 = vand.u32 2147483647, %v5352_v54  ;;  %vm5482_vm4 = vmor %vm1720_vm3, %vm1721_vm0  ;;  %v5489_v54 = vld [vmem:[#allocation14 + $0x68] sm:$0xff] }
 0x5e6   :  { %v1717_v48 = vsub.f32 1.0, %v1716_v23  ;;  %v1673_v15 = vmul.f32 %v5382_v26, %v1672_v5  ;;  %1977 = vmatpush.msra.mxu2 %v5419_v45  ;;  %vm5495_vm6 = vmor %vm1735_vm5, %vm1736_vm2 }
 0x5e7   :  { %v1732_v37 = vsub.f32 1.0, %v1731_v19  ;;  %v1688_v38 = vmul.f32 %v5386_v51, %v1687_v40  ;;  %1978 = vmatmul.f32.vlgmr.msra.gmra.mxu2 %v5428_v21  ;;  %2002 = vmatpush.msra.mxu0 %v5430_v36  ;;  %v5467_v40 = vld [vmem:[#allocation14 + $0x80] sm:$0xff]  ;;  %vm1725_vm7 = vcmp.eq.f32.partialorder %v1724_v18, 8.507059e+37 }
 0x5e8   :  { %v1718_v46 = vmul.f32 %v5394_v57, %v1717_v48  ;;  %v1674_v42 = vadd.f32 %v5382_v26, %v1673_v15  ;;  %2139 = vmatpush.msra.mxu1 %v5311_v52  ;;  %2159 = vmatpush.msrb.mxu2 %v5345_v16  ;;  %v5477_v48 = vld [vmem:[#allocation14 + $0x130] sm:$0xff]  ;;  %v1739_v15 = vand.u32 2147483647, %v5359_v14 }
 0x5e9   :  { %v1733_v12 = vmul.f32 %v5400_v3, %v1732_v37  ;;  %v1689_v43 = vadd.f32 %v5386_v51, %v1688_v38  ;;  %2003 = vmatpush.msra.mxu0 %v5449_v33  ;;  %1992 = vmatpush.msra.mxu3 %v5467_v40 }
 0x5ea   :  { %v1678_v8 = vsel %vm5442_vm12, %v5382_v26, %v1674_v42  ;;  %v1719_v19 = vadd.f32 %v5394_v57, %v1718_v46  ;;  %2140 = vmatpush.msra.mxu1 %v5316_v63  ;;  %2160 = vmatpush.msrb.mxu2 %v5356_v6  ;;  %v5510_v42 = vld [vmem:[#allocation14 + $0x50] sm:$0xff]  ;;  %vm1740_vm8 = vcmp.eq.f32.partialorder %v1739_v15, 8.507059e+37 }
 0x5eb   :  { %v1683_v23 = vsel %vm1680_vm13, %v1682_v62, %v1678_v8  ;;  %v1693_v5 = vsel %vm1692_vm14, %v5386_v51, %v1689_v43  ;;  %v1734_v22 = vadd.f32 %v5400_v3, %v1733_v12  ;;  %v1741_v51 = vand.u32 2147483648, %v5359_v14  ;;  %2004 = vmatpush.msra.mxu0 %v5470_v58  ;;  %1993 = vmatpush.msra.mxu3 %v5489_v54  ;;  %v5518_v12 = vld [vmem:[#allocation14 + $0x38] sm:$0xff]  ;;  %v5526_v62 = vld [vmem:[#allocation14 + $0x20] sm:$0xff] }
 0x5ec   :  { %v1698_v26 = vsel %vm1695_vm15, %v1697_v34, %v1693_v5  ;;  %v1750_v60 = vmul.f32 %v1746_v25, %v1683_v23  ;;  %v1723_v38 = vsel %vm5482_vm4, %v5394_v57, %v1719_v19  ;;  %2141 = vmatpush.msra.mxu1 %v5319_v31  ;;  %2161 = vmatpush.msrb.mxu2 %v5366_v55  ;;  %v1760_v43 = vrot.slane %v5302_v32, 7  ;;  %v5532_v34 = vld [vmem:[#allocation14 + $0xd0] sm:$0xff]  ;;  %v5547_v25 = vld [vmem:[#allocation14 + $0xa0] sm:$0xff] }
 0x5ed   :  { %v1751_v30 = vmul.f32 %v1747_v7, %v1698_v26  ;;  %v1727_v7 = vor.u32 1.1754944e-38, %v1726_v47  ;;  %v1738_v46 = vsel %vm5495_vm6, %v5400_v3, %v1734_v22  ;;  %2005 = vmatpush.msra.mxu0 %v5477_v48  ;;  %v1742_v57 = vor.u32 1.1754944e-38, %v1741_v51  ;;  %1994 = vmatpush.msra.mxu3 %v5510_v42  ;;  %6578 = vst [vmem:[#allocation29_spill] sm:$0xff] %v5526_v62  ;;  %v5536_v26 = vld [vmem:[#allocation14 + $0x8] sm:$0xff]  ;;  %v5541_v51 = vld [vmem:[#allocation14 + $0xb8] sm:$0xff] }
 0x5ee   :  { %v1752_v44 = vadd.f32 %v1750_v60, %v4735_v61  ;;  %v5504_v61 = vld [vmem:[#allocation14 + $0x118] sm:$0xff]  ;;  %2142 = vmatpush.msra.mxu1 %v5326_v20  ;;  %2162 = vmatpush.msrb.mxu2 %v5371_v59  ;;  %v1761_v5 = vrot.slane %v5304_v1, 7  ;;  %6579 = vst [vmem:[#allocation30_spill] sm:$0xff] %v5536_v26 }
 0x5ef   :  { %v1753_v14 = vadd.f32 %v1751_v30, %v4759_v39  ;;  %v5515_v39 = vld [vmem:[#allocation14 + $0x100] sm:$0xff]  ;;  %v1728_v47 = vsel %vm1725_vm7, %v1727_v7, %v1723_v38  ;;  %2006 = vmatpush.msra.mxu0 %v5504_v61  ;;  %v1743_v3 = vsel %vm1740_vm8, %v1742_v57, %v1738_v46  ;;  %1995 = vmatpush.msra.mxu3 %v5518_v12  ;;  %v5557_v38 = vld [vmem:[#allocation14 + $0x70] sm:$0xff]  ;;  %v5572_v57 = vld [vmem:[#allocation14 + $0x28] sm:$0xff] }
 0x5f0   :  { %3735 = vtanh.f32 %v1752_v44  ;;  %2143 = vmatpush.msra.mxu1 %v5329_v53  ;;  %2163 = vmatpush.msrb.mxu2 %v5380_v4  ;;  %v1756_v8 = vsub.f32 1.0, %v1728_v47  ;;  %v1757_v19 = vsub.f32 1.0, %v1743_v3  ;;  %v1764_v32 = vmul.f32 %v1760_v43, %v1728_v47  ;;  %v5552_v44 = vld [vmem:[#allocation14 + $0x88] sm:$0xff]  ;;  %v5567_v7 = vld [vmem:[#allocation14 + $0x40] sm:$0xff]  ;;  %v5575_v47 = vld [vmem:[#allocation14 + $0x10] sm:$0xff] }
 0x5f1   :  { %3737 = vtanh.f32 %v1753_v14  ;;  %2007 = vmatpush.msra.mxu0 %v5515_v39  ;;  %1996 = vmatpush.msra.mxu3 %v5526_v62  ;;  %v1765_v30 = vmul.f32 %v1761_v5, %v1743_v3  ;;  %v5562_v14 = vld [vmem:[#allocation14 + $0x58] sm:$0xff]  ;;  %6580 = vst [vmem:[#allocation40_spill] sm:$0xff] %v5575_v47 }
 0x5f2   :  { %2144 = vmatpush.msra.mxu1 %v5332_v17  ;;  %2164 = vmatpush.msrb.mxu2 %v5392_v9 }
 0x5f3   :  { %2008 = vmatpush.msra.mxu0 %v5523_v10  ;;  %1997 = vmatpush.msra.mxu3 %v5536_v26 }
 0x5f4   :  { %2145 = vmatpush.msra.mxu1 %v5334_v29  ;;  %2165 = vmatpush.msrb.mxu2 %v5408_v28 }
 0x5f5   :  { %2009 = vmatpush.msra.mxu0 %v5532_v34 }
 0x5f6   :  { %v3736_v23 = vpop.eup %3735  ;;  %2146 = vmatpush.msra.mxu1 %v5337_v49  ;;  %2166 = vmatpush.msrb.mxu2 %v5421_v11 }
 0x5f7   :  { %v3738_v22 = vpop.eup %3737  ;;  %v1758_v60 = vmul.f32 %v3736_v23, %v1756_v8  ;;  %2010 = vmatpush.msra.mxu0 %v5541_v51 }
 0x5f8   :  { %v1759_v18 = vmul.f32 %v3738_v22, %v1757_v19  ;;  %2147 = vmatpush.msra.mxu1 %v5340_v2  ;;  %2167 = vmatpush.msrb.mxu2 %v5436_v50 }
 0x5f9   :  { %v1766_v1 = vadd.f32 %v1764_v32, %v1758_v60  ;;  %2011 = vmatpush.msra.mxu0 %v5547_v25 }
 0x5fa   :  { %v1767_v15 = vadd.f32 %v1765_v30, %v1759_v18  ;;  %2148 = vmatpush.msra.mxu1 %v5349_v35  ;;  %2168 = vmatpush.msrb.mxu2 %v5457_v13 }
 0x5fb   :  { %1768 = vst [vmem:[#allocation2] sm:$0x80] %v1766_v1  ;;  %2012 = vmatpush.msra.mxu0 %v5552_v44 }
 0x5fc   :  { %1769 = vst [vmem:[#allocation2 + $0x8] sm:$0x80] %v1767_v15  ;;  %v1772_v37 = vrot.slane %v1767_v15, 7  ;;  %2149 = vmatpush.msra.mxu1 %v5361_v56  ;;  %2169 = vmatpush.msrb.mxu2 %v5467_v40 }
 0x5fd   :  { %1775 = vst [vmem:[#allocation19 - $0x7] sm:$0x80] %v1766_v1  ;;  %2013 = vmatpush.msra.mxu0 %v5557_v38 }
 0x5fe   :  { %1776 = vst [vmem:[#allocation19 + $0x1] sm:$0x1] %v1772_v37  ;;  %2150 = vmatpush.msra.mxu1 %v5369_v41  ;;  %2170 = vmatpush.msrb.mxu2 %v5489_v54 }
 0x5ff   :  { %2014 = vmatpush.msra.mxu0 %v5562_v14 }
 0x600   :  { %2151 = vmatpush.msra.mxu1 %v5378_v0  ;;  %2171 = vmatpush.msrb.mxu2 %v5510_v42 }
 0x601   :  { %2015 = vmatpush.msra.mxu0 %v5567_v7 }
 0x602   :  { %v1777_v46 = vld [vmem:[#allocation2] sm:$0xff]  ;;  %2152 = vmatpush.msra.mxu1 %v5390_v24  ;;  %2172 = vmatpush.msrb.mxu2 %v5518_v12 }
 0x603   :  { %1851 = vmatmul.f32.vlgmr.msrb.gmra.mxu3 %v1777_v46  ;;  %1874 = vmatmul.f32.vlgmr.msrb.gmra.mxu0 %v1777_v46  ;;  %v1778_v3 = vld [vmem:[#allocation2 + $0x8] sm:$0xff] }
 0x604   :  { %1897 = vmatmul.f32.vlgmr.msrb.gmra.mxu1 %v1777_v46  ;;  %2179 = vmatpush.msrb.mxu3 %v5430_v36 }
 0x605   :  { %2016 = vmatpush.msra.mxu0 %v5572_v57  ;;  %2153 = vmatpush.msra.mxu1 %v5406_v27 }
 0x606   :  { %2180 = vmatpush.msrb.mxu3 %v5449_v33  ;;  %2173 = vmatpush.msrb.mxu2 %v5526_v62 }
 0x607   :  { %2017 = vmatpush.msra.mxu0 %v5575_v47  ;;  %2154 = vmatpush.msra.mxu1 %v5419_v45 }
 0x608   :  { %2181 = vmatpush.msrb.mxu3 %v5470_v58  ;;  %2174 = vmatpush.msrb.mxu2 %v5536_v26 }
 0x609   :  { %2315 = vmatpush.msrb.mxu0 %v5311_v52  ;;  %2335 = vmatpush.msrb.mxu1 %v5345_v16 }
 0x60a   :  { %2182 = vmatpush.msrb.mxu3 %v5477_v48  ;;  %2355 = vmatpush.msra.mxu2 %v5430_v36 }
 0x60b   :  { %1854 = vmatmul.f32.gmra.mxu3 %v1778_v3  ;;  %1877 = vmatmul.f32.gmra.mxu0 %v1778_v3 }
 0x60c   :  { %1900 = vmatmul.f32.gmra.mxu1 %v1778_v3  ;;  %2183 = vmatpush.msrb.mxu3 %v5504_v61 }
 0x60d   :  { %2316 = vmatpush.msrb.mxu0 %v5316_v63  ;;  %2336 = vmatpush.msrb.mxu1 %v5356_v6 }
 0x60e   :  { %2184 = vmatpush.msrb.mxu3 %v5515_v39  ;;  %2356 = vmatpush.msra.mxu2 %v5449_v33 }
 0x60f   :  { %2317 = vmatpush.msrb.mxu0 %v5319_v31  ;;  %2337 = vmatpush.msrb.mxu1 %v5366_v55 }
 0x610   :  { %2185 = vmatpush.msrb.mxu3 %v5523_v10  ;;  %2357 = vmatpush.msra.mxu2 %v5470_v58 }
 0x611   :  { %2318 = vmatpush.msrb.mxu0 %v5326_v20  ;;  %2338 = vmatpush.msrb.mxu1 %v5371_v59 }
 0x612   :  { %2186 = vmatpush.msrb.mxu3 %v5532_v34  ;;  %2358 = vmatpush.msra.mxu2 %v5477_v48 }
 0x613   :  { %1998 = vmatmul.f32.vlgmr.msra.gmra.mxu3 %v5428_v21  ;;  %2018 = vmatmul.f32.vlgmr.msra.gmra.mxu0 %v5428_v21 }
 0x614   :  { %2187 = vmatpush.msrb.mxu3 %v5541_v51  ;;  %2319 = vmatpush.msrb.mxu0 %v5329_v53 }
 0x615   :  { %2339 = vmatpush.msrb.mxu1 %v5380_v4  ;;  %2359 = vmatpush.msra.mxu2 %v5504_v61 }
 0x616   :  { %2188 = vmatpush.msrb.mxu3 %v5547_v25  ;;  %2320 = vmatpush.msrb.mxu0 %v5332_v17 }
 0x617   :  { %2340 = vmatpush.msrb.mxu1 %v5392_v9  ;;  %2360 = vmatpush.msra.mxu2 %v5515_v39 }
 0x618   :  { %2189 = vmatpush.msrb.mxu3 %v5552_v44  ;;  %2321 = vmatpush.msrb.mxu0 %v5334_v29 }
 0x619   :  { %2341 = vmatpush.msrb.mxu1 %v5408_v28  ;;  %2361 = vmatpush.msra.mxu2 %v5523_v10 }
 0x61a   :  { %2190 = vmatpush.msrb.mxu3 %v5557_v38  ;;  %2322 = vmatpush.msrb.mxu0 %v5337_v49 }
 0x61b   :  { %2342 = vmatpush.msrb.mxu1 %v5421_v11  ;;  %2362 = vmatpush.msra.mxu2 %v5532_v34 }
 0x61c   :  { %2191 = vmatpush.msrb.mxu3 %v5562_v14  ;;  %2323 = vmatpush.msrb.mxu0 %v5340_v2 }
 0x61d   :  { %2343 = vmatpush.msrb.mxu1 %v5436_v50  ;;  %2363 = vmatpush.msra.mxu2 %v5541_v51 }
 0x61e   :  { %2192 = vmatpush.msrb.mxu3 %v5567_v7  ;;  %2324 = vmatpush.msrb.mxu0 %v5349_v35 }
 0x61f   :  { %2344 = vmatpush.msrb.mxu1 %v5457_v13  ;;  %2364 = vmatpush.msra.mxu2 %v5547_v25 }
 0x620   :  { %2193 = vmatpush.msrb.mxu3 %v5572_v57  ;;  %2325 = vmatpush.msrb.mxu0 %v5361_v56 }
 0x621   :  { %2345 = vmatpush.msrb.mxu1 %v5467_v40  ;;  %2365 = vmatpush.msra.mxu2 %v5552_v44 }
 0x622   :  { %2194 = vmatpush.msrb.mxu3 %v5575_v47  ;;  %2326 = vmatpush.msrb.mxu0 %v5369_v41 }
 0x623   :  { %2346 = vmatpush.msrb.mxu1 %v5489_v54  ;;  %2366 = vmatpush.msra.mxu2 %v5557_v38 }
 0x624   :  { %2496 = vmatpush.msra.mxu3 %v5311_v52  ;;  %2327 = vmatpush.msrb.mxu0 %v5378_v0  ;;  %v1952_v52 = vld [vmem:[#allocation15] sm:$0x7] }
 0x625   :  { %2347 = vmatpush.msrb.mxu1 %v5510_v42  ;;  %2367 = vmatpush.msra.mxu2 %v5562_v14  ;;  %v5701_v1 = vperm.slane %v1952_v52, 1 }
 0x626   :  { %2497 = vmatpush.msra.mxu3 %v5316_v63  ;;  %2328 = vmatpush.msrb.mxu0 %v5390_v24  ;;  %v5685_v63 = vperm.slane %v1952_v52, 0 }
 0x627   :  { %2348 = vmatpush.msrb.mxu1 %v5518_v12  ;;  %2368 = vmatpush.msra.mxu2 %v5567_v7  ;;  %6584 = vst [vmem:[#allocation33_spill] sm:$0xff] %v5701_v1 }
 0x628   :  { %2498 = vmatpush.msra.mxu3 %v5319_v31  ;;  %2329 = vmatpush.msrb.mxu0 %v5406_v27  ;;  %6581 = vst [vmem:[#allocation31_spill] sm:$0xff] %v5685_v63  ;;  %v5690_v31 = vld [vmem:[%s6334_s8] sm:$0x7]  ;;  %s4288_s8 = smov [#allocation19]  }
 0x629   :  { %2349 = vmatpush.msrb.mxu1 %v5526_v62  ;;  %2369 = vmatpush.msra.mxu2 %v5572_v57  ;;  %v1830_v30 = vperm.slane %v5690_v31, 1  ;;  %s3467_s23 = sshll.u32 %s4288_s8, 4  ;;  %s3468_s23 = int_to_ptr.vmem [resolvable:$true] %s3467_s23 }
 0x62a   :  { %2499 = vmatpush.msra.mxu3 %v5326_v20  ;;  %2330 = vmatpush.msrb.mxu0 %v5419_v45 }
 0x62b   :  { %2350 = vmatpush.msrb.mxu1 %v5536_v26  ;;  %2370 = vmatpush.msra.mxu2 %v5575_v47 }
 0x62c   :  { %2516 = vmatpush.msra.mxu0 %v5345_v16  ;;  %2500 = vmatpush.msra.mxu3 %v5329_v53  ;;  %v1829_v53 = vperm.slane %v5690_v31, 0 }
 0x62e   :  { %2517 = vmatpush.msra.mxu0 %v5356_v6  ;;  %2501 = vmatpush.msra.mxu3 %v5332_v17 }
 0x630   :  { %2518 = vmatpush.msra.mxu0 %v5366_v55  ;;  %2502 = vmatpush.msra.mxu3 %v5334_v29 }
 0x632   :  { %2519 = vmatpush.msra.mxu0 %v5371_v59  ;;  %2503 = vmatpush.msra.mxu3 %v5337_v49 }
 0x634   :  { %2520 = vmatpush.msra.mxu0 %v5380_v4  ;;  %2504 = vmatpush.msra.mxu3 %v5340_v2 }
 0x636   :  { %2521 = vmatpush.msra.mxu0 %v5392_v9  ;;  %2505 = vmatpush.msra.mxu3 %v5349_v35 }
 0x638   :  { %2522 = vmatpush.msra.mxu0 %v5408_v28  ;;  %2506 = vmatpush.msra.mxu3 %v5361_v56 }
 0x63a   :  { %2523 = vmatpush.msra.mxu0 %v5421_v11  ;;  %2507 = vmatpush.msra.mxu3 %v5369_v41 }
 0x63c   :  { %2524 = vmatpush.msra.mxu0 %v5436_v50  ;;  %2508 = vmatpush.msra.mxu3 %v5378_v0 }
 0x63e   :  { %2525 = vmatpush.msra.mxu0 %v5457_v13  ;;  %2509 = vmatpush.msra.mxu3 %v5390_v24 }
 0x640   :  { %2526 = vmatpush.msra.mxu0 %v5467_v40  ;;  %2510 = vmatpush.msra.mxu3 %v5406_v27 }
 0x642   :  { %2527 = vmatpush.msra.mxu0 %v5489_v54  ;;  %2511 = vmatpush.msra.mxu3 %v5419_v45 }
 0x644   :  { %2528 = vmatpush.msra.mxu0 %v5510_v42 }
 0x646   :  { %2529 = vmatpush.msra.mxu0 %v5518_v12 }
 0x648   :  { %2530 = vmatpush.msra.mxu0 %v5526_v62 }
 0x64a   :  { %2531 = vmatpush.msra.mxu0 %v5536_v26  ;;  %v1831_v26 = vperm.slane %v5690_v31, 2 }
 0x66a   :  { %v1979_v20 = vpop.f32.mrf.mxu2 }
 0x66b   :  { %v1980_v17 = vadd.f32 %v1979_v20, %v5685_v63 }
 0x66d   :  { %v2023_v19 = vrot.slane %v1980_v17, 1 }
 0x680   :  { %v1875_v5 = vpop.f32.mrf.mxu0 }
 0x681   :  { %v5703_v20 = vadd.f32 %v1875_v5, %v1830_v30 }
 0x683   :  { %6585 = vst [vmem:[#allocation34_spill] sm:$0xff] %v5703_v20 }
 0x686   :  { %v1852_v29 = vpop.f32.mrf.mxu3 }
 0x687   :  { %v5694_v43 = vadd.f32 %v1852_v29, %v1829_v53 }
 0x688   :  { %v1878_v46 = vpop.f32.mrf.mxu0 }
 0x689   :  { %6582 = vst [vmem:[#allocation32_spill] sm:$0xff] %v5694_v43  ;;  %v2026_v8 = vadd.f32 %v1980_v17, %v5694_v43  ;;  %v5706_v29 = vadd.f32 %v1878_v46, %v1830_v30  ;;  %v1898_v30 = vpop.f32.mrf.mxu1  ;;  %v5710_v46 = vperm.slane %v1952_v52, 2 }
 0x68b   :  { %v3529_v23 = vmul.f32 -1.442695, %v2026_v8  ;;  %6586 = vst [vmem:[#allocation42_spill] sm:$0xff] %v5706_v29 }
 0x68c   :  { %6587 = vst [vmem:[#allocation35_spill] sm:$0xff] %v5710_v46 }
 0x68d   :  { %3739 = vpow2.f32 %v3529_v23 }
 0x68e   :  { %v1855_v22 = vpop.f32.mrf.mxu3 }
 0x68f   :  { %v5697_v60 = vadd.f32 %v1855_v22, %v1829_v53 }
 0x691   :  { %6583 = vst [vmem:[#allocation41_spill] sm:$0xff] %v5697_v60  ;;  %v2027_v32 = vadd.f32 %v2023_v19, %v5697_v60 }
 0x693   :  { %v3740_v18 = vpop.eup %3739  ;;  %v3530_v15 = vmul.f32 -1.442695, %v2027_v32 }
 0x694   :  { %v2034_v37 = vadd.f32 1.0, %v3740_v18 }
 0x695   :  { %3741 = vpow2.f32 %v3530_v15 }
 0x696   :  { %3743 = vrcp.f32 %v2034_v37  ;;  %v1999_v3 = vpop.f32.mrf.mxu3  ;;  %vm2041_vm10 = vweird.f32 %v2034_v37 }
 0x697   :  { %v2000_v17 = vadd.f32 %v1999_v3, %v5701_v1  ;;  %v2047_v3 = vand.u32 2147483648, %v2034_v37  ;;  %v2045_v1 = vand.u32 2147483647, %v2034_v37 }
 0x699   :  { %v2067_v53 = vrot.slane %v2000_v17, 1  ;;  %v2070_v8 = vadd.f32 %v2000_v17, %v5703_v20  ;;  %v2019_v20 = vpop.f32.mrf.mxu0  ;;  %vm2046_vm12 = vcmp.eq.f32.partialorder %v2045_v1, 8.507059e+37 }
 0x69b   :  { %v3742_v23 = vpop.eup %3741  ;;  %v2071_v19 = vadd.f32 %v2067_v53, %v5706_v29  ;;  %v3531_v22 = vmul.f32 -1.442695, %v2070_v8 }
 0x69c   :  { %v3744_v43 = vpop.eup %3743  ;;  %v2035_v32 = vadd.f32 1.0, %v3742_v23 }
 0x69d   :  { %3745 = vpow2.f32 %v3531_v22  ;;  %v3532_v18 = vmul.f32 -1.442695, %v2071_v19  ;;  %v2037_v15 = vmul.f32 %v3744_v43, %v2034_v37  ;;  %vm2042_vm9 = vweird.f32 %v3744_v43 }
 0x69e   :  { %3747 = vrcp.f32 %v2035_v32  ;;  %vm2043_vm11 = vmor %vm2041_vm10, %vm2042_vm9  ;;  %v2048_v22 = vor.u32 1.1754944e-38, %v2047_v3  ;;  %v2062_v45 = vand.u32 2147483648, %v2035_v32  ;;  %v2060_v37 = vand.u32 2147483647, %v2035_v32 }
 0x69f   :  { %3749 = vpow2.f32 %v3532_v18  ;;  %v2038_v5 = vsub.f32 1.0, %v2037_v15  ;;  %v2020_v15 = vadd.f32 %v2019_v20, %v5710_v46  ;;  %vm2056_vm14 = vweird.f32 %v2035_v32 }
 0x6a0   :  { %v5714_v3 = vadd.f32 %v1898_v30, %v1831_v26  ;;  %v2063_v20 = vor.u32 1.1754944e-38, %v2062_v45  ;;  %vm2061_vm0 = vcmp.eq.f32.partialorder %v2060_v37, 8.507059e+37 }
 0x6a1   :  { %v2039_v60 = vmul.f32 %v3744_v43, %v2038_v5 }
 0x6a3   :  { %v3746_v17 = vpop.eup %3745  ;;  %v2040_v63 = vadd.f32 %v3744_v43, %v2039_v60 }
 0x6a4   :  { %v3748_v53 = vpop.eup %3747  ;;  %v2078_v8 = vadd.f32 1.0, %v3746_v17 }
 0x6a5   :  { %v3750_v23 = vpop.eup %3749  ;;  %v2044_v19 = vsel %vm2043_vm11, %v3744_v43, %v2040_v63  ;;  %v2052_v29 = vmul.f32 %v3748_v53, %v2035_v32  ;;  %vm2057_vm13 = vweird.f32 %v3748_v53  ;;  %v2111_v63 = vrot.slane %v2020_v15, 1 }
 0x6a6   :  { %v2079_v18 = vadd.f32 1.0, %v3750_v23  ;;  %3751 = vrcp.f32 %v2078_v8  ;;  %v2049_v5 = vsel %vm2046_vm12, %v2048_v22, %v2044_v19  ;;  %v1901_v23 = vpop.f32.mrf.mxu1  ;;  %vm2058_vm15 = vmor %vm2056_vm14, %vm2057_vm13  ;;  %v2089_v32 = vand.u32 2147483647, %v2078_v8 }
 0x6a7   :  { %v2053_v52 = vsub.f32 1.0, %v2052_v29  ;;  %v2114_v17 = vmul.f32 %v2049_v5, %v2020_v15  ;;  %v2091_v15 = vand.u32 2147483648, %v2078_v8  ;;  %vm2085_vm3 = vweird.f32 %v2078_v8 }
 0x6a8   :  { %3753 = vrcp.f32 %v2079_v18  ;;  %v2104_v45 = vand.u32 2147483647, %v2079_v18  ;;  %vm2090_vm6 = vcmp.eq.f32.partialorder %v2089_v32, 8.507059e+37  ;;  %vm2100_vm7 = vweird.f32 %v2079_v18 }
 0x6a9   :  { %v2054_v60 = vmul.f32 %v3748_v53, %v2053_v52  ;;  %v2116_v22 = vadd.f32 %v2114_v17, %v5714_v3  ;;  %v5717_v52 = vadd.f32 %v1901_v23, %v1831_v26  ;;  %v2092_v26 = vor.u32 1.1754944e-38, %v2091_v15 }
 0x6aa   :  { %vm2105_vm9 = vcmp.eq.f32.partialorder %v2104_v45, 8.507059e+37  ;;  %v5744_v45 = vld [vmem:[#allocation14 + $0x138] sm:$0xff] }
 0x6ab   :  { %v2055_v47 = vadd.f32 %v3748_v53, %v2054_v60  ;;  %3755 = vtanh.f32 %v2116_v22 }
 0x6ac   :  { %v3752_v43 = vpop.eup %3751 }
 0x6ad   :  { %v2081_v1 = vmul.f32 %v3752_v43, %v2078_v8  ;;  %v2059_v19 = vsel %vm2058_vm15, %v3748_v53, %v2055_v47  ;;  %vm2086_vm2 = vweird.f32 %v3752_v43  ;;  %v2106_v47 = vand.u32 2147483648, %v2079_v18 }
 0x6ae   :  { %v3754_v29 = vpop.eup %3753  ;;  %v2064_v31 = vsel %vm2061_vm0, %v2063_v20, %v2059_v19  ;;  %vm2087_vm5 = vmor %vm2085_vm3, %vm2086_vm2 }
 0x6af   :  { %v2082_v46 = vsub.f32 1.0, %v2081_v1  ;;  %v2096_v5 = vmul.f32 %v3754_v29, %v2079_v18  ;;  %v2115_v60 = vmul.f32 %v2111_v63, %v2064_v31  ;;  %vm2101_vm4 = vweird.f32 %v3754_v29 }
 0x6b0   :  { %vm2102_vm8 = vmor %vm2100_vm7, %vm2101_vm4  ;;  %v2107_v20 = vor.u32 1.1754944e-38, %v2106_v47 }
 0x6b1   :  { %v2097_v62 = vsub.f32 1.0, %v2096_v5  ;;  %v2117_v30 = vadd.f32 %v2115_v60, %v5717_v52  ;;  %v2083_v27 = vmul.f32 %v3752_v43, %v2082_v46  ;;  %v2125_v46 = vrot.slane %v5428_v21, 1  ;;  %v3756_v19 = vpop.eup %3755 }
 0x6b3   :  { %3757 = vtanh.f32 %v2117_v30  ;;  %v2084_v53 = vadd.f32 %v3752_v43, %v2083_v27  ;;  %v2098_v37 = vmul.f32 %v3754_v29, %v2097_v62  ;;  %v5739_v30 = vld [vmem:[#allocation14 + $0x150] sm:$0xff] }
 0x6b5   :  { %v2088_v17 = vsel %vm2087_vm5, %v3752_v43, %v2084_v53  ;;  %v2099_v63 = vadd.f32 %v3754_v29, %v2098_v37  ;;  %v6598_v53 = vld [vmem:[#allocation34_spill] sm:$0xff] }
 0x6b6   :  { %v2093_v23 = vsel %vm2090_vm6, %v2092_v26, %v2088_v17 }
 0x6b7   :  { %v2103_v1 = vsel %vm2102_vm8, %v3754_v29, %v2099_v63  ;;  %v2120_v8 = vsub.f32 1.0, %v2093_v23  ;;  %v2128_v5 = vmul.f32 %v2093_v23, %v5428_v21  ;;  %v5734_v21 = vld [vmem:[#allocation14 + $0x168] sm:$0xff] }
 0x6b8   :  { %v2108_v31 = vsel %vm2105_vm9, %v2107_v20, %v2103_v1 }
 0x6b9   :  { %v3758_v22 = vpop.eup %3757  ;;  %v2121_v27 = vsub.f32 1.0, %v2108_v31  ;;  %v2122_v62 = vmul.f32 %v3756_v19, %v2120_v8  ;;  %v2129_v43 = vmul.f32 %v2125_v46, %v2108_v31 }
 0x6bb   :  { %v2123_v60 = vmul.f32 %v3758_v22, %v2121_v27  ;;  %v5722_v32 = vadd.f32 %v2128_v5, %v2122_v62 }
 0x6bd   :  { %v5724_v18 = vadd.f32 %v2129_v43, %v2123_v60  ;;  %2132 = vst [vmem:[#allocation2] sm:$0x1] %v5722_v32  ;;  %v6599_v60 = vld [vmem:[#allocation35_spill] sm:$0xff] }
 0x6bf   :  { %2133 = vst [vmem:[#allocation2 + $0x8] sm:$0x1] %v5724_v18  ;;  %v2136_v29 = vrot.slane %v5724_v18, 7  ;;  %v5841_v18 = vld [vmem:[#allocation14 + $0x178] sm:$0xff] }
 0x6c1   :  { %v2137_v15 = vsel %vm511_vm1, %v2136_v29, %v5722_v32 }
 0x6c2   :  { %2155 = vmatmul.f32.vlgmr.msra.gmra.mxu1 %v2137_v15  ;;  %2175 = vmatmul.f32.vlgmr.msrb.gmra.mxu2 %v2137_v15 }
 0x6c3   :  { %2195 = vmatmul.f32.vlgmr.msrb.gmra.mxu3 %v2137_v15  ;;  %2536 = vmatpush.msra.mxu1 %v5430_v36  ;;  %v5749_v36 = vld [vmem:[#allocation14 + $0x120] sm:$0xff] }
 0x6c4   :  { %2677 = vmatpush.msrb.mxu2 %v5734_v21  ;;  %2697 = vmatpush.msrb.mxu3 %v5345_v16  ;;  %v5754_v16 = vld [vmem:[#allocation14 + $0x108] sm:$0xff] }
 0x6c5   :  { %2537 = vmatpush.msra.mxu1 %v5449_v33 }
 0x6c6   :  { %2678 = vmatpush.msrb.mxu2 %v5739_v30  ;;  %2698 = vmatpush.msrb.mxu3 %v5356_v6  ;;  %v5759_v6 = vld [vmem:[#allocation14 + $0xf0] sm:$0xff] }
 0x6c7   :  { %2538 = vmatpush.msra.mxu1 %v5470_v58  ;;  %v6596_v58 = vld [vmem:[#allocation33_spill] sm:$0xff] }
 0x6c8   :  { %2679 = vmatpush.msrb.mxu2 %v5744_v45  ;;  %2699 = vmatpush.msrb.mxu3 %v5366_v55  ;;  %v5764_v55 = vld [vmem:[#allocation14 + $0xd8] sm:$0xff] }
 0x6c9   :  { %2539 = vmatpush.msra.mxu1 %v5477_v48 }
 0x6ca   :  { %2680 = vmatpush.msrb.mxu2 %v5749_v36  ;;  %2700 = vmatpush.msrb.mxu3 %v5371_v59 }
 0x6cb   :  { %2540 = vmatpush.msra.mxu1 %v5504_v61 }
 0x6cc   :  { %2681 = vmatpush.msrb.mxu2 %v5754_v16  ;;  %2701 = vmatpush.msrb.mxu3 %v5380_v4 }
 0x6cd   :  { %2541 = vmatpush.msra.mxu1 %v5515_v39 }
 0x6ce   :  { %2682 = vmatpush.msrb.mxu2 %v5759_v6  ;;  %2702 = vmatpush.msrb.mxu3 %v5392_v9 }
 0x6cf   :  { %2542 = vmatpush.msra.mxu1 %v5523_v10 }
 0x6d0   :  { %2683 = vmatpush.msrb.mxu2 %v5764_v55  ;;  %2703 = vmatpush.msrb.mxu3 %v5408_v28  ;;  %v6594_v28 = vld [vmem:[#allocation41_spill] sm:$0xff] }
 0x6d1   :  { %2543 = vmatpush.msra.mxu1 %v5532_v34 }
 0x6d2   :  { %2684 = vmatpush.msrb.mxu2 %v5337_v49  ;;  %2704 = vmatpush.msrb.mxu3 %v5421_v11  ;;  %v6588_v49 = vld [vmem:[#allocation28_spill] sm:$0xff] }
 0x6d3   :  { %2544 = vmatpush.msra.mxu1 %v5541_v51  ;;  %v6595_v11 = vld [vmem:[#allocation32_spill] sm:$0xff] }
 0x6d4   :  { %2685 = vmatpush.msrb.mxu2 %v5340_v2  ;;  %2705 = vmatpush.msrb.mxu3 %v5436_v50  ;;  %v6589_v2 = vld [vmem:[#allocation29_spill] sm:$0xff] }
 0x6d5   :  { %2545 = vmatpush.msra.mxu1 %v5547_v25 }
 0x6d6   :  { %2686 = vmatpush.msrb.mxu2 %v5349_v35  ;;  %2706 = vmatpush.msrb.mxu3 %v5457_v13  ;;  %v6590_v35 = vld [vmem:[#allocation40_spill] sm:$0xff] }
 0x6d7   :  { %2546 = vmatpush.msra.mxu1 %v5552_v44 }
 0x6d8   :  { %2687 = vmatpush.msrb.mxu2 %v5361_v56  ;;  %2707 = vmatpush.msrb.mxu3 %v5467_v40  ;;  %v6591_v56 = vld [vmem:[#allocation39_spill] sm:$0xff] }
 0x6d9   :  { %2547 = vmatpush.msra.mxu1 %v5557_v38 }
 0x6da   :  { %2688 = vmatpush.msrb.mxu2 %v5369_v41  ;;  %2708 = vmatpush.msrb.mxu3 %v5489_v54  ;;  %v6592_v41 = vld [vmem:[#allocation30_spill] sm:$0xff] }
 0x6db   :  { %2548 = vmatpush.msra.mxu1 %v5562_v14 }
 0x6dc   :  { %2689 = vmatpush.msrb.mxu2 %v5378_v0  ;;  %2709 = vmatpush.msrb.mxu3 %v5510_v42  ;;  %v6593_v0 = vld [vmem:[#allocation31_spill] sm:$0xff] }
 0x6dd   :  { %2549 = vmatpush.msra.mxu1 %v5567_v7 }
 0x6de   :  { %2690 = vmatpush.msrb.mxu2 %v5390_v24  ;;  %2710 = vmatpush.msrb.mxu3 %v5518_v12  ;;  %v6597_v12 = vld [vmem:[#allocation42_spill] sm:$0xff] }
 0x6df   :  { %2550 = vmatpush.msra.mxu1 %v5572_v57 }
 0x6e0   :  { %2691 = vmatpush.msrb.mxu2 %v6588_v49  ;;  %2711 = vmatpush.msrb.mxu3 %v6589_v2 }
 0x6e1   :  { %2551 = vmatpush.msra.mxu1 %v6590_v35 }
 0x6e2   :  { %2692 = vmatpush.msrb.mxu2 %v6591_v56  ;;  %2712 = vmatpush.msrb.mxu3 %v6592_v41 }
 0x73f   :  { %v2156_v59 = vpop.f32.mrf.mxu1 }
 0x740   :  { %v2157_v4 = vadd.f32 %v2156_v59, %v6593_v0 }
 0x742   :  { %v2200_v9 = vrot.slane %v2157_v4, 7  ;;  %v2204_v24 = vadd.f32 %v2157_v4, %v6594_v28 }
 0x744   :  { %v2203_v50 = vadd.f32 %v2200_v9, %v6595_v11  ;;  %v3534_v33 = vmul.f32 -1.442695, %v2204_v24 }
 0x745   :  { %v2176_v13 = vpop.f32.mrf.mxu2 }
 0x746   :  { %v3533_v40 = vmul.f32 -1.442695, %v2203_v50  ;;  %3759 = vpow2.f32 %v3534_v33  ;;  %v2177_v54 = vadd.f32 %v2176_v13, %v6596_v58  ;;  %v2196_v31 = vpop.f32.mrf.mxu3 }
 0x747   :  { %v2197_v43 = vadd.f32 %v2196_v31, %v6599_v60 }
 0x748   :  { %3761 = vpow2.f32 %v3533_v40  ;;  %v2244_v42 = vrot.slane %v2177_v54, 7  ;;  %v2248_v47 = vadd.f32 %v2177_v54, %v6597_v12 }
 0x749   :  { %v2288_v13 = vrot.slane %v2197_v43, 7 }
 0x74a   :  { %v2247_v37 = vadd.f32 %v2244_v42, %v6598_v53  ;;  %v3536_v26 = vmul.f32 -1.442695, %v2248_v47 }
 0x74c   :  { %v3760_v17 = vpop.eup %3759  ;;  %v3535_v63 = vmul.f32 -1.442695, %v2247_v37  ;;  %3763 = vpow2.f32 %v3536_v26 }
 0x74d   :  { %v2212_v23 = vadd.f32 1.0, %v3760_v17 }
 0x74e   :  { %v3762_v20 = vpop.eup %3761  ;;  %3765 = vpow2.f32 %v3535_v63 }
 0x74f   :  { %v2211_v46 = vadd.f32 1.0, %v3762_v20  ;;  %3767 = vrcp.f32 %v2212_v23  ;;  %v2237_v59 = vand.u32 2147483647, %v2212_v23  ;;  %v2239_v4 = vand.u32 2147483648, %v2212_v23 }
 0x750   :  { %vm2233_vm10 = vweird.f32 %v2212_v23 }
 0x751   :  { %3769 = vrcp.f32 %v2211_v46  ;;  %v2222_v56 = vand.u32 2147483647, %v2211_v46  ;;  %v2224_v24 = vand.u32 2147483648, %v2211_v46  ;;  %vm2218_vm13 = vweird.f32 %v2211_v46 }
 0x752   :  { %v3764_v1 = vpop.eup %3763  ;;  %vm2238_vm15 = vcmp.eq.f32.partialorder %v2237_v59, 8.507059e+37  ;;  %v2240_v26 = vor.u32 1.1754944e-38, %v2239_v4 }
 0x753   :  { %v5801_v8 = vadd.f32 1.0, %v3764_v1  ;;  %vm5809_vm14 = vcmp.eq.f32.partialorder %v2222_v56, 8.507059e+37  ;;  %v2225_v1 = vor.u32 1.1754944e-38, %v2224_v24 }
 0x754   :  { %v3766_v19 = vpop.eup %3765 }
 0x755   :  { %v3768_v22 = vpop.eup %3767  ;;  %v5803_v27 = vadd.f32 1.0, %v3766_v19  ;;  %3771 = vrcp.f32 %v5801_v8  ;;  %vm2277_vm3 = vweird.f32 %v5801_v8 }
 0x756   :  { %v2229_v62 = vmul.f32 %v3768_v22, %v2212_v23  ;;  %vm2234_vm11 = vweird.f32 %v3768_v22  ;;  %v2283_v23 = vand.u32 2147483648, %v5801_v8 }
 0x757   :  { %v3770_v5 = vpop.eup %3769  ;;  %3773 = vrcp.f32 %v5803_v27  ;;  %vm2235_vm0 = vmor %vm2233_vm10, %vm2234_vm11  ;;  %v2268_v56 = vand.u32 2147483648, %v5803_v27  ;;  %vm2262_vm7 = vweird.f32 %v5803_v27 }
 0x758   :  { %v2214_v15 = vmul.f32 %v3770_v5, %v2211_v46  ;;  %v2230_v49 = vsub.f32 1.0, %v2229_v62  ;;  %vm2219_vm12 = vweird.f32 %v3770_v5  ;;  %v2281_v46 = vand.u32 2147483647, %v5801_v8 }
 0x759   :  { %vm2220_vm2 = vmor %vm2218_vm13, %vm2219_vm12  ;;  %v2269_v37 = vor.u32 1.1754944e-38, %v2268_v56  ;;  %v5852_v56 = vld [vmem:[#allocation14 + $0x158] sm:$0xff] }
 0x75a   :  { %v2215_v9 = vsub.f32 1.0, %v2214_v15  ;;  %v2231_v50 = vmul.f32 %v3768_v22, %v2230_v49  ;;  %vm2282_vm9 = vcmp.eq.f32.partialorder %v2281_v46, 8.507059e+37 }
 0x75b   :  { %v3772_v33 = vpop.eup %3771 }
 0x75c   :  { %v2273_v40 = vmul.f32 %v3772_v33, %v5801_v8  ;;  %v2216_v54 = vmul.f32 %v3770_v5, %v2215_v9  ;;  %v2232_v42 = vadd.f32 %v3768_v22, %v2231_v50  ;;  %vm2278_vm4 = vweird.f32 %v3772_v33 }
 0x75d   :  { %v3774_v47 = vpop.eup %3773  ;;  %v2266_v50 = vand.u32 2147483647, %v5803_v27  ;;  %vm2279_vm6 = vmor %vm2277_vm3, %vm2278_vm4  ;;  %v2301_v8 = vrot.slane %v5722_v32, 7 }
 0x75e   :  { %v2258_v17 = vmul.f32 %v3774_v47, %v5803_v27  ;;  %v2274_v63 = vsub.f32 1.0, %v2273_v40  ;;  %v2217_v20 = vadd.f32 %v3770_v5, %v2216_v54  ;;  %v2236_v19 = vsel %vm2235_vm0, %v3768_v22, %v2232_v42 }
 0x75f   :  { %v2241_v15 = vsel %vm2238_vm15, %v2240_v26, %v2236_v19  ;;  %vm2263_vm5 = vweird.f32 %v3774_v47  ;;  %v2284_v42 = vor.u32 1.1754944e-38, %v2283_v23  ;;  %vm2267_vm10 = vcmp.eq.f32.partialorder %v2266_v50, 8.507059e+37  ;;  %v5864_v23 = vld [vmem:[#allocation14 + $0x128] sm:$0xff]  ;;  %v5900_v50 = vld [vmem:[#allocation14 + $0x98] sm:$0xff] }
 0x760   :  { %v2259_v31 = vsub.f32 1.0, %v2258_v17  ;;  %v2221_v62 = vsel %vm2220_vm2, %v3770_v5, %v2217_v20  ;;  %v2275_v49 = vmul.f32 %v3772_v33, %v2274_v63  ;;  %v2292_v4 = vmul.f32 %v2241_v15, %v2197_v43  ;;  %vm2264_vm8 = vmor %vm2262_vm7, %vm2263_vm5 }
 0x761   :  { %v2226_v59 = vsel %vm5809_vm14, %v2225_v1, %v2221_v62 }
 0x762   :  { %v2260_v9 = vmul.f32 %v3774_v47, %v2259_v31  ;;  %v2291_v22 = vmul.f32 %v2288_v13, %v2226_v59  ;;  %v2276_v24 = vadd.f32 %v3772_v33, %v2275_v49  ;;  %v2294_v40 = vadd.f32 %v2292_v4, %v5717_v52  ;;  %v5848_v49 = vld [vmem:[#allocation14 + $0x160] sm:$0xff]  ;;  %v5855_v59 = vld [vmem:[#allocation14 + $0x148] sm:$0xff] }
 0x763   :  { %v5859_v4 = vld [vmem:[#allocation14 + $0x140] sm:$0xff] }
 0x764   :  { %v2261_v5 = vadd.f32 %v3774_v47, %v2260_v9  ;;  %v2293_v54 = vadd.f32 %v2291_v22, %v5714_v3  ;;  %v2280_v43 = vsel %vm2279_vm6, %v3772_v33, %v2276_v24  ;;  %3775 = vtanh.f32 %v2294_v40  ;;  %v5869_v9 = vld [vmem:[#allocation14 + $0x110] sm:$0xff]  ;;  %v5874_v22 = vld [vmem:[#allocation14 + $0xf8] sm:$0xff]  ;;  %v5890_v24 = vld [vmem:[#allocation14 + $0xa8] sm:$0xff] }
 0x765   :  { %v2285_v26 = vsel %vm2282_vm9, %v2284_v42, %v2280_v43  ;;  %v5907_v40 = vld [vmem:[#allocation14 + $0x80] sm:$0xff]  ;;  %v5928_v43 = vld [vmem:[#allocation14 + $0x38] sm:$0xff] }
 0x766   :  { %v2265_v13 = vsel %vm2264_vm8, %v3774_v47, %v2261_v5  ;;  %3777 = vtanh.f32 %v2293_v54  ;;  %v2298_v63 = vsub.f32 1.0, %v2285_v26  ;;  %v2305_v33 = vmul.f32 %v2285_v26, %v2136_v29  ;;  %v5845_v29 = vld [vmem:[#allocation14 + $0x170] sm:$0xff]  ;;  %6603 = vst [vmem:[#allocation43_spill] sm:$0xff] %v5907_v40  ;;  %v5914_v5 = vld [vmem:[#allocation14 + $0x68] sm:$0xff]  ;;  %v5937_v42 = vld [vmem:[#allocation14] sm:$0xff] }
 0x767   :  { %v2270_v17 = vsel %vm2267_vm10, %v2269_v37, %v2265_v13  ;;  %6605 = vst [vmem:[#allocation38_spill] sm:$0xff] %v5914_v5  ;;  %v5921_v54 = vld [vmem:[#allocation14 + $0x50] sm:$0xff] }
 0x768   :  { %v2297_v1 = vsub.f32 1.0, %v2270_v17  ;;  %v2304_v62 = vmul.f32 %v2301_v8, %v2270_v17  ;;  %6607 = vst [vmem:[#allocation52_spill] sm:$0xff] %v5921_v54 }
 0x769   :  { %6609 = vst [vmem:[#allocation45_spill] sm:$0xff] %v5928_v43 }
 0x76a   :  { %v3776_v20 = vpop.eup %3775  ;;  %6611 = vst [vmem:[#allocation47_spill] sm:$0xff] %v5937_v42 }
 0x76b   :  { %v2300_v19 = vmul.f32 %v3776_v20, %v2298_v63 }
 0x76c   :  { %v3778_v27 = vpop.eup %3777 }
 0x76d   :  { %v2299_v31 = vmul.f32 %v3778_v27, %v2297_v1  ;;  %v5832_v15 = vadd.f32 %v2305_v33, %v2300_v19 }
 0x76f   :  { %v5834_v47 = vadd.f32 %v2304_v62, %v2299_v31  ;;  %2309 = vst [vmem:[#allocation2 + $0x8] sm:$0x2] %v5832_v15 }
 0x771   :  { %2308 = vst [vmem:[#allocation2] sm:$0x2] %v5834_v47  ;;  %v2312_v46 = vrot.slane %v5834_v47, 1 }
 0x773   :  { %v2313_v32 = vsel %vm511_vm1, %v5832_v15, %v2312_v46 }
 0x774   :  { %2331 = vmatmul.f32.vlgmr.msrb.gmra.mxu0 %v2313_v32  ;;  %2351 = vmatmul.f32.vlgmr.msrb.gmra.mxu1 %v2313_v32 }
 0x775   :  { %2371 = vmatmul.f32.vlgmr.msra.gmra.mxu2 %v2313_v32  ;;  %2717 = vmatpush.msrb.mxu0 %v5841_v18 }
 0x776   :  { %2858 = vmatpush.msrb.mxu1 %v5734_v21  ;;  %2878 = vmatpush.msra.mxu2 %v5845_v29 }
 0x777   :  { %2718 = vmatpush.msrb.mxu0 %v5848_v49 }
 0x778   :  { %2859 = vmatpush.msrb.mxu1 %v5739_v30  ;;  %2879 = vmatpush.msra.mxu2 %v5852_v56 }
 0x779   :  { %2719 = vmatpush.msrb.mxu0 %v5855_v59 }
 0x77a   :  { %2860 = vmatpush.msrb.mxu1 %v5744_v45  ;;  %2880 = vmatpush.msra.mxu2 %v5859_v4 }
 0x77b   :  { %2720 = vmatpush.msrb.mxu0 %v5477_v48  ;;  %v5879_v48 = vld [vmem:[#allocation14 + $0xe0] sm:$0xff] }
 0x77c   :  { %2861 = vmatpush.msrb.mxu1 %v5749_v36  ;;  %2881 = vmatpush.msra.mxu2 %v5864_v23 }
 0x77d   :  { %2721 = vmatpush.msrb.mxu0 %v5504_v61  ;;  %v5883_v61 = vld [vmem:[#allocation14 + $0xc0] sm:$0xff] }
 0x77e   :  { %2862 = vmatpush.msrb.mxu1 %v5754_v16  ;;  %2882 = vmatpush.msra.mxu2 %v5869_v9 }
 0x77f   :  { %2722 = vmatpush.msrb.mxu0 %v5515_v39  ;;  %v5886_v39 = vld [vmem:[#allocation14 + $0xc8] sm:$0xff] }
 0x780   :  { %2863 = vmatpush.msrb.mxu1 %v5759_v6  ;;  %2883 = vmatpush.msra.mxu2 %v5874_v22 }
 0x781   :  { %2723 = vmatpush.msrb.mxu0 %v5523_v10  ;;  %v5893_v10 = vld [vmem:[#allocation14 + $0xb0] sm:$0xff] }
 0x782   :  { %2864 = vmatpush.msrb.mxu1 %v5764_v55  ;;  %2884 = vmatpush.msra.mxu2 %v5879_v48 }
 0x783   :  { %2724 = vmatpush.msrb.mxu0 %v5532_v34  ;;  %v5897_v34 = vld [vmem:[#allocation14 + $0x90] sm:$0xff] }
 0x784   :  { %2865 = vmatpush.msrb.mxu1 %v5883_v61  ;;  %2885 = vmatpush.msra.mxu2 %v5886_v39 }
 0x785   :  { %2725 = vmatpush.msrb.mxu0 %v5541_v51  ;;  %v5904_v51 = vld [vmem:[#allocation14 + $0x78] sm:$0xff] }
 0x786   :  { %2866 = vmatpush.msrb.mxu1 %v5890_v24  ;;  %2886 = vmatpush.msra.mxu2 %v5893_v10  ;;  %6602 = vst [vmem:[#allocation36_spill] sm:$0xff] %v5904_v51 }
 0x787   :  { %2726 = vmatpush.msrb.mxu0 %v5547_v25  ;;  %v5911_v25 = vld [vmem:[#allocation14 + $0x60] sm:$0xff] }
 0x788   :  { %2867 = vmatpush.msrb.mxu1 %v5897_v34  ;;  %2887 = vmatpush.msra.mxu2 %v5900_v50  ;;  %6604 = vst [vmem:[#allocation37_spill] sm:$0xff] %v5911_v25 }
 0x789   :  { %2727 = vmatpush.msrb.mxu0 %v5552_v44  ;;  %v5918_v44 = vld [vmem:[#allocation14 + $0x48] sm:$0xff] }
 0x78a   :  { %2868 = vmatpush.msrb.mxu1 %v5904_v51  ;;  %2888 = vmatpush.msra.mxu2 %v5907_v40  ;;  %6606 = vst [vmem:[#allocation51_spill] sm:$0xff] %v5918_v44 }
 0x78b   :  { %2728 = vmatpush.msrb.mxu0 %v5557_v38  ;;  %v5925_v38 = vld [vmem:[#allocation14 + $0x30] sm:$0xff] }
 0x78c   :  { %2869 = vmatpush.msrb.mxu1 %v5911_v25  ;;  %2889 = vmatpush.msra.mxu2 %v5914_v5  ;;  %6608 = vst [vmem:[#allocation44_spill] sm:$0xff] %v5925_v38 }
 0x78d   :  { %2729 = vmatpush.msrb.mxu0 %v5562_v14  ;;  %v5932_v14 = vld [vmem:[#allocation14 + $0x18] sm:$0xff] }
 0x78e   :  { %2870 = vmatpush.msrb.mxu1 %v5918_v44  ;;  %2890 = vmatpush.msra.mxu2 %v5921_v54  ;;  %6610 = vst [vmem:[#allocation46_spill] sm:$0xff] %v5932_v14 }
 0x78f   :  { %2730 = vmatpush.msrb.mxu0 %v5567_v7 }
 0x790   :  { %2871 = vmatpush.msrb.mxu1 %v5925_v38  ;;  %2891 = vmatpush.msra.mxu2 %v5928_v43 }
 0x791   :  { %2731 = vmatpush.msrb.mxu0 %v5572_v57 }
 0x792   :  { %2872 = vmatpush.msrb.mxu1 %v5932_v14  ;;  %2892 = vmatpush.msra.mxu2 %v6589_v2 }
 0x793   :  { %2732 = vmatpush.msrb.mxu0 %v6590_v35 }
 0x794   :  { %2873 = vmatpush.msrb.mxu1 %v5937_v42  ;;  %2893 = vmatpush.msra.mxu2 %v6592_v41 }
 0x7f1   :  { %v2332_v7 = vpop.f32.mrf.mxu0  ;;  %v2352_v37 = vpop.f32.mrf.mxu1 }
 0x7f2   :  { %v2333_v13 = vadd.f32 %v2332_v7, %v6593_v0  ;;  %v2353_v57 = vadd.f32 %v2352_v37, %v6596_v58 }
 0x7f4   :  { %v2376_v26 = vrot.slane %v2333_v13, 6  ;;  %v2377_v17 = vrot.slane %v2333_v13, 7  ;;  %v2421_v63 = vrot.slane %v2353_v57, 6  ;;  %v2422_v20 = vrot.slane %v2353_v57, 7 }
 0x7f6   :  { %v2380_v2 = vadd.f32 %v2376_v26, %v6595_v11  ;;  %v2381_v35 = vadd.f32 %v2377_v17, %v6594_v28  ;;  %v2425_v8 = vadd.f32 %v2421_v63, %v6598_v53  ;;  %v2426_v1 = vadd.f32 %v2422_v20, %v6597_v12 }
 0x7f8   :  { %v3537_v27 = vmul.f32 -1.442695, %v2380_v2  ;;  %v3538_v41 = vmul.f32 -1.442695, %v2381_v35  ;;  %v3539_v19 = vmul.f32 -1.442695, %v2425_v8  ;;  %v2372_v26 = vpop.f32.mrf.mxu2 }
 0x7f9   :  { %v3540_v33 = vmul.f32 -1.442695, %v2426_v1  ;;  %v2373_v17 = vadd.f32 %v2372_v26, %v6599_v60 }
 0x7fa   :  { %3779 = vpow2.f32 %v3537_v27 }
 0x7fb   :  { %3781 = vpow2.f32 %v3538_v41  ;;  %v2467_v12 = vrot.slane %v2373_v17, 7 }
 0x7fc   :  { %3783 = vpow2.f32 %v3539_v19 }
 0x7fd   :  { %3785 = vpow2.f32 %v3540_v33  ;;  %v2466_v33 = vrot.slane %v2373_v17, 6 }
 0x800   :  { %v3780_v31 = vpop.eup %3779 }
 0x801   :  { %v3782_v62 = vpop.eup %3781  ;;  %v2388_v46 = vadd.f32 1.0, %v3780_v31 }
 0x802   :  { %v3784_v32 = vpop.eup %3783  ;;  %v2389_v7 = vadd.f32 1.0, %v3782_v62 }
 0x803   :  { %v3786_v37 = vpop.eup %3785  ;;  %3787 = vrcp.f32 %v2388_v46  ;;  %v5947_v13 = vadd.f32 1.0, %v3784_v32  ;;  %v2399_v19 = vand.u32 2147483647, %v2388_v46  ;;  %v2401_v62 = vand.u32 2147483648, %v2388_v46 }
 0x804   :  { %3789 = vrcp.f32 %v2389_v7  ;;  %v5949_v57 = vadd.f32 1.0, %v3786_v37  ;;  %v2414_v37 = vand.u32 2147483647, %v2389_v7  ;;  %v2416_v26 = vand.u32 2147483648, %v2389_v7 }
 0x805   :  { %3791 = vrcp.f32 %v5947_v13  ;;  %vm2395_vm13 = vweird.f32 %v2388_v46  ;;  %vm2410_vm14 = vweird.f32 %v2389_v7  ;;  %v2402_v14 = vor.u32 1.1754944e-38, %v2401_v62 }
 0x806   :  { %3793 = vrcp.f32 %v5949_v57  ;;  %vm2400_vm0 = vcmp.eq.f32.partialorder %v2399_v19, 8.507059e+37  ;;  %vm2415_vm3 = vcmp.eq.f32.partialorder %v2414_v37, 8.507059e+37  ;;  %vm2440_vm6 = vweird.f32 %v5947_v13 }
 0x807   :  { %vm2455_vm8 = vweird.f32 %v5949_v57  ;;  %v2480_v19 = vrot.slane %v5834_v47, 7 }
 0x809   :  { %v3788_v63 = vpop.eup %3787 }
 0x80a   :  { %v3790_v20 = vpop.eup %3789  ;;  %v2391_v2 = vmul.f32 %v3788_v63, %v2388_v46  ;;  %vm2396_vm11 = vweird.f32 %v3788_v63 }
 0x80b   :  { %v3792_v35 = vpop.eup %3791  ;;  %v2406_v8 = vmul.f32 %v3790_v20, %v2389_v7  ;;  %vm2411_vm12 = vweird.f32 %v3790_v20  ;;  %vm2397_vm15 = vmor %vm2395_vm13, %vm2396_vm11  ;;  %v2444_v7 = vand.u32 2147483647, %v5947_v13 }
 0x80c   :  { %v3794_v1 = vpop.eup %3793  ;;  %v2436_v27 = vmul.f32 %v3792_v35, %v5947_v13  ;;  %v2392_v41 = vsub.f32 1.0, %v2391_v2  ;;  %v2446_v2 = vand.u32 2147483648, %v5947_v13  ;;  %vm2412_vm2 = vmor %vm2410_vm14, %vm2411_vm12  ;;  %vm2441_vm4 = vweird.f32 %v3792_v35 }
 0x80d   :  { %v2451_v31 = vmul.f32 %v3794_v1, %v5949_v57  ;;  %v2407_v32 = vsub.f32 1.0, %v2406_v8  ;;  %vm2456_vm5 = vweird.f32 %v3794_v1  ;;  %vm2442_vm7 = vmor %vm2440_vm6, %vm2441_vm4  ;;  %vm2445_vm10 = vcmp.eq.f32.partialorder %v2444_v7, 8.507059e+37  ;;  %v6014_v7 = vld [vmem:[#allocation14 + $0xa0] sm:$0xff] }
 0x80e   :  { %v2437_v28 = vsub.f32 1.0, %v2436_v27  ;;  %v2393_v11 = vmul.f32 %v3788_v63, %v2392_v41  ;;  %v2417_v27 = vor.u32 1.1754944e-38, %v2416_v26  ;;  %vm2457_vm9 = vmor %vm2455_vm8, %vm2456_vm5 }
 0x80f   :  { %v2452_v60 = vsub.f32 1.0, %v2451_v31  ;;  %v2408_v0 = vmul.f32 %v3790_v20, %v2407_v32 }
 0x810   :  { %v2438_v53 = vmul.f32 %v3792_v35, %v2437_v28  ;;  %v2394_v58 = vadd.f32 %v3788_v63, %v2393_v11 }
 0x811   :  { %v2453_v42 = vmul.f32 %v3794_v1, %v2452_v60  ;;  %v2409_v43 = vadd.f32 %v3790_v20, %v2408_v0  ;;  %v2461_v60 = vand.u32 2147483648, %v5949_v57 }
 0x812   :  { %v2398_v8 = vsel %vm2397_vm15, %v3788_v63, %v2394_v58  ;;  %v2439_v32 = vadd.f32 %v3792_v35, %v2438_v53  ;;  %v2459_v58 = vand.u32 2147483647, %v5949_v57  ;;  %v2481_v57 = vrot.slane %v5832_v15, 7 }
 0x813   :  { %v2403_v41 = vsel %vm2400_vm0, %v2402_v14, %v2398_v8  ;;  %v2413_v31 = vsel %vm2412_vm2, %v3790_v20, %v2409_v43  ;;  %v2454_v11 = vadd.f32 %v3794_v1, %v2453_v42  ;;  %v2447_v42 = vor.u32 1.1754944e-38, %v2446_v2 }
 0x814   :  { %v2418_v28 = vsel %vm2415_vm3, %v2417_v27, %v2413_v31  ;;  %v2470_v46 = vmul.f32 %v2466_v33, %v2403_v41  ;;  %v2443_v53 = vsel %vm2442_vm7, %v3792_v35, %v2439_v32  ;;  %v2462_v63 = vor.u32 1.1754944e-38, %v2461_v60  ;;  %v5984_v31 = vld [vmem:[#allocation14 + $0x130] sm:$0xff]  ;;  %v5989_v32 = vld [vmem:[#allocation14 + $0x118] sm:$0xff] }
 0x815   :  { %v2471_v0 = vmul.f32 %v2467_v12, %v2418_v28  ;;  %v2458_v17 = vsel %vm2457_vm9, %v3794_v1, %v2454_v11  ;;  %v2448_v20 = vsel %vm2445_vm10, %v2447_v42, %v2443_v53  ;;  %vm2460_vm11 = vcmp.eq.f32.partialorder %v2459_v58, 8.507059e+37  ;;  %v5994_v28 = vld [vmem:[#allocation14 + $0x100] sm:$0xff]  ;;  %v5999_v11 = vld [vmem:[#allocation14 + $0xe8] sm:$0xff]  ;;  %v6009_v60 = vld [vmem:[#allocation14 + $0xb8] sm:$0xff] }
 0x816   :  { %v2472_v14 = vadd.f32 %v2470_v46, %v5714_v3  ;;  %v2463_v12 = vsel %vm2460_vm11, %v2462_v63, %v2458_v17  ;;  %v2476_v13 = vsub.f32 1.0, %v2448_v20  ;;  %v2484_v26 = vmul.f32 %v2480_v19, %v2448_v20  ;;  %v6004_v46 = vld [vmem:[#allocation14 + $0xd0] sm:$0xff]  ;;  %v6034_v53 = vld [vmem:[#allocation14 + $0x40] sm:$0xff]  ;;  %v6039_v42 = vld [vmem:[#allocation14 + $0x28] sm:$0xff] }
 0x817   :  { %v2473_v43 = vadd.f32 %v2471_v0, %v5717_v52  ;;  %v2477_v62 = vsub.f32 1.0, %v2463_v12  ;;  %v2485_v2 = vmul.f32 %v2481_v57, %v2463_v12  ;;  %v6019_v0 = vld [vmem:[#allocation14 + $0x88] sm:$0xff]  ;;  %v6024_v58 = vld [vmem:[#allocation14 + $0x70] sm:$0xff]  ;;  %6614 = vst [vmem:[#allocation50_spill] sm:$0xff] %v6034_v53  ;;  %v6043_v63 = vld [vmem:[#allocation14 + $0x20] sm:$0xff] }
 0x818   :  { %3795 = vtanh.f32 %v2472_v14  ;;  %6612 = vst [vmem:[#allocation48_spill] sm:$0xff] %v6024_v58  ;;  %v6029_v14 = vld [vmem:[#allocation14 + $0x58] sm:$0xff]  ;;  %v6617_v17 = vld [vmem:[#allocation46_spill] sm:$0xff]  ;;  %v6046_v20 = vld [vmem:[#allocation14 + $0x10] sm:$0xff] }
 0x819   :  { %3797 = vtanh.f32 %v2473_v43  ;;  %6613 = vst [vmem:[#allocation49_spill] sm:$0xff] %v6029_v14  ;;  %v6615_v43 = vld [vmem:[#allocation45_spill] sm:$0xff]  ;;  %v6620_v12 = vld [vmem:[#allocation47_spill] sm:$0xff] }
 0x81a   :  { %6616 = vst [vmem:[#allocation28_spill] sm:$0xff] %v6039_v42 }
 0x81b   :  { %6618 = vst [vmem:[#allocation29_spill] sm:$0xff] %v6043_v63 }
 0x81c   :  { %6619 = vst [vmem:[#allocation40_spill] sm:$0xff] %v6046_v20 }
 0x81e   :  { %v3796_v33 = vpop.eup %3795 }
 0x81f   :  { %v3798_v37 = vpop.eup %3797  ;;  %v2478_v35 = vmul.f32 %v3796_v33, %v2476_v13  ;;  %v6050_v13 = vld [vmem:[#allocation14 + $0x8] sm:$0xff]  ;;  %v6622_v33 = vld [vmem:[#allocation33_spill] sm:$0xff] }
 0x820   :  { %v2479_v8 = vmul.f32 %v3798_v37, %v2477_v62  ;;  %6621 = vst [vmem:[#allocation39_spill] sm:$0xff] %v6050_v13 }
 0x821   :  { %v5966_v1 = vadd.f32 %v2484_v26, %v2478_v35  ;;  %v6623_v35 = vld [vmem:[#allocation34_spill] sm:$0xff] }
 0x822   :  { %v5968_v27 = vadd.f32 %v2485_v2, %v2479_v8  ;;  %v6624_v8 = vld [vmem:[#allocation42_spill] sm:$0xff] }
 0x823   :  { %2488 = vst [vmem:[#allocation2] sm:$0x4] %v5966_v1  ;;  %v2492_v41 = vrot.slane %v5966_v1, 2 }
 0x824   :  { %2489 = vst [vmem:[#allocation2 + $0x8] sm:$0x4] %v5968_v27  ;;  %v2493_v47 = vrot.slane %v5968_v27, 1 }
 0x826   :  { %v2494_v15 = vsel %vm511_vm1, %v2493_v47, %v2492_v41 }
 0x827   :  { %2512 = vmatmul.f32.vlgmr.msra.gmra.mxu3 %v2494_v15  ;;  %2532 = vmatmul.f32.vlgmr.msra.gmra.mxu0 %v2494_v15 }
 0x828   :  { %2552 = vmatmul.f32.vlgmr.msra.gmra.mxu1 %v2494_v15  ;;  %2898 = vmatpush.msra.mxu3 %v5841_v18 }
 0x829   :  { %3039 = vmatpush.msra.mxu0 %v5734_v21  ;;  %3059 = vmatpush.msra.mxu1 %v5845_v29 }
 0x82a   :  { %2899 = vmatpush.msra.mxu3 %v5848_v49 }
 0x82b   :  { %3040 = vmatpush.msra.mxu0 %v5739_v30  ;;  %3060 = vmatpush.msra.mxu1 %v5852_v56 }
 0x82c   :  { %2900 = vmatpush.msra.mxu3 %v5855_v59 }
 0x82d   :  { %3041 = vmatpush.msra.mxu0 %v5744_v45  ;;  %3061 = vmatpush.msra.mxu1 %v5859_v4 }
 0x82e   :  { %2901 = vmatpush.msra.mxu3 %v5984_v31 }
 0x82f   :  { %3042 = vmatpush.msra.mxu0 %v5749_v36  ;;  %3062 = vmatpush.msra.mxu1 %v5864_v23 }
 0x830   :  { %2902 = vmatpush.msra.mxu3 %v5989_v32 }
 0x831   :  { %3043 = vmatpush.msra.mxu0 %v5754_v16  ;;  %3063 = vmatpush.msra.mxu1 %v5869_v9 }
 0x832   :  { %2903 = vmatpush.msra.mxu3 %v5994_v28 }
 0x833   :  { %3044 = vmatpush.msra.mxu0 %v5759_v6  ;;  %3064 = vmatpush.msra.mxu1 %v5874_v22 }
 0x834   :  { %2904 = vmatpush.msra.mxu3 %v5999_v11 }
 0x835   :  { %3045 = vmatpush.msra.mxu0 %v5764_v55  ;;  %3065 = vmatpush.msra.mxu1 %v5879_v48 }
 0x836   :  { %2905 = vmatpush.msra.mxu3 %v6004_v46 }
 0x837   :  { %3046 = vmatpush.msra.mxu0 %v5883_v61  ;;  %3066 = vmatpush.msra.mxu1 %v5886_v39 }
 0x838   :  { %2906 = vmatpush.msra.mxu3 %v6009_v60 }
 0x839   :  { %3047 = vmatpush.msra.mxu0 %v5890_v24  ;;  %3067 = vmatpush.msra.mxu1 %v5893_v10 }
 0x83a   :  { %2907 = vmatpush.msra.mxu3 %v6014_v7 }
 0x83b   :  { %3048 = vmatpush.msra.mxu0 %v5897_v34  ;;  %3068 = vmatpush.msra.mxu1 %v5900_v50 }
 0x83c   :  { %2908 = vmatpush.msra.mxu3 %v6019_v0 }
 0x83d   :  { %3049 = vmatpush.msra.mxu0 %v5904_v51  ;;  %3069 = vmatpush.msra.mxu1 %v5907_v40 }
 0x83e   :  { %2909 = vmatpush.msra.mxu3 %v6024_v58 }
 0x83f   :  { %3050 = vmatpush.msra.mxu0 %v5911_v25  ;;  %3070 = vmatpush.msra.mxu1 %v5914_v5 }
 0x840   :  { %2910 = vmatpush.msra.mxu3 %v6029_v14 }
 0x841   :  { %3051 = vmatpush.msra.mxu0 %v5918_v44  ;;  %3071 = vmatpush.msra.mxu1 %v5921_v54 }
 0x842   :  { %2911 = vmatpush.msra.mxu3 %v6034_v53 }
 0x843   :  { %3052 = vmatpush.msra.mxu0 %v5925_v38  ;;  %3072 = vmatpush.msra.mxu1 %v6615_v43  ;;  %v6627_v43 = vld [vmem:[#allocation41_spill] sm:$0xff] }
 0x844   :  { %2912 = vmatpush.msra.mxu3 %v6039_v42  ;;  %v6626_v42 = vld [vmem:[#allocation32_spill] sm:$0xff] }
 0x845   :  { %3053 = vmatpush.msra.mxu0 %v6617_v17  ;;  %3073 = vmatpush.msra.mxu1 %v6043_v63  ;;  %v6625_v63 = vld [vmem:[#allocation31_spill] sm:$0xff] }
 0x846   :  { %2913 = vmatpush.msra.mxu3 %v6046_v20 }
 0x847   :  { %3054 = vmatpush.msra.mxu0 %v6620_v12  ;;  %3074 = vmatpush.msra.mxu1 %v6050_v13 }
 0x8a4   :  { %v2533_v19 = vpop.f32.mrf.mxu0 }
 0x8a5   :  { %v2534_v57 = vadd.f32 %v2533_v19, %v6622_v33 }
 0x8a7   :  { %v2602_v62 = vrot.slane %v2534_v57, 5  ;;  %v2603_v37 = vrot.slane %v2534_v57, 6 }
 0x8a9   :  { %v2606_v26 = vadd.f32 %v2602_v62, %v6623_v35  ;;  %v2607_v2 = vadd.f32 %v2603_v37, %v6624_v8 }
 0x8aa   :  { %v2513_v41 = vpop.f32.mrf.mxu3 }
 0x8ab   :  { %v3543_v47 = vmul.f32 -1.442695, %v2606_v26  ;;  %v3544_v15 = vmul.f32 -1.442695, %v2607_v2  ;;  %v2514_v20 = vadd.f32 %v2513_v41, %v6625_v63  ;;  %v2553_v41 = vpop.f32.mrf.mxu1 }
 0x8ad   :  { %3799 = vpow2.f32 %v3543_v47  ;;  %v2557_v12 = vrot.slane %v2514_v20, 5  ;;  %v2558_v17 = vrot.slane %v2514_v20, 6 }
 0x8ae   :  { %3801 = vpow2.f32 %v3544_v15 }
 0x8af   :  { %v2561_v13 = vadd.f32 %v2557_v12, %v6626_v42  ;;  %v2562_v38 = vadd.f32 %v2558_v17, %v6627_v43 }
 0x8b1   :  { %v3541_v19 = vmul.f32 -1.442695, %v2561_v13  ;;  %v3542_v33 = vmul.f32 -1.442695, %v2562_v38 }
 0x8b3   :  { %v3800_v57 = vpop.eup %3799  ;;  %3803 = vpow2.f32 %v3541_v19 }
 0x8b4   :  { %v3802_v62 = vpop.eup %3801  ;;  %v6059_v35 = vadd.f32 1.0, %v3800_v57  ;;  %3805 = vpow2.f32 %v3542_v33 }
 0x8b5   :  { %v6061_v37 = vadd.f32 1.0, %v3802_v62  ;;  %v6628_v62 = vld [vmem:[#allocation35_spill] sm:$0xff] }
 0x8b6   :  { %3807 = vrcp.f32 %v6059_v35  ;;  %vm2621_vm7 = vweird.f32 %v6059_v35 }
 0x8b7   :  { %3809 = vrcp.f32 %v6061_v37  ;;  %vm2636_vm8 = vweird.f32 %v6061_v37 }
 0x8b9   :  { %v3804_v20 = vpop.eup %3803 }
 0x8ba   :  { %v3806_v26 = vpop.eup %3805  ;;  %v2569_v2 = vadd.f32 1.0, %v3804_v20  ;;  %v2554_v20 = vadd.f32 %v2553_v41, %v6628_v62 }
 0x8bb   :  { %v2570_v12 = vadd.f32 1.0, %v3806_v26 }
 0x8bc   :  { %3811 = vrcp.f32 %v2569_v2  ;;  %v6065_v17 = vpop.eup %3807  ;;  %v2580_v42 = vand.u32 2147483647, %v2569_v2  ;;  %v2582_v63 = vand.u32 2147483648, %v2569_v2  ;;  %v2647_v25 = vrot.slane %v2554_v20, 5 }
 0x8bd   :  { %3813 = vrcp.f32 %v2570_v12  ;;  %v6067_v38 = vpop.eup %3809  ;;  %v2617_v13 = vmul.f32 %v6065_v17, %v6059_v35  ;;  %v2595_v44 = vand.u32 2147483647, %v2570_v12  ;;  %v2597_v14 = vand.u32 2147483648, %v2570_v12 }
 0x8be   :  { %v2632_v33 = vmul.f32 %v6067_v38, %v6061_v37  ;;  %vm2576_vm14 = vweird.f32 %v2569_v2  ;;  %v2583_v41 = vor.u32 1.1754944e-38, %v2582_v63  ;;  %vm2591_vm0 = vweird.f32 %v2570_v12 }
 0x8bf   :  { %v2618_v57 = vsub.f32 1.0, %v2617_v13  ;;  %v2648_v13 = vrot.slane %v2554_v20, 6  ;;  %vm2581_vm2 = vcmp.eq.f32.partialorder %v2580_v42, 8.507059e+37  ;;  %vm2596_vm4 = vcmp.eq.f32.partialorder %v2595_v44, 8.507059e+37 }
 0x8c0   :  { %v2633_v8 = vsub.f32 1.0, %v2632_v33  ;;  %v2627_v33 = vand.u32 2147483648, %v6059_v35  ;;  %vm2622_vm5 = vweird.f32 %v6065_v17  ;;  %vm2637_vm6 = vweird.f32 %v6067_v38 }
 0x8c1   :  { %v2619_v5 = vmul.f32 %v6065_v17, %v2618_v57  ;;  %v2625_v44 = vand.u32 2147483647, %v6059_v35  ;;  %vm2623_vm9 = vmor %vm2621_vm7, %vm2622_vm5 }
 0x8c2   :  { %v3812_v47 = vpop.eup %3811  ;;  %v2634_v40 = vmul.f32 %v6067_v38, %v2633_v8  ;;  %vm2638_vm10 = vmor %vm2636_vm8, %vm2637_vm6  ;;  %v2628_v42 = vor.u32 1.1754944e-38, %v2627_v33 }
 0x8c3   :  { %v3814_v15 = vpop.eup %3813  ;;  %v2572_v19 = vmul.f32 %v3812_v47, %v2569_v2  ;;  %vm2577_vm12 = vweird.f32 %v3812_v47  ;;  %vm2626_vm11 = vcmp.eq.f32.partialorder %v2625_v44, 8.507059e+37 }
 0x8c4   :  { %v2587_v26 = vmul.f32 %v3814_v15, %v2570_v12  ;;  %vm2592_vm13 = vweird.f32 %v3814_v15  ;;  %vm2578_vm15 = vmor %vm2576_vm14, %vm2577_vm12  ;;  %v2635_v2 = vadd.f32 %v6067_v38, %v2634_v40 }
 0x8c5   :  { %v2573_v43 = vsub.f32 1.0, %v2572_v19  ;;  %vm2593_vm3 = vmor %vm2591_vm0, %vm2592_vm13 }
 0x8c6   :  { %v2588_v53 = vsub.f32 1.0, %v2587_v26  ;;  %v2598_v26 = vor.u32 1.1754944e-38, %v2597_v14  ;;  %v2639_v63 = vsel %vm2638_vm10, %v6067_v38, %v2635_v2 }
 0x8c7   :  { %v2574_v54 = vmul.f32 %v3812_v47, %v2573_v43 }
 0x8c8   :  { %v2589_v58 = vmul.f32 %v3814_v15, %v2588_v53  ;;  %v2620_v53 = vadd.f32 %v6065_v17, %v2619_v5  ;;  %v2640_v5 = vand.u32 2147483647, %v6061_v37 }
 0x8c9   :  { %v2575_v51 = vadd.f32 %v3812_v47, %v2574_v54 }
 0x8ca   :  { %v2590_v19 = vadd.f32 %v3814_v15, %v2589_v58  ;;  %vm2641_vm12 = vcmp.eq.f32.partialorder %v2640_v5, 8.507059e+37  ;;  %v6648_v5 = vld [vmem:[#allocation32_spill] sm:$0xff] }
 0x8cb   :  { %v2579_v43 = vsel %vm2578_vm15, %v3812_v47, %v2575_v51  ;;  %v2642_v51 = vand.u32 2147483648, %v6061_v37  ;;  %v2661_v37 = vrot.slane %v5966_v1, 7 }
 0x8cc   :  { %v2584_v57 = vsel %vm2581_vm2, %v2583_v41, %v2579_v43  ;;  %v2594_v62 = vsel %vm2593_vm3, %v3814_v15, %v2590_v19 }
 0x8cd   :  { %v2599_v8 = vsel %vm2596_vm4, %v2598_v26, %v2594_v62  ;;  %v2651_v54 = vmul.f32 %v2647_v25, %v2584_v57  ;;  %v2624_v25 = vsel %vm2623_vm9, %v6065_v17, %v2620_v53  ;;  %v2643_v12 = vor.u32 1.1754944e-38, %v2642_v51 }
 0x8ce   :  { %v2652_v58 = vmul.f32 %v2648_v13, %v2599_v8  ;;  %v2629_v35 = vsel %vm2626_vm11, %v2628_v42, %v2624_v25  ;;  %v2662_v17 = vrot.slane %v5968_v27, 7  ;;  %v6647_v8 = vld [vmem:[#allocation33_spill] sm:$0xff]  ;;  %v6650_v42 = vld [vmem:[#allocation34_spill] sm:$0xff] }
 0x8cf   :  { %v2653_v14 = vadd.f32 %v2651_v54, %v5714_v3  ;;  %v2644_v47 = vsel %vm2641_vm12, %v2643_v12, %v2639_v63  ;;  %v2657_v15 = vsub.f32 1.0, %v2629_v35  ;;  %v2665_v19 = vmul.f32 %v2661_v37, %v2629_v35  ;;  %v6649_v25 = vld [vmem:[#allocation41_spill] sm:$0xff]  ;;  %v6651_v12 = vld [vmem:[#allocation42_spill] sm:$0xff] }
 0x8d0   :  { %v2654_v40 = vadd.f32 %v2652_v58, %v5717_v52  ;;  %v2658_v20 = vsub.f32 1.0, %v2644_v47  ;;  %v2666_v43 = vmul.f32 %v2662_v17, %v2644_v47 }
 0x8d1   :  { %3815 = vtanh.f32 %v2653_v14 }
 0x8d2   :  { %3817 = vtanh.f32 %v2654_v40 }
 0x8d7   :  { %v3816_v62 = vpop.eup %3815 }
 0x8d8   :  { %v3818_v13 = vpop.eup %3817  ;;  %v2659_v41 = vmul.f32 %v3816_v62, %v2657_v15 }
 0x8d9   :  { %v2660_v33 = vmul.f32 %v3818_v13, %v2658_v20 }
 0x8da   :  { %v6092_v38 = vadd.f32 %v2665_v19, %v2659_v41 }
 0x8db   :  { %v6094_v26 = vadd.f32 %v2666_v43, %v2660_v33 }
 0x8dc   :  { %2669 = vst [vmem:[#allocation2] sm:$0x8] %v6092_v38  ;;  %v2673_v57 = vrot.slane %v6092_v38, 3 }
 0x8dd   :  { %2670 = vst [vmem:[#allocation2 + $0x8] sm:$0x8] %v6094_v26  ;;  %v2674_v1 = vrot.slane %v6094_v26, 2 }
 0x8df   :  { %v2675_v53 = vsel %vm511_vm1, %v2674_v1, %v2673_v57 }
 0x8e0   :  { %2693 = vmatmul.f32.vlgmr.msrb.gmra.mxu2 %v2675_v53  ;;  %2713 = vmatmul.f32.vlgmr.msrb.gmra.mxu3 %v2675_v53 }
 0x8e1   :  { %2733 = vmatmul.f32.vlgmr.msrb.gmra.mxu0 %v2675_v53  ;;  %3079 = vmatpush.msrb.mxu2 %v5841_v18  ;;  %v6652_v53 = vld [vmem:[#allocation35_spill] sm:$0xff] }
 0x8e2   :  { %3220 = vmatpush.msrb.mxu3 %v5734_v21  ;;  %3240 = vmatpush.msrb.mxu0 %v5845_v29  ;;  %v6629_v21 = vld [vmem:[#allocation36_spill] sm:$0xff] }
 0x8e3   :  { %3080 = vmatpush.msrb.mxu2 %v5848_v49  ;;  %v6636_v29 = vld [vmem:[#allocation52_spill] sm:$0xff] }
 0x8e4   :  { %3221 = vmatpush.msrb.mxu3 %v5739_v30  ;;  %3241 = vmatpush.msrb.mxu0 %v5852_v56  ;;  %v6630_v30 = vld [vmem:[#allocation43_spill] sm:$0xff]  ;;  %v6637_v56 = vld [vmem:[#allocation50_spill] sm:$0xff] }
 0x8e5   :  { %3081 = vmatpush.msrb.mxu2 %v5855_v59 }
 0x8e6   :  { %3222 = vmatpush.msrb.mxu3 %v5744_v45  ;;  %3242 = vmatpush.msrb.mxu0 %v5859_v4  ;;  %v6631_v45 = vld [vmem:[#allocation48_spill] sm:$0xff] }
 0x8e7   :  { %3082 = vmatpush.msrb.mxu2 %v5984_v31  ;;  %v6638_v4 = vld [vmem:[#allocation44_spill] sm:$0xff] }
 0x8e8   :  { %3223 = vmatpush.msrb.mxu3 %v5749_v36  ;;  %3243 = vmatpush.msrb.mxu0 %v5864_v23  ;;  %v6632_v36 = vld [vmem:[#allocation37_spill] sm:$0xff] }
 0x8e9   :  { %3083 = vmatpush.msrb.mxu2 %v5989_v32  ;;  %v6639_v23 = vld [vmem:[#allocation45_spill] sm:$0xff] }
 0x8ea   :  { %3224 = vmatpush.msrb.mxu3 %v5754_v16  ;;  %3244 = vmatpush.msrb.mxu0 %v5869_v9  ;;  %v6633_v16 = vld [vmem:[#allocation38_spill] sm:$0xff]  ;;  %v6640_v9 = vld [vmem:[#allocation28_spill] sm:$0xff] }
 0x8eb   :  { %3084 = vmatpush.msrb.mxu2 %v5994_v28 }
 0x8ec   :  { %3225 = vmatpush.msrb.mxu3 %v5759_v6  ;;  %3245 = vmatpush.msrb.mxu0 %v5874_v22  ;;  %v6634_v6 = vld [vmem:[#allocation49_spill] sm:$0xff]  ;;  %v6641_v22 = vld [vmem:[#allocation46_spill] sm:$0xff] }
 0x8ed   :  { %3085 = vmatpush.msrb.mxu2 %v5999_v11 }
 0x8ee   :  { %3226 = vmatpush.msrb.mxu3 %v5764_v55  ;;  %3246 = vmatpush.msrb.mxu0 %v5879_v48  ;;  %v6635_v55 = vld [vmem:[#allocation51_spill] sm:$0xff]  ;;  %v6642_v48 = vld [vmem:[#allocation29_spill] sm:$0xff] }
 0x8ef   :  { %3086 = vmatpush.msrb.mxu2 %v6004_v46 }
 0x8f0   :  { %3227 = vmatpush.msrb.mxu3 %v5883_v61  ;;  %3247 = vmatpush.msrb.mxu0 %v5886_v39  ;;  %v6643_v61 = vld [vmem:[#allocation40_spill] sm:$0xff]  ;;  %v6644_v39 = vld [vmem:[#allocation47_spill] sm:$0xff] }
 0x8f1   :  { %3087 = vmatpush.msrb.mxu2 %v6009_v60 }
 0x8f2   :  { %3228 = vmatpush.msrb.mxu3 %v5890_v24  ;;  %3248 = vmatpush.msrb.mxu0 %v5893_v10  ;;  %v6645_v24 = vld [vmem:[#allocation39_spill] sm:$0xff] }
 0x8f3   :  { %3088 = vmatpush.msrb.mxu2 %v6014_v7 }
 0x8f4   :  { %3229 = vmatpush.msrb.mxu3 %v5897_v34  ;;  %3249 = vmatpush.msrb.mxu0 %v5900_v50  ;;  %v6646_v50 = vld [vmem:[#allocation31_spill] sm:$0xff] }
 0x8f5   :  { %3089 = vmatpush.msrb.mxu2 %v6019_v0 }
 0x8f6   :  { %3230 = vmatpush.msrb.mxu3 %v6629_v21  ;;  %3250 = vmatpush.msrb.mxu0 %v6630_v30 }
 0x8f7   :  { %3090 = vmatpush.msrb.mxu2 %v6631_v45 }
 0x8f8   :  { %3231 = vmatpush.msrb.mxu3 %v6632_v36  ;;  %3251 = vmatpush.msrb.mxu0 %v6633_v16 }
 0x8f9   :  { %3091 = vmatpush.msrb.mxu2 %v6634_v6 }
 0x8fa   :  { %3232 = vmatpush.msrb.mxu3 %v6635_v55  ;;  %3252 = vmatpush.msrb.mxu0 %v6636_v29 }
 0x8fb   :  { %3092 = vmatpush.msrb.mxu2 %v6637_v56 }
 0x8fc   :  { %3233 = vmatpush.msrb.mxu3 %v6638_v4  ;;  %3253 = vmatpush.msrb.mxu0 %v6639_v23 }
 0x8fd   :  { %3093 = vmatpush.msrb.mxu2 %v6640_v9 }
 0x8fe   :  { %3234 = vmatpush.msrb.mxu3 %v6641_v22  ;;  %3254 = vmatpush.msrb.mxu0 %v6642_v48 }
 0x8ff   :  { %3094 = vmatpush.msrb.mxu2 %v6643_v61 }
 0x900   :  { %3235 = vmatpush.msrb.mxu3 %v6644_v39  ;;  %3255 = vmatpush.msrb.mxu0 %v6645_v24 }
 0x95e   :  { %v2734_v43 = vpop.f32.mrf.mxu0 }
 0x95f   :  { %v2735_v21 = vadd.f32 %v2734_v43, %v6652_v53 }
 0x961   :  { %v2828_v29 = vrot.slane %v2735_v21, 4  ;;  %v2829_v39 = vrot.slane %v2735_v21, 5 }
 0x963   :  { %v2694_v10 = vpop.f32.mrf.mxu2  ;;  %v2714_v34 = vpop.f32.mrf.mxu3 }
 0x964   :  { %v2695_v27 = vadd.f32 %v2694_v10, %v6646_v50  ;;  %v2715_v54 = vadd.f32 %v2714_v34, %v6647_v8 }
 0x966   :  { %v2738_v2 = vrot.slane %v2695_v27, 4  ;;  %v2739_v51 = vrot.slane %v2695_v27, 5  ;;  %v2783_v58 = vrot.slane %v2715_v54, 4  ;;  %v2784_v44 = vrot.slane %v2715_v54, 5 }
 0x968   :  { %v2742_v14 = vadd.f32 %v2738_v2, %v6648_v5  ;;  %v2743_v40 = vadd.f32 %v2739_v51, %v6649_v25  ;;  %v2787_v63 = vadd.f32 %v2783_v58, %v6650_v42  ;;  %v2788_v35 = vadd.f32 %v2784_v44, %v6651_v12 }
 0x96a   :  { %v3545_v47 = vmul.f32 -1.442695, %v2742_v14  ;;  %v3546_v15 = vmul.f32 -1.442695, %v2743_v40  ;;  %v3547_v37 = vmul.f32 -1.442695, %v2787_v63 }
 0x96b   :  { %v3548_v62 = vmul.f32 -1.442695, %v2788_v35 }
 0x96c   :  { %3819 = vpow2.f32 %v3545_v47 }
 0x96d   :  { %3821 = vpow2.f32 %v3546_v15 }
 0x96e   :  { %3823 = vpow2.f32 %v3547_v37 }
 0x96f   :  { %3825 = vpow2.f32 %v3548_v62 }
 0x972   :  { %v3820_v20 = vpop.eup %3819 }
 0x973   :  { %v3822_v17 = vpop.eup %3821  ;;  %v2750_v13 = vadd.f32 1.0, %v3820_v20 }
 0x974   :  { %v3824_v41 = vpop.eup %3823  ;;  %v2751_v19 = vadd.f32 1.0, %v3822_v17 }
 0x975   :  { %v3826_v33 = vpop.eup %3825  ;;  %3827 = vrcp.f32 %v2750_v13  ;;  %v6155_v57 = vadd.f32 1.0, %v3824_v41  ;;  %v2761_v23 = vand.u32 2147483647, %v2750_v13  ;;  %v2763_v22 = vand.u32 2147483648, %v2750_v13 }
 0x976   :  { %3829 = vrcp.f32 %v2751_v19  ;;  %v6157_v1 = vadd.f32 1.0, %v3826_v33  ;;  %v2776_v10 = vand.u32 2147483647, %v2751_v19  ;;  %v2778_v34 = vand.u32 2147483648, %v2751_v19 }
 0x977   :  { %3831 = vrcp.f32 %v6155_v57  ;;  %vm2757_vm13 = vweird.f32 %v2750_v13  ;;  %vm2772_vm15 = vweird.f32 %v2751_v19  ;;  %vm2762_vm2 = vcmp.eq.f32.partialorder %v2761_v23, 8.507059e+37 }
 0x978   :  { %3833 = vrcp.f32 %v6157_v1  ;;  %v2764_v14 = vor.u32 1.1754944e-38, %v2763_v22  ;;  %vm2777_vm4 = vcmp.eq.f32.partialorder %v2776_v10, 8.507059e+37  ;;  %v2779_v35 = vor.u32 1.1754944e-38, %v2778_v34 }
 0x979   :  { %vm2802_vm6 = vweird.f32 %v6155_v57  ;;  %v2808_v62 = vand.u32 2147483648, %v6155_v57  ;;  %v2823_v21 = vand.u32 2147483648, %v6157_v1  ;;  %vm2817_vm9 = vweird.f32 %v6157_v1 }
 0x97b   :  { %v3828_v30 = vpop.eup %3827  ;;  %v2809_v23 = vor.u32 1.1754944e-38, %v2808_v62 }
 0x97c   :  { %v3830_v36 = vpop.eup %3829  ;;  %v2753_v16 = vmul.f32 %v3828_v30, %v2750_v13  ;;  %vm2758_vm14 = vweird.f32 %v3828_v30 }
 0x97d   :  { %v2768_v55 = vmul.f32 %v3830_v36, %v2751_v19  ;;  %v3832_v48 = vpop.eup %3831  ;;  %vm2773_vm0 = vweird.f32 %v3830_v36  ;;  %vm2759_vm3 = vmor %vm2757_vm13, %vm2758_vm14 }
 0x97e   :  { %v2754_v4 = vsub.f32 1.0, %v2753_v16  ;;  %v3834_v27 = vpop.eup %3833  ;;  %v2798_v2 = vmul.f32 %v3832_v48, %v6155_v57  ;;  %vm2774_vm5 = vmor %vm2772_vm15, %vm2773_vm0  ;;  %vm2803_vm7 = vweird.f32 %v3832_v48  ;;  %v2806_v16 = vand.u32 2147483647, %v6155_v57 }
 0x97f   :  { %v2769_v24 = vsub.f32 1.0, %v2768_v55  ;;  %v2813_v58 = vmul.f32 %v3834_v27, %v6157_v1  ;;  %vm2818_vm8 = vweird.f32 %v3834_v27  ;;  %vm2804_vm10 = vmor %vm2802_vm6, %vm2803_vm7  ;;  %v2821_v55 = vand.u32 2147483647, %v6157_v1 }
 0x980   :  { %v2755_v54 = vmul.f32 %v3828_v30, %v2754_v4  ;;  %v2799_v40 = vsub.f32 1.0, %v2798_v2  ;;  %vm2819_vm11 = vmor %vm2817_vm9, %vm2818_vm8  ;;  %vm2807_vm12 = vcmp.eq.f32.partialorder %v2806_v16, 8.507059e+37  ;;  %v2842_v57 = vrot.slane %v6092_v38, 7 }
 0x981   :  { %v2770_v51 = vmul.f32 %v3830_v36, %v2769_v24  ;;  %v2814_v47 = vsub.f32 1.0, %v2813_v58  ;;  %vm2822_vm13 = vcmp.eq.f32.partialorder %v2821_v55, 8.507059e+37  ;;  %v2843_v2 = vrot.slane %v6094_v26, 7 }
 0x982   :  { %v2756_v44 = vadd.f32 %v3828_v30, %v2755_v54  ;;  %v2800_v37 = vmul.f32 %v3832_v48, %v2799_v40 }
 0x983   :  { %v2771_v63 = vadd.f32 %v3830_v36, %v2770_v51  ;;  %v2815_v13 = vmul.f32 %v3834_v27, %v2814_v47 }
 0x984   :  { %v2760_v15 = vsel %vm2759_vm3, %v3828_v30, %v2756_v44  ;;  %v2801_v33 = vadd.f32 %v3832_v48, %v2800_v37 }
 0x985   :  { %v2765_v20 = vsel %vm2762_vm2, %v2764_v14, %v2760_v15  ;;  %v2775_v17 = vsel %vm2774_vm5, %v3830_v36, %v2771_v63  ;;  %v2816_v30 = vadd.f32 %v3834_v27, %v2815_v13 }
 0x986   :  { %v2780_v41 = vsel %vm2777_vm4, %v2779_v35, %v2775_v17  ;;  %v2832_v19 = vmul.f32 %v2828_v29, %v2765_v20  ;;  %v2805_v4 = vsel %vm2804_vm10, %v3832_v48, %v2801_v33 }
 0x987   :  { %v2833_v43 = vmul.f32 %v2829_v39, %v2780_v41  ;;  %v2820_v22 = vsel %vm2819_vm11, %v3834_v27, %v2816_v30  ;;  %v2824_v39 = vor.u32 1.1754944e-38, %v2823_v21  ;;  %v2810_v24 = vsel %vm2807_vm12, %v2809_v23, %v2805_v4 }
 0x988   :  { %v2834_v36 = vadd.f32 %v2832_v19, %v5714_v3  ;;  %v2838_v34 = vsub.f32 1.0, %v2810_v24  ;;  %v2846_v58 = vmul.f32 %v2842_v57, %v2810_v24 }
 0x989   :  { %v2835_v29 = vadd.f32 %v2833_v43, %v5717_v52  ;;  %v2825_v10 = vsel %vm2822_vm13, %v2824_v39, %v2820_v22 }
 0x98a   :  { %3835 = vtanh.f32 %v2834_v36  ;;  %v2839_v1 = vsub.f32 1.0, %v2825_v10  ;;  %v2847_v14 = vmul.f32 %v2843_v2, %v2825_v10 }
 0x98b   :  { %3837 = vtanh.f32 %v2835_v29 }
 0x990   :  { %v3836_v54 = vpop.eup %3835 }
 0x991   :  { %v3838_v48 = vpop.eup %3837  ;;  %v2840_v51 = vmul.f32 %v3836_v54, %v2838_v34 }
 0x992   :  { %v2841_v44 = vmul.f32 %v3838_v48, %v2839_v1 }
 0x993   :  { %v6176_v27 = vadd.f32 %v2846_v58, %v2840_v51 }
 0x994   :  { %v6178_v40 = vadd.f32 %v2847_v14, %v2841_v44 }
 0x995   :  { %2850 = vst [vmem:[#allocation2] sm:$0x10] %v6176_v27  ;;  %v2854_v63 = vrot.slane %v6176_v27, 4 }
 0x996   :  { %2851 = vst [vmem:[#allocation2 + $0x8] sm:$0x10] %v6178_v40  ;;  %v2855_v38 = vrot.slane %v6178_v40, 3 }
 0x998   :  { %v2856_v35 = vsel %vm511_vm1, %v2855_v38, %v2854_v63 }
 0x999   :  { %2874 = vmatmul.f32.vlgmr.msrb.gmra.mxu1 %v2856_v35  ;;  %2894 = vmatmul.f32.vlgmr.msra.gmra.mxu2 %v2856_v35 }
 0x99a   :  { %2914 = vmatmul.f32.vlgmr.msra.gmra.mxu3 %v2856_v35  ;;  %3260 = vmatpush.msrb.mxu1 %v5841_v18 }
 0x99c   :  { %3261 = vmatpush.msrb.mxu1 %v5848_v49 }
 0x99e   :  { %3262 = vmatpush.msrb.mxu1 %v5855_v59 }
 0x9a0   :  { %3263 = vmatpush.msrb.mxu1 %v5984_v31 }
 0x9a2   :  { %3264 = vmatpush.msrb.mxu1 %v5989_v32 }
 0x9a4   :  { %3265 = vmatpush.msrb.mxu1 %v5994_v28 }
 0x9a6   :  { %3266 = vmatpush.msrb.mxu1 %v5999_v11 }
 0x9a8   :  { %3267 = vmatpush.msrb.mxu1 %v6004_v46 }
 0x9aa   :  { %3268 = vmatpush.msrb.mxu1 %v6009_v60 }
 0x9ac   :  { %3269 = vmatpush.msrb.mxu1 %v6014_v7 }
 0x9ae   :  { %3270 = vmatpush.msrb.mxu1 %v6019_v0 }
 0x9b0   :  { %3271 = vmatpush.msrb.mxu1 %v6631_v45 }
 0x9b2   :  { %3272 = vmatpush.msrb.mxu1 %v6634_v6 }
 0x9b4   :  { %3273 = vmatpush.msrb.mxu1 %v6637_v56 }
 0x9b6   :  { %3274 = vmatpush.msrb.mxu1 %v6640_v9 }
 0x9b8   :  { %3275 = vmatpush.msrb.mxu1 %v6643_v61 }
 0xa16   :  { %v2875_v18 = vpop.f32.mrf.mxu1 }
 0xa17   :  { %v2876_v49 = vadd.f32 %v2875_v18, %v6646_v50 }
 0xa19   :  { %v2919_v59 = vrot.slane %v2876_v49, 3  ;;  %v2920_v31 = vrot.slane %v2876_v49, 4 }
 0xa1b   :  { %v2923_v32 = vadd.f32 %v2919_v59, %v6648_v5  ;;  %v2924_v28 = vadd.f32 %v2920_v31, %v6649_v25 }
 0xa1c   :  { %v2895_v11 = vpop.f32.mrf.mxu2 }
 0xa1d   :  { %v3549_v46 = vmul.f32 -1.442695, %v2923_v32  ;;  %v3550_v60 = vmul.f32 -1.442695, %v2924_v28  ;;  %v2896_v7 = vadd.f32 %v2895_v11, %v6647_v8  ;;  %v2915_v13 = vpop.f32.mrf.mxu3 }
 0xa1e   :  { %v2916_v43 = vadd.f32 %v2915_v13, %v6652_v53  ;;  %v3024_v13 = vrot.slane %v6178_v40, 7 }
 0xa1f   :  { %3839 = vpow2.f32 %v3549_v46  ;;  %v2964_v0 = vrot.slane %v2896_v7, 3  ;;  %v2965_v26 = vrot.slane %v2896_v7, 4 }
 0xa20   :  { %3841 = vpow2.f32 %v3550_v60  ;;  %v3009_v39 = vrot.slane %v2916_v43, 3  ;;  %v3010_v34 = vrot.slane %v2916_v43, 4 }
 0xa21   :  { %v2968_v45 = vadd.f32 %v2964_v0, %v6650_v42  ;;  %v2969_v6 = vadd.f32 %v2965_v26, %v6651_v12 }
 0xa23   :  { %v3551_v56 = vmul.f32 -1.442695, %v2968_v45  ;;  %v3552_v9 = vmul.f32 -1.442695, %v2969_v6 }
 0xa25   :  { %v3840_v61 = vpop.eup %3839  ;;  %3843 = vpow2.f32 %v3551_v56 }
 0xa26   :  { %v3842_v47 = vpop.eup %3841  ;;  %v2931_v15 = vadd.f32 1.0, %v3840_v61  ;;  %3845 = vpow2.f32 %v3552_v9 }
 0xa27   :  { %v2932_v37 = vadd.f32 1.0, %v3842_v47 }
 0xa28   :  { %3847 = vrcp.f32 %v2931_v15  ;;  %v2942_v55 = vand.u32 2147483647, %v2931_v15  ;;  %v2944_v36 = vand.u32 2147483648, %v2931_v15  ;;  %vm2938_vm15 = vweird.f32 %v2931_v15 }
 0xa29   :  { %3849 = vrcp.f32 %v2932_v37  ;;  %v2957_v29 = vand.u32 2147483647, %v2932_v37  ;;  %v2959_v22 = vand.u32 2147483648, %v2932_v37  ;;  %vm2953_vm3 = vweird.f32 %v2932_v37 }
 0xa2a   :  { %vm2943_vm2 = vcmp.eq.f32.partialorder %v2942_v55, 8.507059e+37  ;;  %v2945_v48 = vor.u32 1.1754944e-38, %v2944_v36 }
 0xa2b   :  { %v3844_v62 = vpop.eup %3843  ;;  %vm2958_vm5 = vcmp.eq.f32.partialorder %v2957_v29, 8.507059e+37  ;;  %v2960_v63 = vor.u32 1.1754944e-38, %v2959_v22 }
 0xa2c   :  { %v3846_v20 = vpop.eup %3845  ;;  %v6207_v17 = vadd.f32 1.0, %v3844_v62  ;;  %v3023_v62 = vrot.slane %v6176_v27, 7 }
 0xa2d   :  { %v6209_v41 = vadd.f32 1.0, %v3846_v20 }
 0xa2e   :  { %v3848_v19 = vpop.eup %3847  ;;  %3851 = vrcp.f32 %v6207_v17  ;;  %v2989_v44 = vand.u32 2147483648, %v6207_v17  ;;  %v2987_v49 = vand.u32 2147483647, %v6207_v17  ;;  %vm2983_vm9 = vweird.f32 %v6207_v17 }
 0xa2f   :  { %v3850_v33 = vpop.eup %3849  ;;  %3853 = vrcp.f32 %v6209_v41  ;;  %v2934_v21 = vmul.f32 %v3848_v19, %v2931_v15  ;;  %vm2939_vm14 = vweird.f32 %v3848_v19  ;;  %v3004_v11 = vand.u32 2147483648, %v6209_v41 }
 0xa30   :  { %v2949_v16 = vmul.f32 %v3850_v33, %v2932_v37  ;;  %vm2954_vm0 = vweird.f32 %v3850_v33  ;;  %vm2940_vm4 = vmor %vm2938_vm15, %vm2939_vm14  ;;  %v3002_v7 = vand.u32 2147483647, %v6209_v41  ;;  %vm2998_vm11 = vweird.f32 %v6209_v41 }
 0xa31   :  { %v2935_v30 = vsub.f32 1.0, %v2934_v21  ;;  %vm2955_vm6 = vmor %vm2953_vm3, %vm2954_vm0  ;;  %v2990_v6 = vor.u32 1.1754944e-38, %v2989_v44  ;;  %v3005_v9 = vor.u32 1.1754944e-38, %v3004_v11  ;;  %vm2988_vm13 = vcmp.eq.f32.partialorder %v2987_v49, 8.507059e+37 }
 0xa32   :  { %v2950_v4 = vsub.f32 1.0, %v2949_v16  ;;  %vm3003_vm14 = vcmp.eq.f32.partialorder %v3002_v7, 8.507059e+37 }
 0xa33   :  { %v2936_v23 = vmul.f32 %v3848_v19, %v2935_v30 }
 0xa34   :  { %v3852_v24 = vpop.eup %3851  ;;  %v2951_v10 = vmul.f32 %v3850_v33, %v2950_v4 }
 0xa35   :  { %v3854_v57 = vpop.eup %3853  ;;  %v2979_v54 = vmul.f32 %v3852_v24, %v6207_v17  ;;  %v2937_v1 = vadd.f32 %v3848_v19, %v2936_v23  ;;  %vm2984_vm7 = vweird.f32 %v3852_v24 }
 0xa36   :  { %v2994_v2 = vmul.f32 %v3854_v57, %v6209_v41  ;;  %v2952_v51 = vadd.f32 %v3850_v33, %v2951_v10  ;;  %vm2999_vm8 = vweird.f32 %v3854_v57  ;;  %vm2985_vm10 = vmor %vm2983_vm9, %vm2984_vm7 }
 0xa37   :  { %v2980_v58 = vsub.f32 1.0, %v2979_v54  ;;  %v2941_v14 = vsel %vm2940_vm4, %v3848_v19, %v2937_v1  ;;  %vm3000_vm12 = vmor %vm2998_vm11, %vm2999_vm8 }
 0xa38   :  { %v2995_v38 = vsub.f32 1.0, %v2994_v2  ;;  %v2946_v35 = vsel %vm2943_vm2, %v2945_v48, %v2941_v14  ;;  %v2956_v18 = vsel %vm2955_vm6, %v3850_v33, %v2952_v51 }
 0xa39   :  { %v2981_v59 = vmul.f32 %v3852_v24, %v2980_v58  ;;  %v2961_v31 = vsel %vm2958_vm5, %v2960_v63, %v2956_v18  ;;  %v3013_v32 = vmul.f32 %v3009_v39, %v2946_v35 }
 0xa3a   :  { %v2996_v28 = vmul.f32 %v3854_v57, %v2995_v38  ;;  %v3014_v46 = vmul.f32 %v3010_v34, %v2961_v31 }
 0xa3b   :  { %v2982_v60 = vadd.f32 %v3852_v24, %v2981_v59  ;;  %v3015_v0 = vadd.f32 %v3013_v32, %v5714_v3 }
 0xa3c   :  { %v2997_v26 = vadd.f32 %v3854_v57, %v2996_v28  ;;  %v3016_v45 = vadd.f32 %v3014_v46, %v5717_v52 }
 0xa3d   :  { %v2986_v56 = vsel %vm2985_vm10, %v3852_v24, %v2982_v60  ;;  %3855 = vtanh.f32 %v3015_v0 }
 0xa3e   :  { %v3001_v61 = vsel %vm3000_vm12, %v3854_v57, %v2997_v26  ;;  %3857 = vtanh.f32 %v3016_v45  ;;  %v2991_v47 = vsel %vm2988_vm13, %v2990_v6, %v2986_v56 }
 0xa3f   :  { %v3006_v15 = vsel %vm3003_vm14, %v3005_v9, %v3001_v61  ;;  %v3019_v37 = vsub.f32 1.0, %v2991_v47  ;;  %v3027_v33 = vmul.f32 %v3023_v62, %v2991_v47 }
 0xa40   :  { %v3020_v17 = vsub.f32 1.0, %v3006_v15  ;;  %v3028_v21 = vmul.f32 %v3024_v13, %v3006_v15 }
 0xa43   :  { %v3856_v20 = vpop.eup %3855 }
 0xa44   :  { %v3858_v41 = vpop.eup %3857  ;;  %v3021_v19 = vmul.f32 %v3856_v20, %v3019_v37 }
 0xa45   :  { %v3022_v43 = vmul.f32 %v3858_v41, %v3020_v17 }
 0xa46   :  { %v6227_v16 = vadd.f32 %v3027_v33, %v3021_v19 }
 0xa47   :  { %v6229_v30 = vadd.f32 %v3028_v21, %v3022_v43 }
 0xa48   :  { %3031 = vst [vmem:[#allocation2] sm:$0x20] %v6227_v16  ;;  %v3035_v55 = vrot.slane %v6227_v16, 5 }
 0xa49   :  { %3032 = vst [vmem:[#allocation2 + $0x8] sm:$0x20] %v6229_v30  ;;  %v3036_v27 = vrot.slane %v6229_v30, 4 }
 0xa4b   :  { %v3037_v36 = vsel %vm511_vm1, %v3036_v27, %v3035_v55 }
 0xa4c   :  { %3055 = vmatmul.f32.vlgmr.msra.gmra.mxu0 %v3037_v36  ;;  %3075 = vmatmul.f32.vlgmr.msra.gmra.mxu1 %v3037_v36 }
 0xa4d   :  { %3095 = vmatmul.f32.vlgmr.msrb.gmra.mxu2 %v3037_v36 }
 0xac9   :  { %v3056_v40 = vpop.f32.mrf.mxu0  ;;  %v3076_v4 = vpop.f32.mrf.mxu1 }
 0xaca   :  { %v3057_v29 = vadd.f32 %v3056_v40, %v6646_v50  ;;  %v3077_v23 = vadd.f32 %v3076_v4, %v6647_v8 }
 0xacc   :  { %v3100_v22 = vrot.slane %v3057_v29, 2  ;;  %v3101_v39 = vrot.slane %v3057_v29, 3  ;;  %v3145_v24 = vrot.slane %v3077_v23, 2  ;;  %v3146_v10 = vrot.slane %v3077_v23, 3 }
 0xace   :  { %v3104_v34 = vadd.f32 %v3100_v22, %v6648_v5  ;;  %v3105_v57 = vadd.f32 %v3101_v39, %v6649_v25  ;;  %v3149_v54 = vadd.f32 %v3145_v24, %v6650_v42  ;;  %v3150_v1 = vadd.f32 %v3146_v10, %v6651_v12 }
 0xad0   :  { %v3553_v2 = vmul.f32 -1.442695, %v3104_v34  ;;  %v3554_v48 = vmul.f32 -1.442695, %v3105_v57  ;;  %v3555_v51 = vmul.f32 -1.442695, %v3149_v54  ;;  %v3096_v31 = vpop.f32.mrf.mxu2 }
 0xad1   :  { %v3556_v58 = vmul.f32 -1.442695, %v3150_v1  ;;  %v3097_v32 = vadd.f32 %v3096_v31, %v6652_v53 }
 0xad2   :  { %3859 = vpow2.f32 %v3553_v2 }
 0xad3   :  { %3861 = vpow2.f32 %v3554_v48  ;;  %v3190_v56 = vrot.slane %v3097_v32, 2  ;;  %v3191_v41 = vrot.slane %v3097_v32, 3 }
 0xad4   :  { %3863 = vpow2.f32 %v3555_v51 }
 0xad5   :  { %3865 = vpow2.f32 %v3556_v58 }
 0xad8   :  { %v3860_v44 = vpop.eup %3859 }
 0xad9   :  { %v3862_v14 = vpop.eup %3861  ;;  %v3112_v63 = vadd.f32 1.0, %v3860_v44 }
 0xada   :  { %v3864_v38 = vpop.eup %3863  ;;  %v3113_v35 = vadd.f32 1.0, %v3862_v14 }
 0xadb   :  { %v3866_v18 = vpop.eup %3865  ;;  %3867 = vrcp.f32 %v3112_v63  ;;  %v6242_v49 = vadd.f32 1.0, %v3864_v38  ;;  %v3123_v6 = vand.u32 2147483647, %v3112_v63  ;;  %v3125_v61 = vand.u32 2147483648, %v3112_v63 }
 0xadc   :  { %3869 = vrcp.f32 %v3113_v35  ;;  %v6244_v59 = vadd.f32 1.0, %v3866_v18  ;;  %v3138_v15 = vand.u32 2147483647, %v3113_v35  ;;  %v3140_v20 = vand.u32 2147483648, %v3113_v35 }
 0xadd   :  { %3871 = vrcp.f32 %v6242_v49  ;;  %vm3119_vm2 = vweird.f32 %v3112_v63  ;;  %vm3134_vm3 = vweird.f32 %v3113_v35  ;;  %v3170_v43 = vand.u32 2147483648, %v6242_v49 }
 0xade   :  { %3873 = vrcp.f32 %v6244_v59  ;;  %v3126_v55 = vor.u32 1.1754944e-38, %v3125_v61  ;;  %vm3124_vm5 = vcmp.eq.f32.partialorder %v3123_v6, 8.507059e+37  ;;  %vm3139_vm7 = vcmp.eq.f32.partialorder %v3138_v15, 8.507059e+37 }
 0xadf   :  { %v3141_v40 = vor.u32 1.1754944e-38, %v3140_v20  ;;  %vm3164_vm10 = vweird.f32 %v6242_v49  ;;  %v3185_v10 = vand.u32 2147483648, %v6244_v59  ;;  %v3168_v34 = vand.u32 2147483647, %v6242_v49 }
 0xae0   :  { %vm3179_vm12 = vweird.f32 %v6244_v59  ;;  %v3183_v54 = vand.u32 2147483647, %v6244_v59  ;;  %v3171_v51 = vor.u32 1.1754944e-38, %v3170_v43 }
 0xae1   :  { %v3868_v28 = vpop.eup %3867  ;;  %v3186_v44 = vor.u32 1.1754944e-38, %v3185_v10  ;;  %vm3169_vm14 = vcmp.eq.f32.partialorder %v3168_v34, 8.507059e+37  ;;  %v3410_v10 = vld [vmem:[#allocation17 + $0x28] sm:$0xff] }
 0xae2   :  { %v3870_v11 = vpop.eup %3869  ;;  %v3115_v46 = vmul.f32 %v3868_v28, %v3112_v63  ;;  %vm3120_vm15 = vweird.f32 %v3868_v28 }
 0xae3   :  { %v3872_v60 = vpop.eup %3871  ;;  %v3130_v7 = vmul.f32 %v3870_v11, %v3113_v35  ;;  %vm3135_vm0 = vweird.f32 %v3870_v11  ;;  %vm3121_vm4 = vmor %vm3119_vm2, %vm3120_vm15  ;;  %vm3184_vm15 = vcmp.eq.f32.partialorder %v3183_v54, 8.507059e+37  ;;  %v3204_v35 = vrot.slane %v6227_v16, 7  ;;  %v3409_v54 = vld [vmem:[#allocation17 + $0x20] sm:$0xff] }
 0xae4   :  { %v3874_v0 = vpop.eup %3873  ;;  %v3160_v26 = vmul.f32 %v3872_v60, %v6242_v49  ;;  %v3116_v45 = vsub.f32 1.0, %v3115_v46  ;;  %vm3136_vm6 = vmor %vm3134_vm3, %vm3135_vm0  ;;  %vm3165_vm8 = vweird.f32 %v3872_v60 }
 0xae5   :  { %v3175_v9 = vmul.f32 %v3874_v0, %v6244_v59  ;;  %v3131_v47 = vsub.f32 1.0, %v3130_v7  ;;  %vm3180_vm9 = vweird.f32 %v3874_v0  ;;  %vm3166_vm11 = vmor %vm3164_vm10, %vm3165_vm8  ;;  %v3205_v59 = vrot.slane %v6229_v30, 7 }
 0xae6   :  { %v3161_v37 = vsub.f32 1.0, %v3160_v26  ;;  %v3117_v62 = vmul.f32 %v3868_v28, %v3116_v45  ;;  %vm3181_vm13 = vmor %vm3179_vm12, %vm3180_vm9 }
 0xae7   :  { %v3176_v17 = vsub.f32 1.0, %v3175_v9  ;;  %v3132_v13 = vmul.f32 %v3870_v11, %v3131_v47  ;;  %v3420_v9 = vld [vmem:[#allocation17 + $0x78] sm:$0xff] }
 0xae8   :  { %v3162_v19 = vmul.f32 %v3872_v60, %v3161_v37  ;;  %v3118_v33 = vadd.f32 %v3868_v28, %v3117_v62  ;;  %3425 = vmatpush.msra.mxu2 %v3420_v9  ;;  %v3419_v37 = vld [vmem:[#allocation17 + $0x70] sm:$0xff] }
 0xae9   :  { %v3177_v21 = vmul.f32 %v3874_v0, %v3176_v17  ;;  %v3133_v27 = vadd.f32 %v3870_v11, %v3132_v13  ;;  %v3418_v13 = vld [vmem:[#allocation17 + $0x68] sm:$0xff] }
 0xaea   :  { %v3122_v36 = vsel %vm3121_vm4, %v3868_v28, %v3118_v33  ;;  %v3163_v23 = vadd.f32 %v3872_v60, %v3162_v19  ;;  %3426 = vmatpush.msra.mxu2 %v3419_v37 }
 0xaeb   :  { %v3127_v4 = vsel %vm3124_vm5, %v3126_v55, %v3122_v36  ;;  %v3137_v29 = vsel %vm3136_vm6, %v3870_v11, %v3133_v27  ;;  %v3178_v39 = vadd.f32 %v3874_v0, %v3177_v21  ;;  %v3415_v55 = vld [vmem:[#allocation17 + $0x50] sm:$0xff] }
 0xaec   :  { %v3142_v22 = vsel %vm3139_vm7, %v3141_v40, %v3137_v29  ;;  %v3194_v24 = vmul.f32 %v3190_v56, %v3127_v4  ;;  %v3167_v2 = vsel %vm3166_vm11, %v3872_v60, %v3163_v23  ;;  %3427 = vmatpush.msra.mxu2 %v3418_v13  ;;  %v3414_v40 = vld [vmem:[#allocation17 + $0x48] sm:$0xff] }
 0xaed   :  { %v3195_v57 = vmul.f32 %v3191_v41, %v3142_v22  ;;  %v3182_v58 = vsel %vm3181_vm13, %v3874_v0, %v3178_v39  ;;  %v3172_v14 = vsel %vm3169_vm14, %v3171_v51, %v3167_v2  ;;  %v3411_v39 = vld [vmem:[#allocation17 + $0x30] sm:$0xff] }
 0xaee   :  { %v3196_v1 = vadd.f32 %v3194_v24, %v5714_v3  ;;  %v3187_v63 = vsel %vm3184_vm15, %v3186_v44, %v3182_v58  ;;  %v3200_v38 = vsub.f32 1.0, %v3172_v14  ;;  %v3208_v28 = vmul.f32 %v3204_v35, %v3172_v14  ;;  %v3407_v51 = vld [vmem:[#allocation17 + $0x10] sm:$0xff] }
 0xaef   :  { %v3197_v48 = vadd.f32 %v3195_v57, %v5717_v52  ;;  %v3201_v49 = vsub.f32 1.0, %v3187_v63  ;;  %v3209_v46 = vmul.f32 %v3205_v59, %v3187_v63  ;;  %v3406_v63 = vld [vmem:[#allocation17 + $0x8] sm:$0xff]  ;;  %v3405_v59 = vld [vmem:[#allocation17] sm:$0xff] }
 0xaf0   :  { %3875 = vtanh.f32 %v3196_v1  ;;  %v3408_v1 = vld [vmem:[#allocation17 + $0x18] sm:$0xff] }
 0xaf1   :  { %3877 = vtanh.f32 %v3197_v48 }
 0xaf6   :  { %v3876_v18 = vpop.eup %3875 }
 0xaf7   :  { %v3878_v31 = vpop.eup %3877  ;;  %v3202_v32 = vmul.f32 %v3876_v18, %v3200_v38 }
 0xaf8   :  { %v3203_v11 = vmul.f32 %v3878_v31, %v3201_v49 }
 0xaf9   :  { %v6261_v60 = vadd.f32 %v3208_v28, %v3202_v32 }
 0xafa   :  { %v6263_v7 = vadd.f32 %v3209_v46, %v3203_v11 }
 0xafb   :  { %3212 = vst [vmem:[#allocation2] sm:$0x40] %v6261_v60  ;;  %v3216_v0 = vrot.slane %v6261_v60, 6 }
 0xafc   :  { %3213 = vst [vmem:[#allocation2 + $0x8] sm:$0x40] %v6263_v7  ;;  %v3217_v16 = vrot.slane %v6263_v7, 5 }
 0xafe   :  { %v3218_v26 = vsel %vm511_vm1, %v3217_v16, %v3216_v0 }
 0xaff   :  { %3236 = vmatmul.f32.vlgmr.msrb.gmra.mxu3 %v3218_v26  ;;  %3256 = vmatmul.f32.vlgmr.msrb.gmra.mxu0 %v3218_v26 }
 0xb00   :  { %3276 = vmatmul.f32.vlgmr.msrb.gmra.mxu1 %v3218_v26 }
 0xb7c   :  { %v3257_v30 = vpop.f32.mrf.mxu0 }
 0xb7d   :  { %v3258_v45 = vadd.f32 %v3257_v30, %v6647_v8  ;;  %v3417_v8 = vld [vmem:[#allocation17 + $0x60] sm:$0xff]  ;;  %v3277_v2 = vpop.f32.mrf.mxu1 }
 0xb7e   :  { %3428 = vmatpush.msra.mxu2 %v3417_v8  ;;  %v3278_v14 = vadd.f32 %v3277_v2, %v6652_v53 }
 0xb7f   :  { %v3326_v6 = vrot.slane %v3258_v45, 1  ;;  %v3327_v56 = vrot.slane %v3258_v45, 2 }
 0xb80   :  { %v3371_v28 = vrot.slane %v3278_v14, 1 }
 0xb81   :  { %v3330_v61 = vadd.f32 %v3326_v6, %v6650_v42  ;;  %v3331_v47 = vadd.f32 %v3327_v56, %v6651_v12  ;;  %v3416_v12 = vld [vmem:[#allocation17 + $0x58] sm:$0xff]  ;;  %v3372_v56 = vrot.slane %v3278_v14, 2 }
 0xb82   :  { %v3237_v15 = vpop.f32.mrf.mxu3  ;;  %3429 = vmatpush.msra.mxu2 %v3416_v12 }
 0xb83   :  { %v3559_v62 = vmul.f32 -1.442695, %v3330_v61  ;;  %v3560_v20 = vmul.f32 -1.442695, %v3331_v47  ;;  %v3238_v17 = vadd.f32 %v3237_v15, %v6646_v50 }
 0xb84   :  { %3430 = vmatpush.msra.mxu2 %v3415_v55 }
 0xb85   :  { %3879 = vpow2.f32 %v3559_v62  ;;  %v3281_v41 = vrot.slane %v3238_v17, 1  ;;  %v3282_v19 = vrot.slane %v3238_v17, 2 }
 0xb86   :  { %3881 = vpow2.f32 %v3560_v20  ;;  %3431 = vmatpush.msra.mxu2 %v3414_v40 }
 0xb87   :  { %v3285_v33 = vadd.f32 %v3281_v41, %v6648_v5  ;;  %v3286_v42 = vadd.f32 %v3282_v19, %v6649_v25  ;;  %v3413_v5 = vld [vmem:[#allocation17 + $0x40] sm:$0xff]  ;;  %v3412_v25 = vld [vmem:[#allocation17 + $0x38] sm:$0xff] }
 0xb88   :  { %3432 = vmatpush.msra.mxu2 %v3413_v5 }
 0xb89   :  { %v3557_v43 = vmul.f32 -1.442695, %v3285_v33  ;;  %v3558_v21 = vmul.f32 -1.442695, %v3286_v42 }
 0xb8a   :  { %3433 = vmatpush.msra.mxu2 %v3412_v25 }
 0xb8b   :  { %v3880_v27 = vpop.eup %3879  ;;  %3883 = vpow2.f32 %v3557_v43 }
 0xb8c   :  { %v3882_v50 = vpop.eup %3881  ;;  %v6276_v36 = vadd.f32 1.0, %v3880_v27  ;;  %3885 = vpow2.f32 %v3558_v21  ;;  %3434 = vmatpush.msra.mxu2 %v3411_v39 }
 0xb8d   :  { %v6278_v4 = vadd.f32 1.0, %v3882_v50 }
 0xb8e   :  { %3887 = vrcp.f32 %v6276_v36  ;;  %3435 = vmatpush.msra.mxu2 %v3410_v10  ;;  %v3351_v61 = vand.u32 2147483648, %v6276_v36  ;;  %vm3345_vm10 = vweird.f32 %v6276_v36  ;;  %v3349_v33 = vand.u32 2147483647, %v6276_v36 }
 0xb8f   :  { %3889 = vrcp.f32 %v6278_v4  ;;  %v3366_v42 = vand.u32 2147483648, %v6278_v4  ;;  %vm3360_vm12 = vweird.f32 %v6278_v4  ;;  %v3364_v43 = vand.u32 2147483647, %v6278_v4 }
 0xb90   :  { %3436 = vmatpush.msra.mxu2 %v3409_v54  ;;  %v3352_v50 = vor.u32 1.1754944e-38, %v3351_v61  ;;  %vm3350_vm14 = vcmp.eq.f32.partialorder %v3349_v33, 8.507059e+37 }
 0xb91   :  { %v3884_v29 = vpop.eup %3883  ;;  %v3367_v40 = vor.u32 1.1754944e-38, %v3366_v42  ;;  %vm3365_vm15 = vcmp.eq.f32.partialorder %v3364_v43, 8.507059e+37 }
 0xb92   :  { %v3886_v23 = vpop.eup %3885  ;;  %v3293_v22 = vadd.f32 1.0, %v3884_v29  ;;  %3437 = vmatpush.msra.mxu2 %v3408_v1  ;;  %v3385_v29 = vrot.slane %v6261_v60, 7 }
 0xb93   :  { %v3294_v24 = vadd.f32 1.0, %v3886_v23 }
 0xb94   :  { %3891 = vrcp.f32 %v3293_v22  ;;  %v6282_v34 = vpop.eup %3887  ;;  %3438 = vmatpush.msra.mxu2 %v3407_v51  ;;  %v3306_v11 = vand.u32 2147483648, %v3293_v22  ;;  %v3304_v16 = vand.u32 2147483647, %v3293_v22  ;;  %vm3300_vm2 = vweird.f32 %v3293_v22 }
 0xb95   :  { %3893 = vrcp.f32 %v3294_v24  ;;  %v6284_v57 = vpop.eup %3889  ;;  %v3341_v48 = vmul.f32 %v6282_v34, %v6276_v36  ;;  %v3321_v26 = vand.u32 2147483648, %v3294_v24  ;;  %v3319_v45 = vand.u32 2147483647, %v3294_v24 }
 0xb96   :  { %v3356_v58 = vmul.f32 %v6284_v57, %v6278_v4  ;;  %3439 = vmatpush.msra.mxu2 %v3406_v63  ;;  %v3307_v47 = vor.u32 1.1754944e-38, %v3306_v11  ;;  %vm3315_vm4 = vweird.f32 %v3294_v24  ;;  %vm3346_vm5 = vweird.f32 %v6282_v34 }
 0xb97   :  { %v3342_v18 = vsub.f32 1.0, %v3341_v48  ;;  %vm3305_vm6 = vcmp.eq.f32.partialorder %v3304_v16, 8.507059e+37  ;;  %v3322_v62 = vor.u32 1.1754944e-38, %v3321_v26  ;;  %vm3320_vm8 = vcmp.eq.f32.partialorder %v3319_v45, 8.507059e+37  ;;  %vm3347_vm11 = vmor %vm3345_vm10, %vm3346_vm5 }
 0xb98   :  { %v3357_v31 = vsub.f32 1.0, %v3356_v58  ;;  %3440 = vmatpush.msra.mxu2 %v3405_v59  ;;  %vm3361_vm9 = vweird.f32 %v6284_v57 }
 0xb99   :  { %v3343_v53 = vmul.f32 %v6282_v34, %v3342_v18  ;;  %vm3362_vm13 = vmor %vm3360_vm12, %vm3361_vm9 }
 0xb9a   :  { %v3892_v44 = vpop.eup %3891  ;;  %v3358_v6 = vmul.f32 %v6284_v57, %v3357_v31 }
 0xb9b   :  { %v3894_v38 = vpop.eup %3893  ;;  %v3296_v35 = vmul.f32 %v3892_v44, %v3293_v22  ;;  %vm3301_vm1 = vweird.f32 %v3892_v44  ;;  %v3344_v20 = vadd.f32 %v6282_v34, %v3343_v53 }
 0xb9c   :  { %v3311_v49 = vmul.f32 %v3894_v38, %v3294_v24  ;;  %vm3316_vm0 = vweird.f32 %v3894_v38  ;;  %vm3302_vm3 = vmor %vm3300_vm2, %vm3301_vm1  ;;  %v3359_v41 = vadd.f32 %v6284_v57, %v3358_v6 }
 0xb9d   :  { %v3297_v32 = vsub.f32 1.0, %v3296_v35  ;;  %vm3317_vm7 = vmor %vm3315_vm4, %vm3316_vm0  ;;  %v3348_v55 = vsel %vm3347_vm11, %v6282_v34, %v3344_v20 }
 0xb9e   :  { %v3312_v46 = vsub.f32 1.0, %v3311_v49  ;;  %v3363_v36 = vsel %vm3362_vm13, %v6284_v57, %v3359_v41  ;;  %v3353_v5 = vsel %vm3350_vm14, %v3352_v50, %v3348_v55 }
 0xb9f   :  { %v3298_v0 = vmul.f32 %v3892_v44, %v3297_v32  ;;  %v3368_v25 = vsel %vm3365_vm15, %v3367_v40, %v3363_v36  ;;  %v3381_v4 = vsub.f32 1.0, %v3353_v5  ;;  %v3389_v24 = vmul.f32 %v3385_v29, %v3353_v5 }
 0xba0   :  { %v3313_v30 = vmul.f32 %v3894_v38, %v3312_v46  ;;  %v3382_v22 = vsub.f32 1.0, %v3368_v25 }
 0xba1   :  { %v3299_v9 = vadd.f32 %v3892_v44, %v3298_v0 }
 0xba2   :  { %v3314_v15 = vadd.f32 %v3894_v38, %v3313_v30 }
 0xba3   :  { %v3303_v37 = vsel %vm3302_vm3, %v3892_v44, %v3299_v9 }
 0xba4   :  { %v3308_v17 = vsel %vm3305_vm6, %v3307_v47, %v3303_v37  ;;  %v3318_v13 = vsel %vm3317_vm7, %v3894_v38, %v3314_v15 }
 0xba5   :  { %v3323_v19 = vsel %vm3320_vm8, %v3322_v62, %v3318_v13  ;;  %v3375_v8 = vmul.f32 %v3371_v28, %v3308_v17 }
 0xba6   :  { %v3376_v12 = vmul.f32 %v3372_v56, %v3323_v19 }
 0xba7   :  { %v3377_v21 = vadd.f32 %v3375_v8, %v5714_v3  ;;  %v3386_v3 = vrot.slane %v6263_v7, 7  ;;  %v3578_v7 = vld [vmem:[%s6337_s11] ss:$0 sm:$0xff] }
 0xba8   :  { %v3378_v27 = vadd.f32 %v3376_v12, %v5717_v52 }
 0xba9   :  { %3895 = vtanh.f32 %v3377_v21  ;;  %v3390_v10 = vmul.f32 %v3386_v3, %v3368_v25 }
 0xbaa   :  { %3897 = vtanh.f32 %v3378_v27 }
 0xbaf   :  { %v3896_v23 = vpop.eup %3895 }
 0xbb0   :  { %v3898_v39 = vpop.eup %3897  ;;  %v3383_v52 = vmul.f32 %v3896_v23, %v3381_v4 }
 0xbb1   :  { %v3384_v34 = vmul.f32 %v3898_v39, %v3382_v22 }
 0xbb2   :  { %v3391_v57 = vadd.f32 %v3389_v24, %v3383_v52 }
 0xbb3   :  { %v3392_v54 = vadd.f32 %v3390_v10, %v3384_v34 }
 0xbb4   :  { %3393 = vst [vmem:[#allocation2] sm:$0x80] %v3391_v57 }
 0xbb5   :  { %3394 = vst [vmem:[#allocation2 + $0x8] sm:$0x80] %v3392_v54  ;;  %v3397_v1 = vrot.slane %v3392_v54, 7 }
 0xbb6   :  { %3401 = vst [vmem:[#allocation19 - $0x5] sm:$0x80] %v3391_v57 }
 0xbb7   :  { %3402 = vst [vmem:[#allocation19 + $0x3] sm:$0x1] %v3397_v1 }
 0xbb8   :  { %3475 = dma.vmem_to_hbm [thread:$0]  %s3468_s23, 64, %s3470_s25, [#allocation20], %s4274_s30, %s4274_s30, %s4275_s14  }
 0xbbb   :  { %v3403_v2 = vld [vmem:[#allocation2] sm:$0xff] }
 0xbbc   :  { %3441 = vmatmul.f32.vlgmr.msra.gmra.mxu2 %v3403_v2  ;;  %v3404_v60 = vld [vmem:[#allocation2 + $0x8] sm:$0xff] }
 0xbc4   :  { %3444 = vmatmul.f32.gmra.mxu2 %v3404_v60 }
 0xc3f   :  { %v3442_v48 = vpop.f32.mrf.mxu2 }
 0xc40   :  { %v3443_v51 = vadd.f32 %v3578_v7, %v3442_v48 }
 0xc42   :  { %3448 = vst [vmem:[#allocation18] sm:$0xff] %v3443_v51 }
 0xc47   :  { %v3445_v58 = vpop.f32.mrf.mxu2 }
 0xc48   :  { %v3446_v44 = vadd.f32 %v3578_v7, %v3445_v58 }
 0xc4a   :  { %3449 = vst [vmem:[#allocation18 + $0x8] sm:$0xff] %v3446_v44 }
 0xc4b   :  { %3462 = dma.vmem_to_hbm [thread:$0]  %s3455_s2, 256, %s3457_s28, [#allocation5], %s4282_s1, %s4282_s1, %s4283_s24  }
 0xc4c   :  { %4269 = dma.done.wait [#allocation5], 256  }
 0xc4d   :  { %4270 = vsyncadd [#allocation5], 4294967040 }
 0xc4e   :  { %4271 = dma.done.wait [#allocation20], 64  }
 0xc4f   :  { %4272 = vsyncadd [#allocation20], 4294967232 }
 0xc50   :  { %3484 = vsyncpa [#allocation4], 1 }
 0xc51   :  { %3485 = vsyncpa [#allocation7], 1 }
 0xc52   :  { %3486 = vsyncpa [#allocation10], 1 }
 0xc53   :  { %3487 = vsyncpa [#allocation13], 1 }
 0xc54   :  { %3488 = vsyncpa [#allocation16], 1 }
 0xc55   :  { %3489 = vsyncpa [#allocation5], 1 }
 0xc56   :  { %3490 = vsyncpa [#allocation20], 1 }

</bundles_post_ra>
